<compile_context>
chip_gen: v5e
topology: v5e:2x2
jax: 0.10.0
libtpu: 0.0.40
codegen_flags: <defaults>
</compile_context>

<pallas_src>
import functools

import jax
import jax.numpy as jnp
from jax.experimental import pallas as pl
from jax.experimental.pallas import tpu as pltpu


# ----------------------------------------------------------------------------
# Pallas kernels
# ----------------------------------------------------------------------------
def _matmul_bias_kernel(x_ref, w_ref, b_ref, o_ref, *, relu):
    # x: (TM, K) bf16   w: (K, N) bf16   b: (1, N) f32   o: (TM, N)
    acc = jnp.dot(x_ref[...], w_ref[...], preferred_element_type=jnp.float32)
    out = acc + b_ref[...]
    if relu:
        out = jnp.maximum(out, 0.0)
    o_ref[...] = out.astype(o_ref.dtype)


def fused_matmul(x, w, bias, *, relu, grid_m=2, out_dtype=jnp.bfloat16):
    """out = relu?(x @ w + bias).  x:[M,K] bf16, w:[K,N] bf16, bias:[1,N] f32.

    The whole M range is split into `grid_m` blocks (>=2 so a v7x megacore can
    shard them); M is padded only to a 16*grid_m sublane granule, not to 128.
    """
    M, K = x.shape
    Kw, N = w.shape
    assert K == Kw
    granule = 16 * grid_m                      # bf16 sublane tile * grid steps
    Mp = ((M + granule - 1) // granule) * granule
    if Mp != M:
        x = jnp.pad(x, ((0, Mp - M), (0, 0)))
    tm = Mp // grid_m

    out = pl.pallas_call(
        functools.partial(_matmul_bias_kernel, relu=relu),
        out_shape=jax.ShapeDtypeStruct((Mp, N), out_dtype),
        grid_spec=pl.GridSpec(
            grid=(grid_m,),
            in_specs=[
                pl.BlockSpec((tm, K), lambda i: (i, 0)),
                pl.BlockSpec((K, N), lambda i: (0, 0)),
                pl.BlockSpec((1, N), lambda i: (0, 0)),
            ],
            out_specs=pl.BlockSpec((tm, N), lambda i: (i, 0)),
        ),
        compiler_params=pltpu.CompilerParams(
            dimension_semantics=("parallel",)),
    )(x, w, bias)
    return out[:M] if Mp != M else out


def _conv1x1_pool_kernel(a_ref, b_ref, c_ref, d_ref, w_ref, bias_ref, o_ref):
    # a/b/c/d: (1, 196, C) bf16 — the four 2x2-window members of the conv2
    # output.  Computes relu(max_i(x_i @ W) + bias)  ==  maxpool(relu(1x1conv)).
    w = w_ref[...]
    za = jnp.dot(a_ref[0], w, preferred_element_type=jnp.float32)
    zb = jnp.dot(b_ref[0], w, preferred_element_type=jnp.float32)
    zc = jnp.dot(c_ref[0], w, preferred_element_type=jnp.float32)
    zd = jnp.dot(d_ref[0], w, preferred_element_type=jnp.float32)
    z = jnp.maximum(jnp.maximum(za, zb), jnp.maximum(zc, zd)) + bias_ref[...]
    o_ref[0] = jnp.maximum(z, 0.0).astype(o_ref.dtype)


def conv1x1_bn_relu_maxpool(a, b, c, d, w, bias):
    """Fused Conv2d(32,32,1)+BN+ReLU+MaxPool2d(2,2). Inputs (B,196,C) bf16."""
    B, P, C = a.shape
    N = w.shape[1]
    return pl.pallas_call(
        _conv1x1_pool_kernel,
        out_shape=jax.ShapeDtypeStruct((B, P, N), jnp.bfloat16),
        grid_spec=pl.GridSpec(
            grid=(B,),
            in_specs=[
                pl.BlockSpec((1, P, C), lambda i: (i, 0, 0)),
                pl.BlockSpec((1, P, C), lambda i: (i, 0, 0)),
                pl.BlockSpec((1, P, C), lambda i: (i, 0, 0)),
                pl.BlockSpec((1, P, C), lambda i: (i, 0, 0)),
                pl.BlockSpec((C, N), lambda i: (0, 0)),
                pl.BlockSpec((1, N), lambda i: (0, 0)),
            ],
            out_specs=pl.BlockSpec((1, P, N), lambda i: (i, 0, 0)),
        ),
        compiler_params=pltpu.CompilerParams(
            dimension_semantics=("parallel",)),
    )(a, b, c, d, w, bias)


def _mlp_head_kernel(x_ref, w1_ref, b1_ref, w2_ref, b2_ref, w3_ref, b3_ref,
                     o_ref):
    # Linear(6272,128)+ReLU+[Dropout=id]+Linear(128,64)+ReLU+[Dropout=id]+Linear(64,10)
    h1 = jnp.dot(x_ref[...], w1_ref[...], preferred_element_type=jnp.float32)
    h1 = jnp.maximum(h1 + b1_ref[...], 0.0)
    h2 = jnp.dot(h1.astype(jnp.bfloat16), w2_ref[...],
                 preferred_element_type=jnp.float32)
    h2 = jnp.maximum(h2 + b2_ref[...], 0.0)
    out = jnp.dot(h2.astype(jnp.bfloat16), w3_ref[...],
                  preferred_element_type=jnp.float32)
    o_ref[...] = (out + b3_ref[...]).astype(o_ref.dtype)


def mlp_head(x, w1, b1, w2, b2, w3, b3):
    """Whole FC stack in one un-gridded pallas_call (no M padding to 128)."""
    B = x.shape[0]
    return pl.pallas_call(
        _mlp_head_kernel,
        out_shape=jax.ShapeDtypeStruct((B, 10), jnp.float32),
    )(x, w1, b1, w2, b2, w3, b3)


# ----------------------------------------------------------------------------
# Glue: im2col, one-time parameter preparation
# ----------------------------------------------------------------------------
def im2col_3x3_pad1(x_nhwc):
    """x: [B,H,W,C] -> [B*H*W, 9*C], patch ordering (kh, kw, cin)."""
    B, H, W, C = x_nhwc.shape
    xp = jnp.pad(x_nhwc, ((0, 0), (1, 1), (1, 1), (0, 0)))
    patches = [xp[:, dy:dy + H, dx:dx + W, :]
               for dy in range(3) for dx in range(3)]
    cols = jnp.concatenate(patches, axis=-1)          # [B,H,W,9*C]
    return cols.reshape(B * H * W, 9 * C)


def prepare_params(p, eps=1e-5):
    """One-time (outside jit): fold BN into weights, permute fc1 columns to the
    NHWC flatten order, transpose Linear weights, cast matmul operands to bf16."""

    def fold(w_kn, conv_b, g, beta, m, v):
        scale = g / jnp.sqrt(v + eps)
        bias = (conv_b - m) * scale + beta
        return ((w_kn * scale[None, :]).astype(jnp.bfloat16),
                bias.reshape(1, -1).astype(jnp.float32))

    w1 = jnp.transpose(p["w1"], (2, 3, 1, 0)).reshape(9 * 1, 16)
    w2 = jnp.transpose(p["w2"], (2, 3, 1, 0)).reshape(9 * 16, 32)
    w3 = p["w3"].reshape(32, 32).T                    # [Cin, Cout]
    w1p, b1p = fold(w1, p["b1"], p["bn1_g"], p["bn1_b"], p["bn1_m"], p["bn1_v"])
    w2p, b2p = fold(w2, p["b2"], p["bn2_g"], p["bn2_b"], p["bn2_m"], p["bn2_v"])
    w3p, b3p = fold(w3, p["b3"], p["bn3_g"], p["bn3_b"], p["bn3_m"], p["bn3_v"])

    # fc1 expects PyTorch's NCHW flatten (c*196 + h*14 + w); our features are
    # flattened NHWC ((h*14+w)*32 + c) -> permute the weight columns once.
    fc1 = (p["fc1_w"].reshape(128, 32, 14, 14)
           .transpose(0, 2, 3, 1).reshape(128, 32 * 14 * 14))
    return dict(
        w1=w1p, b1=b1p, w2=w2p, b2=b2p, w3=w3p, b3=b3p,
        fc1_w=fc1.T.astype(jnp.bfloat16),
        fc1_b=p["fc1_b"].reshape(1, -1).astype(jnp.float32),
        fc2_w=p["fc2_w"].T.astype(jnp.bfloat16),
        fc2_b=p["fc2_b"].reshape(1, -1).astype(jnp.float32),
        fc3_w=p["fc3_w"].T.astype(jnp.bfloat16),
        fc3_b=p["fc3_b"].reshape(1, -1).astype(jnp.float32),
    )


def make_params(key):
    ks = jax.random.split(key, 20)
    p = {}
    p["w1"] = 0.1 * jax.random.normal(ks[0], (16, 1, 3, 3), jnp.float32)
    p["b1"] = 0.05 * jax.random.normal(ks[1], (16,), jnp.float32)
    p["bn1_g"] = 1.0 + 0.1 * jax.random.normal(ks[2], (16,), jnp.float32)
    p["bn1_b"] = 0.1 * jax.random.normal(ks[3], (16,), jnp.float32)
    p["bn1_m"] = 0.1 * jax.random.normal(ks[4], (16,), jnp.float32)
    p["bn1_v"] = 1.0 + 0.1 * jnp.abs(jax.random.normal(ks[5], (16,), jnp.float32))
    p["w2"] = 0.1 * jax.random.normal(ks[6], (32, 16, 3, 3), jnp.float32)
    p["b2"] = 0.05 * jax.random.normal(ks[7], (32,), jnp.float32)
    p["bn2_g"] = 1.0 + 0.1 * jax.random.normal(ks[8], (32,), jnp.float32)
    p["bn2_b"] = 0.1 * jax.random.normal(ks[9], (32,), jnp.float32)
    p["bn2_m"] = 0.1 * jax.random.normal(ks[10], (32,), jnp.float32)
    p["bn2_v"] = 1.0 + 0.1 * jnp.abs(jax.random.normal(ks[11], (32,), jnp.float32))
    p["w3"] = 0.1 * jax.random.normal(ks[12], (32, 32, 1, 1), jnp.float32)
    p["b3"] = 0.05 * jax.random.normal(ks[13], (32,), jnp.float32)
    p["bn3_g"] = 1.0 + 0.1 * jax.random.normal(ks[14], (32,), jnp.float32)
    p["bn3_b"] = 0.1 * jax.random.normal(ks[15], (32,), jnp.float32)
    p["bn3_m"] = 0.1 * jax.random.normal(ks[16], (32,), jnp.float32)
    p["bn3_v"] = 1.0 + 0.1 * jnp.abs(jax.random.normal(ks[17], (32,), jnp.float32))
    kf = jax.random.split(ks[18], 6)
    p["fc1_w"] = 0.02 * jax.random.normal(kf[0], (128, 32 * 14 * 14), jnp.float32)
    p["fc1_b"] = 0.02 * jax.random.normal(kf[1], (128,), jnp.float32)
    p["fc2_w"] = 0.05 * jax.random.normal(kf[2], (64, 128), jnp.float32)
    p["fc2_b"] = 0.02 * jax.random.normal(kf[3], (64,), jnp.float32)
    p["fc3_w"] = 0.05 * jax.random.normal(kf[4], (10, 64), jnp.float32)
    p["fc3_b"] = 0.02 * jax.random.normal(kf[5], (10,), jnp.float32)
    return p


# ----------------------------------------------------------------------------
# Forward pass (CNNNet.forward, eval mode)
# ----------------------------------------------------------------------------
def cnnnet_forward(prep, x_nchw):
    B = x_nchw.shape[0]
    x = jnp.transpose(x_nchw, (0, 2, 3, 1)).astype(jnp.bfloat16)   # NHWC [B,28,28,1]
    H, W = x.shape[1], x.shape[2]
    gm = max(B, 2)                  # >= 2 grid steps so both v7x TCs are used

    # Conv1 (3x3, 1->16) + BN + ReLU
    cols = im2col_3x3_pad1(x)                                      # [B*784, 9]
    y = fused_matmul(cols, prep["w1"], prep["b1"], relu=True, grid_m=gm)
    y = y.reshape(B, H, W, 16)

    # Conv2 (3x3, 16->32) + BN + ReLU
    cols = im2col_3x3_pad1(y)                                      # [B*784, 144]
    y = fused_matmul(cols, prep["w2"], prep["b2"], relu=True, grid_m=gm)
    y = y.reshape(B, H, W, 32)

    # Conv3 (1x1, 32->32) + BN + ReLU + MaxPool2d(2,2), fused in one kernel.
    a = y[:, 0::2, 0::2, :].reshape(B, 196, 32)
    b = y[:, 0::2, 1::2, :].reshape(B, 196, 32)
    c = y[:, 1::2, 0::2, :].reshape(B, 196, 32)
    d = y[:, 1::2, 1::2, :].reshape(B, 196, 32)
    pooled = conv1x1_bn_relu_maxpool(a, b, c, d, prep["w3"], prep["b3"])
    feats = pooled.reshape(B, 32 * 14 * 14)   # NHWC flatten; fc1_w pre-permuted

    # FC head: Linear+ReLU+Dropout(id)+Linear+ReLU+Dropout(id)+Linear
    return mlp_head(feats, prep["fc1_w"], prep["fc1_b"],
                    prep["fc2_w"], prep["fc2_b"],
                    prep["fc3_w"], prep["fc3_b"])                  # [B, 10]


if __name__ == "__main__":
    key = jax.random.PRNGKey(0)
    k_param, k_x = jax.random.split(key)
    params = make_params(k_param)
    prep = prepare_params(params)   # one-time weight folding / layout prep
    # MNIST-shaped input: batch=2, 1 channel, 28x28 (required by Linear(32*14*14)).
    x = jax.random.normal(k_x, (2, 1, 28, 28), jnp.float32)

    logits = jax.jit(cnnnet_forward)(prep, x)
    logits = jax.block_until_ready(logits)
    assert logits.shape == (2, 10), logits.shape
    assert jnp.all(jnp.isfinite(logits))
    print("KERNEL_OK")
</pallas_src>

<mosaic_0001>
module attributes {stable_mosaic.version = 11 : i64} {
  func.func @_matmul_bias_kernel(%arg0: i32, %arg1: memref<784x9xbf16, #tpu.memory_space<vmem>>, %arg2: memref<9x16xbf16, #tpu.memory_space<vmem>>, %arg3: memref<1x16xf32, #tpu.memory_space<vmem>>, %arg4: memref<784x16xbf16, #tpu.memory_space<vmem>>) attributes {dimension_semantics = [#tpu.dimension_semantics<parallel>], iteration_bounds = array<i64: 2>, scalar_prefetch = 0 : i64, scratch_operands = 0 : i64, tpu.core_type = #tpu.core_type<tc>, window_params = [{transform_indices = @transform_0, window_bounds = array<i64: 784, 9>}, {pipeline_mode = #tpu.pipeline_mode<synchronous>, transform_indices = @transform_1, window_bounds = array<i64: 9, 16>}, {pipeline_mode = #tpu.pipeline_mode<synchronous>, transform_indices = @transform_2, window_bounds = array<i64: 1, 16>}, {transform_indices = @transform_3, window_bounds = array<i64: 784, 16>}]} {
    %c0 = arith.constant 0 : index
    %c0_0 = arith.constant 0 : index
    %0 = vector.load %arg1[%c0, %c0_0] : memref<784x9xbf16, #tpu.memory_space<vmem>>, vector<784x9xbf16>
    %c0_1 = arith.constant 0 : index
    %c0_2 = arith.constant 0 : index
    %1 = vector.load %arg2[%c0_1, %c0_2] : memref<9x16xbf16, #tpu.memory_space<vmem>>, vector<9x16xbf16>
    %cst = arith.constant dense<0.000000e+00> : vector<784x16xf32>
    %2 = tpu.matmul %0, %1, %cst {dimension_numbers = #tpu.dot_dimension_numbers<[1], [0], [0], [1], [0, 0, 1, 1], [], []>} : vector<784x9xbf16>, vector<9x16xbf16>, vector<784x16xf32> -> vector<784x16xf32>
    %c0_3 = arith.constant 0 : index
    %c0_4 = arith.constant 0 : index
    %3 = vector.load %arg3[%c0_3, %c0_4] : memref<1x16xf32, #tpu.memory_space<vmem>>, vector<1x16xf32>
    %4 = vector.broadcast %3 : vector<1x16xf32> to vector<784x16xf32>
    %5 = arith.addf %2, %4 : vector<784x16xf32>
    %cst_5 = arith.constant 0.000000e+00 : f32
    %6 = vector.broadcast %cst_5 : f32 to vector<784x16xf32>
    %7 = arith.maximumf %5, %6 : vector<784x16xf32>
    %8 = arith.truncf %7 : vector<784x16xf32> to vector<784x16xbf16>
    %c0_6 = arith.constant 0 : index
    %c0_7 = arith.constant 0 : index
    %9 = vector.load %arg4[%c0_6, %c0_7] : memref<784x16xbf16, #tpu.memory_space<vmem>>, vector<784x16xbf16>
    tpu.vector_store %arg4[%c0_6, %c0_7], %8 {strides = array<i32>} : memref<784x16xbf16, #tpu.memory_space<vmem>>, vector<784x16xbf16>,
    return
  }
  func.func @transform_0(%arg0: i32) -> (i32, i32) {
    %c0_i32 = arith.constant 0 : i32
    %c0_i32_0 = arith.constant 0 : i32
    return %arg0, %c0_i32 : i32, i32
  }
  func.func @transform_1(%arg0: i32) -> (i32, i32) {
    %c0_i32 = arith.constant 0 : i32
    %c0_i32_0 = arith.constant 0 : i32
    %c0_i32_1 = arith.constant 0 : i32
    return %c0_i32, %c0_i32_0 : i32, i32
  }
  func.func @transform_2(%arg0: i32) -> (i32, i32) {
    %c0_i32 = arith.constant 0 : i32
    %c0_i32_0 = arith.constant 0 : i32
    %c0_i32_1 = arith.constant 0 : i32
    return %c0_i32, %c0_i32_0 : i32, i32
  }
  func.func @transform_3(%arg0: i32) -> (i32, i32) {
    %c0_i32 = arith.constant 0 : i32
    %c0_i32_0 = arith.constant 0 : i32
    return %arg0, %c0_i32 : i32, i32
  }
}

module attributes {stable_mosaic.version = 11 : i64} {
  func.func @_matmul_bias_kernel(%arg0: i32, %arg1: memref<784x144xbf16, #tpu.memory_space<vmem>>, %arg2: memref<144x32xbf16, #tpu.memory_space<vmem>>, %arg3: memref<1x32xf32, #tpu.memory_space<vmem>>, %arg4: memref<784x32xbf16, #tpu.memory_space<vmem>>) attributes {dimension_semantics = [#tpu.dimension_semantics<parallel>], iteration_bounds = array<i64: 2>, scalar_prefetch = 0 : i64, scratch_operands = 0 : i64, tpu.core_type = #tpu.core_type<tc>, window_params = [{transform_indices = @transform_0, window_bounds = array<i64: 784, 144>}, {pipeline_mode = #tpu.pipeline_mode<synchronous>, transform_indices = @transform_1, window_bounds = array<i64: 144, 32>}, {pipeline_mode = #tpu.pipeline_mode<synchronous>, transform_indices = @transform_2, window_bounds = array<i64: 1, 32>}, {transform_indices = @transform_3, window_bounds = array<i64: 784, 32>}]} {
    %c0 = arith.constant 0 : index
    %c0_0 = arith.constant 0 : index
    %0 = vector.load %arg1[%c0, %c0_0] : memref<784x144xbf16, #tpu.memory_space<vmem>>, vector<784x144xbf16>
    %c0_1 = arith.constant 0 : index
    %c0_2 = arith.constant 0 : index
    %1 = vector.load %arg2[%c0_1, %c0_2] : memref<144x32xbf16, #tpu.memory_space<vmem>>, vector<144x32xbf16>
    %cst = arith.constant dense<0.000000e+00> : vector<784x32xf32>
    %2 = tpu.matmul %0, %1, %cst {dimension_numbers = #tpu.dot_dimension_numbers<[1], [0], [0], [1], [0, 0, 1, 1], [], []>} : vector<784x144xbf16>, vector<144x32xbf16>, vector<784x32xf32> -> vector<784x32xf32>
    %c0_3 = arith.constant 0 : index
    %c0_4 = arith.constant 0 : index
    %3 = vector.load %arg3[%c0_3, %c0_4] : memref<1x32xf32, #tpu.memory_space<vmem>>, vector<1x32xf32>
    %4 = vector.broadcast %3 : vector<1x32xf32> to vector<784x32xf32>
    %5 = arith.addf %2, %4 : vector<784x32xf32>
    %cst_5 = arith.constant 0.000000e+00 : f32
    %6 = vector.broadcast %cst_5 : f32 to vector<784x32xf32>
    %7 = arith.maximumf %5, %6 : vector<784x32xf32>
    %8 = arith.truncf %7 : vector<784x32xf32> to vector<784x32xbf16>
    %c0_6 = arith.constant 0 : index
    %c0_7 = arith.constant 0 : index
    %9 = vector.load %arg4[%c0_6, %c0_7] : memref<784x32xbf16, #tpu.memory_space<vmem>>, vector<784x32xbf16>
    tpu.vector_store %arg4[%c0_6, %c0_7], %8 {strides = array<i32>} : memref<784x32xbf16, #tpu.memory_space<vmem>>, vector<784x32xbf16>,
    return
  }
  func.func @transform_0(%arg0: i32) -> (i32, i32) {
    %c0_i32 = arith.constant 0 : i32
    %c0_i32_0 = arith.constant 0 : i32
    return %arg0, %c0_i32 : i32, i32
  }
  func.func @transform_1(%arg0: i32) -> (i32, i32) {
    %c0_i32 = arith.constant 0 : i32
    %c0_i32_0 = arith.constant 0 : i32
    %c0_i32_1 = arith.constant 0 : i32
    return %c0_i32, %c0_i32_0 : i32, i32
  }
  func.func @transform_2(%arg0: i32) -> (i32, i32) {
    %c0_i32 = arith.constant 0 : i32
    %c0_i32_0 = arith.constant 0 : i32
    %c0_i32_1 = arith.constant 0 : i32
    return %c0_i32, %c0_i32_0 : i32, i32
  }
  func.func @transform_3(%arg0: i32) -> (i32, i32) {
    %c0_i32 = arith.constant 0 : i32
    %c0_i32_0 = arith.constant 0 : i32
    return %arg0, %c0_i32 : i32, i32
  }
}

module attributes {stable_mosaic.version = 11 : i64} {
  func.func @_conv1x1_pool_kernel(%arg0: i32, %arg1: memref<1x196x32xbf16, #tpu.memory_space<vmem>>, %arg2: memref<1x196x32xbf16, #tpu.memory_space<vmem>>, %arg3: memref<1x196x32xbf16, #tpu.memory_space<vmem>>, %arg4: memref<1x196x32xbf16, #tpu.memory_space<vmem>>, %arg5: memref<32x32xbf16, #tpu.memory_space<vmem>>, %arg6: memref<1x32xf32, #tpu.memory_space<vmem>>, %arg7: memref<1x196x32xbf16, #tpu.memory_space<vmem>>) attributes {dimension_semantics = [#tpu.dimension_semantics<parallel>], iteration_bounds = array<i64: 2>, scalar_prefetch = 0 : i64, scratch_operands = 0 : i64, tpu.core_type = #tpu.core_type<tc>, window_params = [{transform_indices = @transform_0, window_bounds = array<i64: 1, 196, 32>}, {transform_indices = @transform_1, window_bounds = array<i64: 1, 196, 32>}, {transform_indices = @transform_2, window_bounds = array<i64: 1, 196, 32>}, {transform_indices = @transform_3, window_bounds = array<i64: 1, 196, 32>}, {pipeline_mode = #tpu.pipeline_mode<synchronous>, transform_indices = @transform_4, window_bounds = array<i64: 32, 32>}, {pipeline_mode = #tpu.pipeline_mode<synchronous>, transform_indices = @transform_5, window_bounds = array<i64: 1, 32>}, {transform_indices = @transform_6, window_bounds = array<i64: 1, 196, 32>}]} {
    %c0 = arith.constant 0 : index
    %c0_0 = arith.constant 0 : index
    %0 = vector.load %arg5[%c0, %c0_0] : memref<32x32xbf16, #tpu.memory_space<vmem>>, vector<32x32xbf16>
    %c0_1 = arith.constant 0 : index
    %c0_2 = arith.constant 0 : index
    %c0_3 = arith.constant 0 : index
    %1 = vector.load %arg1[%c0_1, %c0_2, %c0_3] : memref<1x196x32xbf16, #tpu.memory_space<vmem>>, vector<1x196x32xbf16>
    %2 = vector.shape_cast %1 : vector<1x196x32xbf16> to vector<196x32xbf16>
    %cst = arith.constant dense<0.000000e+00> : vector<196x32xf32>
    %3 = tpu.matmul %2, %0, %cst {dimension_numbers = #tpu.dot_dimension_numbers<[1], [0], [0], [1], [0, 0, 1, 1], [], []>} : vector<196x32xbf16>, vector<32x32xbf16>, vector<196x32xf32> -> vector<196x32xf32>
    %c0_4 = arith.constant 0 : index
    %c0_5 = arith.constant 0 : index
    %c0_6 = arith.constant 0 : index
    %4 = vector.load %arg2[%c0_4, %c0_5, %c0_6] : memref<1x196x32xbf16, #tpu.memory_space<vmem>>, vector<1x196x32xbf16>
    %5 = vector.shape_cast %4 : vector<1x196x32xbf16> to vector<196x32xbf16>
    %cst_7 = arith.constant dense<0.000000e+00> : vector<196x32xf32>
    %6 = tpu.matmul %5, %0, %cst_7 {dimension_numbers = #tpu.dot_dimension_numbers<[1], [0], [0], [1], [0, 0, 1, 1], [], []>} : vector<196x32xbf16>, vector<32x32xbf16>, vector<196x32xf32> -> vector<196x32xf32>
    %c0_8 = arith.constant 0 : index
    %c0_9 = arith.constant 0 : index
    %c0_10 = arith.constant 0 : index
    %7 = vector.load %arg3[%c0_8, %c0_9, %c0_10] : memref<1x196x32xbf16, #tpu.memory_space<vmem>>, vector<1x196x32xbf16>
    %8 = vector.shape_cast %7 : vector<1x196x32xbf16> to vector<196x32xbf16>
    %cst_11 = arith.constant dense<0.000000e+00> : vector<196x32xf32>
    %9 = tpu.matmul %8, %0, %cst_11 {dimension_numbers = #tpu.dot_dimension_numbers<[1], [0], [0], [1], [0, 0, 1, 1], [], []>} : vector<196x32xbf16>, vector<32x32xbf16>, vector<196x32xf32> -> vector<196x32xf32>
    %c0_12 = arith.constant 0 : index
    %c0_13 = arith.constant 0 : index
    %c0_14 = arith.constant 0 : index
    %10 = vector.load %arg4[%c0_12, %c0_13, %c0_14] : memref<1x196x32xbf16, #tpu.memory_space<vmem>>, vector<1x196x32xbf16>
    %11 = vector.shape_cast %10 : vector<1x196x32xbf16> to vector<196x32xbf16>
    %cst_15 = arith.constant dense<0.000000e+00> : vector<196x32xf32>
    %12 = tpu.matmul %11, %0, %cst_15 {dimension_numbers = #tpu.dot_dimension_numbers<[1], [0], [0], [1], [0, 0, 1, 1], [], []>} : vector<196x32xbf16>, vector<32x32xbf16>, vector<196x32xf32> -> vector<196x32xf32>
    %13 = arith.maximumf %3, %6 : vector<196x32xf32>
    %14 = arith.maximumf %9, %12 : vector<196x32xf32>
    %15 = arith.maximumf %13, %14 : vector<196x32xf32>
    %c0_16 = arith.constant 0 : index
    %c0_17 = arith.constant 0 : index
    %16 = vector.load %arg6[%c0_16, %c0_17] : memref<1x32xf32, #tpu.memory_space<vmem>>, vector<1x32xf32>
    %17 = vector.broadcast %16 : vector<1x32xf32> to vector<196x32xf32>
    %18 = arith.addf %15, %17 : vector<196x32xf32>
    %cst_18 = arith.constant 0.000000e+00 : f32
    %19 = vector.broadcast %cst_18 : f32 to vector<196x32xf32>
    %20 = arith.maximumf %18, %19 : vector<196x32xf32>
    %21 = arith.truncf %20 : vector<196x32xf32> to vector<196x32xbf16>
    %c0_19 = arith.constant 0 : index
    %c0_20 = arith.constant 0 : index
    %c0_21 = arith.constant 0 : index
    %22 = vector.load %arg7[%c0_19, %c0_20, %c0_21] : memref<1x196x32xbf16, #tpu.memory_space<vmem>>, vector<1x196x32xbf16>
    %23 = vector.shape_cast %22 : vector<1x196x32xbf16> to vector<196x32xbf16>
    %24 = vector.shape_cast %21 : vector<196x32xbf16> to vector<1x196x32xbf16>
    tpu.vector_store %arg7[%c0_19, %c0_20, %c0_21], %24 {strides = array<i32>} : memref<1x196x32xbf16, #tpu.memory_space<vmem>>, vector<1x196x32xbf16>,
    return
  }
  func.func @transform_0(%arg0: i32) -> (i32, i32, i32) {
    %c0_i32 = arith.constant 0 : i32
    %c0_i32_0 = arith.constant 0 : i32
    %c0_i32_1 = arith.constant 0 : i32
    return %arg0, %c0_i32, %c0_i32_0 : i32, i32, i32
  }
  func.func @transform_1(%arg0: i32) -> (i32, i32, i32) {
    %c0_i32 = arith.constant 0 : i32
    %c0_i32_0 = arith.constant 0 : i32
    %c0_i32_1 = arith.constant 0 : i32
    return %arg0, %c0_i32, %c0_i32_0 : i32, i32, i32
  }
  func.func @transform_2(%arg0: i32) -> (i32, i32, i32) {
    %c0_i32 = arith.constant 0 : i32
    %c0_i32_0 = arith.constant 0 : i32
    %c0_i32_1 = arith.constant 0 : i32
    return %arg0, %c0_i32, %c0_i32_0 : i32, i32, i32
  }
  func.func @transform_3(%arg0: i32) -> (i32, i32, i32) {
    %c0_i32 = arith.constant 0 : i32
    %c0_i32_0 = arith.constant 0 : i32
    %c0_i32_1 = arith.constant 0 : i32
    return %arg0, %c0_i32, %c0_i32_0 : i32, i32, i32
  }
  func.func @transform_4(%arg0: i32) -> (i32, i32) {
    %c0_i32 = arith.constant 0 : i32
    %c0_i32_0 = arith.constant 0 : i32
    %c0_i32_1 = arith.constant 0 : i32
    return %c0_i32, %c0_i32_0 : i32, i32
  }
  func.func @transform_5(%arg0: i32) -> (i32, i32) {
    %c0_i32 = arith.constant 0 : i32
    %c0_i32_0 = arith.constant 0 : i32
    %c0_i32_1 = arith.constant 0 : i32
    return %c0_i32, %c0_i32_0 : i32, i32
  }
  func.func @transform_6(%arg0: i32) -> (i32, i32, i32) {
    %c0_i32 = arith.constant 0 : i32
    %c0_i32_0 = arith.constant 0 : i32
    %c0_i32_1 = arith.constant 0 : i32
    return %arg0, %c0_i32, %c0_i32_0 : i32, i32, i32
  }
}

module attributes {stable_mosaic.version = 11 : i64} {
  func.func @_mlp_head_kernel(%arg0: memref<2x6272xbf16, #tpu.memory_space<vmem>>, %arg1: memref<6272x128xbf16, #tpu.memory_space<vmem>>, %arg2: memref<1x128xf32, #tpu.memory_space<vmem>>, %arg3: memref<128x64xbf16, #tpu.memory_space<vmem>>, %arg4: memref<1x64xf32, #tpu.memory_space<vmem>>, %arg5: memref<64x10xbf16, #tpu.memory_space<vmem>>, %arg6: memref<1x10xf32, #tpu.memory_space<vmem>>, %arg7: memref<2x10xf32, #tpu.memory_space<vmem>>) attributes {dimension_semantics = [], scalar_prefetch = 0 : i64, scratch_operands = 0 : i64, tpu.core_type = #tpu.core_type<tc>} {
    %c0 = arith.constant 0 : index
    %c0_0 = arith.constant 0 : index
    %0 = vector.load %arg0[%c0, %c0_0] : memref<2x6272xbf16, #tpu.memory_space<vmem>>, vector<2x6272xbf16>
    %c0_1 = arith.constant 0 : index
    %c0_2 = arith.constant 0 : index
    %1 = vector.load %arg1[%c0_1, %c0_2] : memref<6272x128xbf16, #tpu.memory_space<vmem>>, vector<6272x128xbf16>
    %cst = arith.constant dense<0.000000e+00> : vector<2x128xf32>
    %2 = tpu.matmul %0, %1, %cst {dimension_numbers = #tpu.dot_dimension_numbers<[1], [0], [0], [1], [0, 0, 1, 1], [], []>} : vector<2x6272xbf16>, vector<6272x128xbf16>, vector<2x128xf32> -> vector<2x128xf32>
    %c0_3 = arith.constant 0 : index
    %c0_4 = arith.constant 0 : index
    %3 = vector.load %arg2[%c0_3, %c0_4] : memref<1x128xf32, #tpu.memory_space<vmem>>, vector<1x128xf32>
    %4 = vector.broadcast %3 : vector<1x128xf32> to vector<2x128xf32>
    %5 = arith.addf %2, %4 : vector<2x128xf32>
    %cst_5 = arith.constant 0.000000e+00 : f32
    %6 = vector.broadcast %cst_5 : f32 to vector<2x128xf32>
    %7 = arith.maximumf %5, %6 : vector<2x128xf32>
    %8 = arith.truncf %7 : vector<2x128xf32> to vector<2x128xbf16>
    %c0_6 = arith.constant 0 : index
    %c0_7 = arith.constant 0 : index
    %9 = vector.load %arg3[%c0_6, %c0_7] : memref<128x64xbf16, #tpu.memory_space<vmem>>, vector<128x64xbf16>
    %cst_8 = arith.constant dense<0.000000e+00> : vector<2x64xf32>
    %10 = tpu.matmul %8, %9, %cst_8 {dimension_numbers = #tpu.dot_dimension_numbers<[1], [0], [0], [1], [0, 0, 1, 1], [], []>} : vector<2x128xbf16>, vector<128x64xbf16>, vector<2x64xf32> -> vector<2x64xf32>
    %c0_9 = arith.constant 0 : index
    %c0_10 = arith.constant 0 : index
    %11 = vector.load %arg4[%c0_9, %c0_10] : memref<1x64xf32, #tpu.memory_space<vmem>>, vector<1x64xf32>
    %12 = vector.broadcast %11 : vector<1x64xf32> to vector<2x64xf32>
    %13 = arith.addf %10, %12 : vector<2x64xf32>
    %cst_11 = arith.constant 0.000000e+00 : f32
    %14 = vector.broadcast %cst_11 : f32 to vector<2x64xf32>
    %15 = arith.maximumf %13, %14 : vector<2x64xf32>
    %16 = arith.truncf %15 : vector<2x64xf32> to vector<2x64xbf16>
    %c0_12 = arith.constant 0 : index
    %c0_13 = arith.constant 0 : index
    %17 = vector.load %arg5[%c0_12, %c0_13] : memref<64x10xbf16, #tpu.memory_space<vmem>>, vector<64x10xbf16>
    %cst_14 = arith.constant dense<0.000000e+00> : vector<2x10xf32>
    %18 = tpu.matmul %16, %17, %cst_14 {dimension_numbers = #tpu.dot_dimension_numbers<[1], [0], [0], [1], [0, 0, 1, 1], [], []>} : vector<2x64xbf16>, vector<64x10xbf16>, vector<2x10xf32> -> vector<2x10xf32>
    %c0_15 = arith.constant 0 : index
    %c0_16 = arith.constant 0 : index
    %19 = vector.load %arg6[%c0_15, %c0_16] : memref<1x10xf32, #tpu.memory_space<vmem>>, vector<1x10xf32>
    %20 = vector.broadcast %19 : vector<1x10xf32> to vector<2x10xf32>
    %21 = arith.addf %18, %20 : vector<2x10xf32>
    %c0_17 = arith.constant 0 : index
    %c0_18 = arith.constant 0 : index
    %22 = vector.load %arg7[%c0_17, %c0_18] : memref<2x10xf32, #tpu.memory_space<vmem>>, vector<2x10xf32>
    tpu.vector_store %arg7[%c0_17, %c0_18], %21 {strides = array<i32>} : memref<2x10xf32, #tpu.memory_space<vmem>>, vector<2x10xf32>,
    return
  }
}

</mosaic_0001>

<bundles_post_ra>
// kernel: cnnnet_forward.4
= control target key start
LH: loop header
LB: loop body
LE: loop exit
PB: predicated region body
PF: predicated region fallthrough
CT: control target
= control target key end

     0   :  { %8 = vsyncpa [#allocation3], 0  ;;  %s2241_s0 = inlined_call_operand.vmem [shape: bf16[1568,9], index: 0, kind: input, shape index: {}]   ;;  %s2242_s1 = inlined_call_operand.hbm [shape: bf16[9,16], index: 1, kind: input, shape index: {}]   ;;  %s2243_s2 = inlined_call_operand.hbm [shape: f32[1,16], index: 2, kind: input, shape index: {}]   ;;  %s2244_s3 = inlined_call_operand.vmem [shape: bf16[1568,16], index: 3, kind: output, shape index: {}]  }
   0x1   :  { %9 = vsyncpa [#allocation5], 0  ;;  %s1793_s12 = smov 0  }
   0x2 LB: > { %s125_s15 = sshll.u32 %s2242_s1, 4  ;;  %s1343_s16 = sadd.s32 4294967295, %s1766_s12   ;;  %s1766_s12 = sphi %s1793_s12, %s15_s12   ;;  %s126_s15 = int_to_ptr.hbm [resolvable:$true] %s125_s15 }
   0x3   : > { %p1345_p0 = scmp.ge.s32.totalorder %s1766_s12, 1  ;;  %p114_p1 = scmp.lt.s32.totalorder %s1766_s12, 3 }
   0x4   : > { %p1804_p2 = scmp.eq.s32.totalorder %s1343_s16, 0  ;;  %s1768_s19 = smov [#allocation2]  }
   0x5   : > { %p1808_p3 = pnand %p1345_p0, %p114_p1  ;;  %s127_s20 = sshll.u32 %s1768_s19, 4  ;;  %s128_s20 = int_to_ptr.vmem [resolvable:$true] %s127_s20 }
   0x6   : > { %s140_s23 = sshll.u32 %s2243_s2, 4  ;;  %s1769_s24 = smov [#allocation4]   ;;  %s141_s23 = int_to_ptr.hbm [resolvable:$true] %s140_s23 }
   0x7   : > { %p1666_p4 = pneg %p1808_p3  ;;  %s142_s25 = sshll.u32 %s1769_s24, 4  ;;  %s143_s25 = int_to_ptr.vmem [resolvable:$true] %s142_s25 }
   0x8   : > { %s1770_s26 = smov 64   ;;  %s1771_s27 = smov 4  }
   0x9   : > { %p1667_p5 = pnand %p1804_p2, %p1666_p4  ;;  %164 = sbr.rel (%p1808_p3) target bundleno = 366 (0x16e), region = 32 }
   0xb   : > { %1669 = dma.hbm_to_vmem [thread:$0]  (!%p1667_p5), %s126_s15, 128, %s128_s20, [#allocation3], %s1770_s26, %s1770_s26, %s1771_s27  }
   0xc   : > { %1672 = dma.hbm_to_vmem [thread:$0]  (!%p1667_p5), %s141_s23, 16, %s143_s25, [#allocation5]  }
   0xe   : > { %1757 = dma.done.wait (%p1804_p2), [#allocation3], 128  }
   0xf   : > { %1759 = vsyncadd (%p1804_p2), [#allocation3], 4294967168 }
  0x10   : > { %1761 = dma.done.wait (%p1804_p2), [#allocation5], 16  }
  0x11   : > { %1763 = vsyncadd (%p1804_p2), [#allocation5], 4294967280  ;;  %vm709_vm0 = vcmask 1043456   ;;  %s194_s28 = smul.u32 98, %s1343_s16  ;;  %vm710_vm1 = vcmask 1044480   ;;  %v1772_v0 = vmov 65535  }
  0x12   : > { %v711_v1 = vsel %vm709_vm0, 4294967295, %v1772_v0  ;;  %v1552_v3 = vld [vmem:[#allocation2] sm:$0xf]  ;;  %v1654_v4 = vld [vmem:[#allocation2] sm:$0x10]  ;;  %vm561_vm2 = vcmask 72704  }
  0x13   : > { %p195_p6 = scmp.lt.s32.totalorder %s194_s28, 195  ;;  %v712_v2 = vsel %vm710_vm1, %v711_v1, 0  ;;  %v1553_v5 = vor.u32 %v1654_v4, %v1552_v3  ;;  %v1903_v39 = vld [vmem:[#allocation4] ss:$0 sm:$0xff]  ;;  %vm1166_vm3 = vcmask 125952  }
  0x15   : > { %s2248_s28 = smov (!%p195_p6, %s194_s28), 195  ;;  %v714_v6 = vand.u32 %v1553_v5, %v712_v2 }
  0x16   : > { %s1352_s29 = sshll.u32 %s2248_s28, 2 }
  0x17   : > { %s1837_s5 = scalar_lea.vmem %s2241_s0, %s1352_s29  ;;  %723 = vmatpush.bf16.msra.mxu0 %v714_v6  ;;  %1655 = vmatpush.bf16.msra.mxu1 %v714_v6  ;;  %s1917_s8 = scalar_lea.vmem %s2244_s3, %s1352_s29 }
  0x18   : > { %v1605_v7 = vld [vmem:[%s1837_s5] sm:$0xff]  ;;  %v1618_v8 = vld [vmem:[%s1837_s5 + $0x68] sm:$0xff]  ;;  %v1631_v9 = vld [vmem:[%s1837_s5 + $0xd0] sm:$0xff]  ;;  %1656 = vmatpush.bf16.msra.mxu2 %v714_v6  ;;  %1657 = vmatpush.bf16.msra.mxu3 %v714_v6 }
  0x19   : > { %v1644_v10 = vld [vmem:[%s1837_s5 + $0x138] sm:$0xff]  ;;  %v1606_v11 = vld [vmem:[%s1837_s5 + $0x8] sm:$0xff]  ;;  %v1619_v12 = vld [vmem:[%s1837_s5 + $0x70] sm:$0xff] }
  0x1a   : > { %1554 = vmatmul.msk.bf16.vlgmr.msra.gmra.mxu0 %vm561_vm2, %v1605_v7  ;;  %1567 = vmatmul.msk.bf16.vlgmr.msra.gmra.mxu1 %vm561_vm2, %v1618_v8  ;;  %v1632_v13 = vld [vmem:[%s1837_s5 + $0xd8] sm:$0xff]  ;;  %v1645_v14 = vld [vmem:[%s1837_s5 + $0x140] sm:$0xff]  ;;  %v1607_v15 = vld [vmem:[%s1837_s5 + $0x10] sm:$0xff] }
  0x1b   : > { %1580 = vmatmul.msk.bf16.vlgmr.msra.gmra.mxu2 %vm561_vm2, %v1631_v9  ;;  %1593 = vmatmul.msk.bf16.vlgmr.msra.gmra.mxu3 %vm561_vm2, %v1644_v10  ;;  %v1620_v16 = vld [vmem:[%s1837_s5 + $0x78] sm:$0xff]  ;;  %v1633_v17 = vld [vmem:[%s1837_s5 + $0xe0] sm:$0xff]  ;;  %v1646_v18 = vld [vmem:[%s1837_s5 + $0x148] sm:$0xff] }
  0x1c   : > { %v1608_v19 = vld [vmem:[%s1837_s5 + $0x18] sm:$0xff]  ;;  %v1621_v20 = vld [vmem:[%s1837_s5 + $0x80] sm:$0xff]  ;;  %v1634_v21 = vld [vmem:[%s1837_s5 + $0xe8] sm:$0xff] }
  0x1d   : > { %v1647_v22 = vld [vmem:[%s1837_s5 + $0x150] sm:$0xff]  ;;  %v1609_v23 = vld [vmem:[%s1837_s5 + $0x20] sm:$0xff]  ;;  %v1622_v24 = vld [vmem:[%s1837_s5 + $0x88] sm:$0xff] }
  0x1e   : > { %v1635_v25 = vld [vmem:[%s1837_s5 + $0xf0] sm:$0xff]  ;;  %v1648_v26 = vld [vmem:[%s1837_s5 + $0x158] sm:$0xff]  ;;  %v1610_v27 = vld [vmem:[%s1837_s5 + $0x28] sm:$0xff] }
  0x1f   : > { %v1623_v28 = vld [vmem:[%s1837_s5 + $0x90] sm:$0xff]  ;;  %v1636_v29 = vld [vmem:[%s1837_s5 + $0xf8] sm:$0xff]  ;;  %v1649_v30 = vld [vmem:[%s1837_s5 + $0x160] sm:$0xff] }
  0x20   : > { %v1611_v31 = vld [vmem:[%s1837_s5 + $0x30] sm:$0xff]  ;;  %v1624_v32 = vld [vmem:[%s1837_s5 + $0x98] sm:$0xff]  ;;  %v1637_v33 = vld [vmem:[%s1837_s5 + $0x100] sm:$0xff] }
  0x21   : > { %v1650_v34 = vld [vmem:[%s1837_s5 + $0x168] sm:$0xff]  ;;  %v1612_v35 = vld [vmem:[%s1837_s5 + $0x38] sm:$0xff]  ;;  %v1625_v36 = vld [vmem:[%s1837_s5 + $0xa0] sm:$0xff] }
  0x22   : > { %v1638_v37 = vld [vmem:[%s1837_s5 + $0x108] sm:$0xff]  ;;  %v1651_v38 = vld [vmem:[%s1837_s5 + $0x170] sm:$0xff]  ;;  %v1613_v40 = vld [vmem:[%s1837_s5 + $0x40] sm:$0xff] }
  0x23   : > { %v1626_v41 = vld [vmem:[%s1837_s5 + $0xa8] sm:$0xff]  ;;  %v1639_v44 = vld [vmem:[%s1837_s5 + $0x110] sm:$0xff]  ;;  %v1652_v58 = vld [vmem:[%s1837_s5 + $0x178] sm:$0xff] }
  0x24   : > { %v1614_v1 = vld [vmem:[%s1837_s5 + $0x48] sm:$0xff]  ;;  %v1627_v2 = vld [vmem:[%s1837_s5 + $0xb0] sm:$0xff]  ;;  %v1640_v7 = vld [vmem:[%s1837_s5 + $0x118] sm:$0xff] }
  0x2a   : > { %1555 = vmatmul.msk.bf16.gmra.mxu0 %vm561_vm2, %v1606_v11  ;;  %1568 = vmatmul.msk.bf16.gmra.mxu1 %vm561_vm2, %v1619_v12 }
  0x2b   : > { %1581 = vmatmul.msk.bf16.gmra.mxu2 %vm561_vm2, %v1632_v13  ;;  %1594 = vmatmul.msk.bf16.gmra.mxu3 %vm561_vm2, %v1645_v14 }
  0x3a   : > { %1556 = vmatmul.msk.bf16.gmra.mxu0 %vm561_vm2, %v1607_v15  ;;  %1569 = vmatmul.msk.bf16.gmra.mxu1 %vm561_vm2, %v1620_v16 }
  0x3b   : > { %1582 = vmatmul.msk.bf16.gmra.mxu2 %vm561_vm2, %v1633_v17  ;;  %1595 = vmatmul.msk.bf16.gmra.mxu3 %vm561_vm2, %v1646_v18 }
  0x4a   : > { %1557 = vmatmul.msk.bf16.gmra.mxu0 %vm561_vm2, %v1608_v19  ;;  %1570 = vmatmul.msk.bf16.gmra.mxu1 %vm561_vm2, %v1621_v20 }
  0x4b   : > { %1583 = vmatmul.msk.bf16.gmra.mxu2 %vm561_vm2, %v1634_v21  ;;  %1596 = vmatmul.msk.bf16.gmra.mxu3 %vm561_vm2, %v1647_v22 }
  0x5a   : > { %1558 = vmatmul.msk.bf16.gmra.mxu0 %vm561_vm2, %v1609_v23  ;;  %1571 = vmatmul.msk.bf16.gmra.mxu1 %vm561_vm2, %v1622_v24 }
  0x5b   : > { %1584 = vmatmul.msk.bf16.gmra.mxu2 %vm561_vm2, %v1635_v25  ;;  %1597 = vmatmul.msk.bf16.gmra.mxu3 %vm561_vm2, %v1648_v26 }
  0x6a   : > { %1559 = vmatmul.msk.bf16.gmra.mxu0 %vm561_vm2, %v1610_v27  ;;  %1572 = vmatmul.msk.bf16.gmra.mxu1 %vm561_vm2, %v1623_v28 }
  0x6b   : > { %1585 = vmatmul.msk.bf16.gmra.mxu2 %vm561_vm2, %v1636_v29  ;;  %1598 = vmatmul.msk.bf16.gmra.mxu3 %vm561_vm2, %v1649_v30  ;;  %v1653_v29 = vld [vmem:[%s1837_s5 + $0x180] sm:$0xff] }
  0x7a   : > { %1560 = vmatmul.msk.bf16.gmra.mxu0 %vm561_vm2, %v1611_v31  ;;  %1573 = vmatmul.msk.bf16.gmra.mxu1 %vm561_vm2, %v1624_v32 }
  0x7b   : > { %1586 = vmatmul.msk.bf16.gmra.mxu2 %vm561_vm2, %v1637_v33  ;;  %1599 = vmatmul.msk.bf16.gmra.mxu3 %vm561_vm2, %v1650_v34 }
  0x8a   : > { %1561 = vmatmul.msk.bf16.gmra.mxu0 %vm561_vm2, %v1612_v35  ;;  %1574 = vmatmul.msk.bf16.gmra.mxu1 %vm561_vm2, %v1625_v36 }
  0x8b   : > { %1587 = vmatmul.msk.bf16.gmra.mxu2 %vm561_vm2, %v1638_v37  ;;  %1600 = vmatmul.msk.bf16.gmra.mxu3 %vm561_vm2, %v1651_v38  ;;  %v1615_v37 = vld [vmem:[%s1837_s5 + $0x50] sm:$0xff]  ;;  %v1628_v38 = vld [vmem:[%s1837_s5 + $0xb8] sm:$0xff] }
  0x97   : > { %v725_v42 = vpop.f32.mrf.mxu0  ;;  %v790_v43 = vpop.f32.mrf.mxu1 }
  0x98   : > { %v726_v45 = vadd.f32 %v1903_v39, %v725_v42  ;;  %v791_v46 = vadd.f32 %v1903_v39, %v790_v43 }
  0x9a   : > { %v970_v47 = vmax.f32 %v726_v45, 0.0  ;;  %v996_v48 = vmax.f32 %v791_v46, 0.0  ;;  %1562 = vmatmul.msk.bf16.gmra.mxu0 %vm561_vm2, %v1613_v40  ;;  %1575 = vmatmul.msk.bf16.gmra.mxu1 %vm561_vm2, %v1626_v41 }
  0x9b   : > { %1588 = vmatmul.msk.bf16.gmra.mxu2 %vm561_vm2, %v1639_v44  ;;  %1601 = vmatmul.msk.bf16.gmra.mxu3 %vm561_vm2, %v1652_v58  ;;  %v1641_v44 = vld [vmem:[%s1837_s5 + $0x120] sm:$0xff] }
  0x9c   : > { %v1068_v49 = vpack.c.bf16 %v970_v47, %v970_v47  ;;  %v1094_v50 = vpack.c.bf16 %v996_v48, %v996_v48 }
  0x9e   : > { %1167 = vst.msk [vmem:[%s1917_s8] sm:$0xf] %vm1166_vm3, %v1068_v49  ;;  %v855_v51 = vpop.f32.mrf.mxu2  ;;  %v920_v3 = vpop.f32.mrf.mxu3 }
  0x9f   : > { %1193 = vst.msk [vmem:[%s1917_s8 + $0x68] sm:$0xf] %vm1166_vm3, %v1094_v50  ;;  %v856_v52 = vadd.f32 %v1903_v39, %v855_v51  ;;  %v727_v53 = vpop.f32.mrf.mxu0  ;;  %v792_v54 = vpop.f32.mrf.mxu1  ;;  %v921_v16 = vadd.f32 %v1903_v39, %v920_v3 }
  0xa0   : > { %v728_v55 = vadd.f32 %v1903_v39, %v727_v53  ;;  %v793_v56 = vadd.f32 %v1903_v39, %v792_v54 }
  0xa1   : > { %v1022_v57 = vmax.f32 %v856_v52, 0.0  ;;  %v1048_v22 = vmax.f32 %v921_v16, 0.0 }
  0xa2   : > { %v971_v59 = vmax.f32 %v728_v55, 0.0  ;;  %v997_v60 = vmax.f32 %v793_v56, 0.0 }
  0xa3   : > { %v1120_v61 = vpack.c.bf16 %v1022_v57, %v1022_v57  ;;  %v1146_v27 = vpack.c.bf16 %v1048_v22, %v1048_v22 }
  0xa4   : > { %v1069_v62 = vpack.c.bf16 %v971_v59, %v971_v59  ;;  %v1095_v63 = vpack.c.bf16 %v997_v60, %v997_v60 }
  0xa5   : > { %1219 = vst.msk [vmem:[%s1917_s8 + $0xd0] sm:$0xf] %vm1166_vm3, %v1120_v61 }
  0xa6   : > { %1168 = vst.msk [vmem:[%s1917_s8 + $0x4] sm:$0xf] %vm1166_vm3, %v1069_v62  ;;  %v857_v0 = vpop.f32.mrf.mxu2  ;;  %v922_v18 = vpop.f32.mrf.mxu3 }
  0xa7   : > { %1194 = vst.msk [vmem:[%s1917_s8 + $0x6c] sm:$0xf] %vm1166_vm3, %v1095_v63  ;;  %v858_v4 = vadd.f32 %v1903_v39, %v857_v0  ;;  %v730_v5 = vpop.f32.mrf.mxu0  ;;  %v795_v6 = vpop.f32.mrf.mxu1  ;;  %v923_v23 = vadd.f32 %v1903_v39, %v922_v18 }
  0xa8   : > { %v731_v8 = vadd.f32 %v1903_v39, %v730_v5  ;;  %v796_v9 = vadd.f32 %v1903_v39, %v795_v6  ;;  %1245 = vst.msk [vmem:[%s1917_s8 + $0x138] sm:$0xf] %vm1166_vm3, %v1146_v27 }
  0xa9   : > { %v1023_v10 = vmax.f32 %v858_v4, 0.0  ;;  %v1049_v28 = vmax.f32 %v923_v23, 0.0 }
  0xaa   : > { %v972_v11 = vmax.f32 %v731_v8, 0.0  ;;  %v998_v12 = vmax.f32 %v796_v9, 0.0  ;;  %1563 = vmatmul.msk.bf16.gmra.mxu0 %vm561_vm2, %v1614_v1  ;;  %1576 = vmatmul.msk.bf16.gmra.mxu1 %vm561_vm2, %v1627_v2  ;;  %v1616_v9 = vld [vmem:[%s1837_s5 + $0x58] sm:$0xff] }
  0xab   : > { %v1121_v13 = vpack.c.bf16 %v1023_v10, %v1023_v10  ;;  %1589 = vmatmul.msk.bf16.gmra.mxu2 %vm561_vm2, %v1640_v7  ;;  %1602 = vmatmul.msk.bf16.gmra.mxu3 %vm561_vm2, %v1653_v29  ;;  %v1147_v35 = vpack.c.bf16 %v1049_v28, %v1049_v28  ;;  %v1629_v10 = vld [vmem:[%s1837_s5 + $0xc0] sm:$0xff] }
  0xac   : > { %v1070_v14 = vpack.c.bf16 %v972_v11, %v972_v11  ;;  %v1096_v15 = vpack.c.bf16 %v998_v12, %v998_v12 }
  0xad   : > { %1220 = vst.msk [vmem:[%s1917_s8 + $0xd4] sm:$0xf] %vm1166_vm3, %v1121_v13 }
  0xae   : > { %1169 = vst.msk [vmem:[%s1917_s8 + $0x8] sm:$0xf] %vm1166_vm3, %v1070_v14  ;;  %v860_v17 = vpop.f32.mrf.mxu2  ;;  %v925_v40 = vpop.f32.mrf.mxu3 }
  0xaf   : > { %1195 = vst.msk [vmem:[%s1917_s8 + $0x70] sm:$0xf] %vm1166_vm3, %v1096_v15  ;;  %v861_v19 = vadd.f32 %v1903_v39, %v860_v17  ;;  %v732_v20 = vpop.f32.mrf.mxu0  ;;  %v797_v21 = vpop.f32.mrf.mxu1  ;;  %v926_v53 = vadd.f32 %v1903_v39, %v925_v40  ;;  %v1642_v15 = vld [vmem:[%s1837_s5 + $0x128] sm:$0xff] }
  0xb0   : > { %v733_v24 = vadd.f32 %v1903_v39, %v732_v20  ;;  %v798_v25 = vadd.f32 %v1903_v39, %v797_v21  ;;  %1246 = vst.msk [vmem:[%s1917_s8 + $0x13c] sm:$0xf] %vm1166_vm3, %v1147_v35 }
  0xb1   : > { %v1024_v26 = vmax.f32 %v861_v19, 0.0  ;;  %v1050_v59 = vmax.f32 %v926_v53, 0.0 }
  0xb2   : > { %v973_v30 = vmax.f32 %v733_v24, 0.0  ;;  %v999_v31 = vmax.f32 %v798_v25, 0.0 }
  0xb3   : > { %v1122_v32 = vpack.c.bf16 %v1024_v26, %v1024_v26  ;;  %v1148_v0 = vpack.c.bf16 %v1050_v59, %v1050_v59 }
  0xb4   : > { %v1071_v33 = vpack.c.bf16 %v973_v30, %v973_v30  ;;  %v1097_v34 = vpack.c.bf16 %v999_v31, %v999_v31 }
  0xb5   : > { %1221 = vst.msk [vmem:[%s1917_s8 + $0xd8] sm:$0xf] %vm1166_vm3, %v1122_v32 }
  0xb6   : > { %1170 = vst.msk [vmem:[%s1917_s8 + $0xc] sm:$0xf] %vm1166_vm3, %v1071_v33  ;;  %v862_v36 = vpop.f32.mrf.mxu2  ;;  %v927_v55 = vpop.f32.mrf.mxu3 }
  0xb7   : > { %1196 = vst.msk [vmem:[%s1917_s8 + $0x74] sm:$0xf] %vm1166_vm3, %v1097_v34  ;;  %v863_v41 = vadd.f32 %v1903_v39, %v862_v36  ;;  %v735_v42 = vpop.f32.mrf.mxu0  ;;  %v800_v43 = vpop.f32.mrf.mxu1  ;;  %v928_v60 = vadd.f32 %v1903_v39, %v927_v55 }
  0xb8   : > { %v736_v45 = vadd.f32 %v1903_v39, %v735_v42  ;;  %v801_v46 = vadd.f32 %v1903_v39, %v800_v43  ;;  %1247 = vst.msk [vmem:[%s1917_s8 + $0x140] sm:$0xf] %vm1166_vm3, %v1148_v0 }
  0xb9   : > { %v1025_v47 = vmax.f32 %v863_v41, 0.0  ;;  %v1051_v1 = vmax.f32 %v928_v60, 0.0 }
  0xba   : > { %v974_v48 = vmax.f32 %v736_v45, 0.0  ;;  %v1000_v49 = vmax.f32 %v801_v46, 0.0  ;;  %1564 = vmatmul.msk.bf16.gmra.mxu0 %vm561_vm2, %v1615_v37  ;;  %1577 = vmatmul.msk.bf16.gmra.mxu1 %vm561_vm2, %v1628_v38  ;;  %v1617_v45 = vld [vmem:[%s1837_s5 + $0x60] sm:$0xff]  ;;  %v1630_v46 = vld [vmem:[%s1837_s5 + $0xc8] sm:$0xff] }
  0xbb   : > { %v1123_v50 = vpack.c.bf16 %v1025_v47, %v1025_v47  ;;  %1590 = vmatmul.msk.bf16.gmra.mxu2 %vm561_vm2, %v1641_v44  ;;  %v1149_v7 = vpack.c.bf16 %v1051_v1, %v1051_v1 }
  0xbc   : > { %v1072_v51 = vpack.c.bf16 %v974_v48, %v974_v48  ;;  %v1098_v52 = vpack.c.bf16 %v1000_v49, %v1000_v49 }
  0xbd   : > { %1222 = vst.msk [vmem:[%s1917_s8 + $0xdc] sm:$0xf] %vm1166_vm3, %v1123_v50 }
  0xbe   : > { %1171 = vst.msk [vmem:[%s1917_s8 + $0x10] sm:$0xf] %vm1166_vm3, %v1072_v51  ;;  %v865_v54 = vpop.f32.mrf.mxu2  ;;  %v930_v11 = vpop.f32.mrf.mxu3  ;;  %v1643_v51 = vld [vmem:[%s1837_s5 + $0x130] sm:$0xff] }
  0xbf   : > { %1197 = vst.msk [vmem:[%s1917_s8 + $0x78] sm:$0xf] %vm1166_vm3, %v1098_v52  ;;  %v866_v56 = vadd.f32 %v1903_v39, %v865_v54  ;;  %v737_v57 = vpop.f32.mrf.mxu0  ;;  %v802_v58 = vpop.f32.mrf.mxu1  ;;  %v931_v24 = vadd.f32 %v1903_v39, %v930_v11 }
  0xc0   : > { %v738_v61 = vadd.f32 %v1903_v39, %v737_v57  ;;  %v803_v62 = vadd.f32 %v1903_v39, %v802_v58  ;;  %1248 = vst.msk [vmem:[%s1917_s8 + $0x144] sm:$0xf] %vm1166_vm3, %v1149_v7 }
  0xc1   : > { %v1026_v63 = vmax.f32 %v866_v56, 0.0  ;;  %v1052_v30 = vmax.f32 %v931_v24, 0.0 }
  0xc2   : > { %v975_v2 = vmax.f32 %v738_v61, 0.0  ;;  %v1001_v3 = vmax.f32 %v803_v62, 0.0 }
  0xc3   : > { %v1124_v4 = vpack.c.bf16 %v1026_v63, %v1026_v63  ;;  %v1150_v35 = vpack.c.bf16 %v1052_v30, %v1052_v30 }
  0xc4   : > { %v1073_v5 = vpack.c.bf16 %v975_v2, %v975_v2  ;;  %v1099_v6 = vpack.c.bf16 %v1001_v3, %v1001_v3 }
  0xc5   : > { %1223 = vst.msk [vmem:[%s1917_s8 + $0xe0] sm:$0xf] %vm1166_vm3, %v1124_v4 }
  0xc6   : > { %1172 = vst.msk [vmem:[%s1917_s8 + $0x14] sm:$0xf] %vm1166_vm3, %v1073_v5  ;;  %v867_v8 = vpop.f32.mrf.mxu2  ;;  %v932_v26 = vpop.f32.mrf.mxu3 }
  0xc7   : > { %1198 = vst.msk [vmem:[%s1917_s8 + $0x7c] sm:$0xf] %vm1166_vm3, %v1099_v6  ;;  %v868_v12 = vadd.f32 %v1903_v39, %v867_v8  ;;  %v740_v13 = vpop.f32.mrf.mxu0  ;;  %v805_v14 = vpop.f32.mrf.mxu1  ;;  %v933_v31 = vadd.f32 %v1903_v39, %v932_v26 }
  0xc8   : > { %v741_v16 = vadd.f32 %v1903_v39, %v740_v13  ;;  %v806_v17 = vadd.f32 %v1903_v39, %v805_v14  ;;  %1249 = vst.msk [vmem:[%s1917_s8 + $0x148] sm:$0xf] %vm1166_vm3, %v1150_v35 }
  0xc9   : > { %v1027_v18 = vmax.f32 %v868_v12, 0.0  ;;  %v1053_v36 = vmax.f32 %v933_v31, 0.0 }
  0xca   : > { %v976_v19 = vmax.f32 %v741_v16, 0.0  ;;  %v1002_v20 = vmax.f32 %v806_v17, 0.0  ;;  %1565 = vmatmul.msk.bf16.gmra.mxu0 %vm561_vm2, %v1616_v9  ;;  %1578 = vmatmul.msk.bf16.gmra.mxu1 %vm561_vm2, %v1629_v10 }
  0xcb   : > { %v1125_v21 = vpack.c.bf16 %v1027_v18, %v1027_v18  ;;  %1591 = vmatmul.msk.bf16.gmra.mxu2 %vm561_vm2, %v1642_v15  ;;  %v1151_v43 = vpack.c.bf16 %v1053_v36, %v1053_v36 }
  0xcc   : > { %v1074_v22 = vpack.c.bf16 %v976_v19, %v976_v19  ;;  %v1100_v23 = vpack.c.bf16 %v1002_v20, %v1002_v20 }
  0xcd   : > { %1224 = vst.msk [vmem:[%s1917_s8 + $0xe4] sm:$0xf] %vm1166_vm3, %v1125_v21 }
  0xce   : > { %1173 = vst.msk [vmem:[%s1917_s8 + $0x18] sm:$0xf] %vm1166_vm3, %v1074_v22  ;;  %v870_v25 = vpop.f32.mrf.mxu2  ;;  %v935_v47 = vpop.f32.mrf.mxu3 }
  0xcf   : > { %1199 = vst.msk [vmem:[%s1917_s8 + $0x80] sm:$0xf] %vm1166_vm3, %v1100_v23  ;;  %v871_v27 = vadd.f32 %v1903_v39, %v870_v25  ;;  %v742_v28 = vpop.f32.mrf.mxu0  ;;  %v807_v29 = vpop.f32.mrf.mxu1  ;;  %v936_v60 = vadd.f32 %v1903_v39, %v935_v47 }
  0xd0   : > { %v743_v32 = vadd.f32 %v1903_v39, %v742_v28  ;;  %v808_v33 = vadd.f32 %v1903_v39, %v807_v29  ;;  %1250 = vst.msk [vmem:[%s1917_s8 + $0x14c] sm:$0xf] %vm1166_vm3, %v1151_v43 }
  0xd1   : > { %v1028_v34 = vmax.f32 %v871_v27, 0.0  ;;  %v1054_v2 = vmax.f32 %v936_v60, 0.0 }
  0xd2   : > { %v977_v37 = vmax.f32 %v743_v32, 0.0  ;;  %v1003_v38 = vmax.f32 %v808_v33, 0.0 }
  0xd3   : > { %v1126_v40 = vpack.c.bf16 %v1028_v34, %v1028_v34  ;;  %v1152_v7 = vpack.c.bf16 %v1054_v2, %v1054_v2 }
  0xd4   : > { %v1075_v41 = vpack.c.bf16 %v977_v37, %v977_v37  ;;  %v1101_v42 = vpack.c.bf16 %v1003_v38, %v1003_v38 }
  0xd5   : > { %1225 = vst.msk [vmem:[%s1917_s8 + $0xe8] sm:$0xf] %vm1166_vm3, %v1126_v40 }
  0xd6   : > { %1174 = vst.msk [vmem:[%s1917_s8 + $0x1c] sm:$0xf] %vm1166_vm3, %v1075_v41  ;;  %v872_v44 = vpop.f32.mrf.mxu2  ;;  %v937_v62 = vpop.f32.mrf.mxu3 }
  0xd7   : > { %1200 = vst.msk [vmem:[%s1917_s8 + $0x84] sm:$0xf] %vm1166_vm3, %v1101_v42  ;;  %v873_v48 = vadd.f32 %v1903_v39, %v872_v44  ;;  %v745_v49 = vpop.f32.mrf.mxu0  ;;  %v810_v50 = vpop.f32.mrf.mxu1  ;;  %v938_v3 = vadd.f32 %v1903_v39, %v937_v62 }
  0xd8   : > { %v746_v52 = vadd.f32 %v1903_v39, %v745_v49  ;;  %v811_v53 = vadd.f32 %v1903_v39, %v810_v50  ;;  %1251 = vst.msk [vmem:[%s1917_s8 + $0x150] sm:$0xf] %vm1166_vm3, %v1152_v7 }
  0xd9   : > { %v1029_v54 = vmax.f32 %v873_v48, 0.0  ;;  %v1055_v8 = vmax.f32 %v938_v3, 0.0 }
  0xda   : > { %v978_v55 = vmax.f32 %v746_v52, 0.0  ;;  %v1004_v56 = vmax.f32 %v811_v53, 0.0  ;;  %1566 = vmatmul.msk.bf16.gmra.mxu0 %vm561_vm2, %v1617_v45  ;;  %1579 = vmatmul.msk.bf16.gmra.mxu1 %vm561_vm2, %v1630_v46 }
  0xdb   : > { %v1127_v57 = vpack.c.bf16 %v1029_v54, %v1029_v54  ;;  %1592 = vmatmul.msk.bf16.gmra.mxu2 %vm561_vm2, %v1643_v51  ;;  %v1153_v14 = vpack.c.bf16 %v1055_v8, %v1055_v8 }
  0xdc   : > { %v1076_v58 = vpack.c.bf16 %v978_v55, %v978_v55  ;;  %v1102_v59 = vpack.c.bf16 %v1004_v56, %v1004_v56 }
  0xdd   : > { %1226 = vst.msk [vmem:[%s1917_s8 + $0xec] sm:$0xf] %vm1166_vm3, %v1127_v57 }
  0xde   : > { %1175 = vst.msk [vmem:[%s1917_s8 + $0x20] sm:$0xf] %vm1166_vm3, %v1076_v58  ;;  %v875_v61 = vpop.f32.mrf.mxu2  ;;  %v940_v16 = vpop.f32.mrf.mxu3 }
  0xdf   : > { %1201 = vst.msk [vmem:[%s1917_s8 + $0x88] sm:$0xf] %vm1166_vm3, %v1102_v59  ;;  %v876_v63 = vadd.f32 %v1903_v39, %v875_v61  ;;  %v747_v0 = vpop.f32.mrf.mxu0  ;;  %v812_v1 = vpop.f32.mrf.mxu1  ;;  %v941_v28 = vadd.f32 %v1903_v39, %v940_v16 }
  0xe0   : > { %v748_v4 = vadd.f32 %v1903_v39, %v747_v0  ;;  %v813_v5 = vadd.f32 %v1903_v39, %v812_v1  ;;  %1252 = vst.msk [vmem:[%s1917_s8 + $0x154] sm:$0xf] %vm1166_vm3, %v1153_v14 }
  0xe1   : > { %v1030_v6 = vmax.f32 %v876_v63, 0.0  ;;  %v1056_v34 = vmax.f32 %v941_v28, 0.0 }
  0xe2   : > { %v979_v9 = vmax.f32 %v748_v4, 0.0  ;;  %v1005_v10 = vmax.f32 %v813_v5, 0.0 }
  0xe3   : > { %v1128_v11 = vpack.c.bf16 %v1030_v6, %v1030_v6  ;;  %v1154_v40 = vpack.c.bf16 %v1056_v34, %v1056_v34 }
  0xe4   : > { %v1077_v12 = vpack.c.bf16 %v979_v9, %v979_v9  ;;  %v1103_v13 = vpack.c.bf16 %v1005_v10, %v1005_v10 }
  0xe5   : > { %1227 = vst.msk [vmem:[%s1917_s8 + $0xf0] sm:$0xf] %vm1166_vm3, %v1128_v11 }
  0xe6   : > { %1176 = vst.msk [vmem:[%s1917_s8 + $0x24] sm:$0xf] %vm1166_vm3, %v1077_v12  ;;  %v877_v15 = vpop.f32.mrf.mxu2  ;;  %v942_v30 = vpop.f32.mrf.mxu3 }
  0xe7   : > { %1202 = vst.msk [vmem:[%s1917_s8 + $0x8c] sm:$0xf] %vm1166_vm3, %v1103_v13  ;;  %v878_v17 = vadd.f32 %v1903_v39, %v877_v15  ;;  %v750_v18 = vpop.f32.mrf.mxu0  ;;  %v815_v19 = vpop.f32.mrf.mxu1  ;;  %v943_v35 = vadd.f32 %v1903_v39, %v942_v30 }
  0xe8   : > { %v751_v20 = vadd.f32 %v1903_v39, %v750_v18  ;;  %v816_v21 = vadd.f32 %v1903_v39, %v815_v19  ;;  %1253 = vst.msk [vmem:[%s1917_s8 + $0x158] sm:$0xf] %vm1166_vm3, %v1154_v40 }
  0xe9   : > { %v1031_v22 = vmax.f32 %v878_v17, 0.0  ;;  %v1057_v41 = vmax.f32 %v943_v35, 0.0 }
  0xea   : > { %v980_v23 = vmax.f32 %v751_v20, 0.0  ;;  %v1006_v24 = vmax.f32 %v816_v21, 0.0 }
  0xeb   : > { %v1129_v25 = vpack.c.bf16 %v1031_v22, %v1031_v22  ;;  %v1155_v47 = vpack.c.bf16 %v1057_v41, %v1057_v41 }
  0xec   : > { %v1078_v26 = vpack.c.bf16 %v980_v23, %v980_v23  ;;  %v1104_v27 = vpack.c.bf16 %v1006_v24, %v1006_v24 }
  0xed   : > { %1228 = vst.msk [vmem:[%s1917_s8 + $0xf4] sm:$0xf] %vm1166_vm3, %v1129_v25 }
  0xee   : > { %1177 = vst.msk [vmem:[%s1917_s8 + $0x28] sm:$0xf] %vm1166_vm3, %v1078_v26  ;;  %v880_v29 = vpop.f32.mrf.mxu2  ;;  %v945_v49 = vpop.f32.mrf.mxu3 }
  0xef   : > { %1203 = vst.msk [vmem:[%s1917_s8 + $0x90] sm:$0xf] %vm1166_vm3, %v1104_v27  ;;  %v881_v31 = vadd.f32 %v1903_v39, %v880_v29  ;;  %v752_v32 = vpop.f32.mrf.mxu0  ;;  %v817_v33 = vpop.f32.mrf.mxu1  ;;  %v946_v61 = vadd.f32 %v1903_v39, %v945_v49 }
  0xf0   : > { %v753_v36 = vadd.f32 %v1903_v39, %v752_v32  ;;  %v818_v37 = vadd.f32 %v1903_v39, %v817_v33  ;;  %1254 = vst.msk [vmem:[%s1917_s8 + $0x15c] sm:$0xf] %vm1166_vm3, %v1155_v47 }
  0xf1   : > { %v1032_v38 = vmax.f32 %v881_v31, 0.0  ;;  %v1058_v3 = vmax.f32 %v946_v61, 0.0 }
  0xf2   : > { %v981_v42 = vmax.f32 %v753_v36, 0.0  ;;  %v1007_v43 = vmax.f32 %v818_v37, 0.0 }
  0xf3   : > { %v1130_v44 = vpack.c.bf16 %v1032_v38, %v1032_v38  ;;  %v1156_v8 = vpack.c.bf16 %v1058_v3, %v1058_v3 }
  0xf4   : > { %v1079_v45 = vpack.c.bf16 %v981_v42, %v981_v42  ;;  %v1105_v46 = vpack.c.bf16 %v1007_v43, %v1007_v43 }
  0xf5   : > { %1229 = vst.msk [vmem:[%s1917_s8 + $0xf8] sm:$0xf] %vm1166_vm3, %v1130_v44 }
  0xf6   : > { %1178 = vst.msk [vmem:[%s1917_s8 + $0x2c] sm:$0xf] %vm1166_vm3, %v1079_v45  ;;  %v882_v48 = vpop.f32.mrf.mxu2  ;;  %v947_v63 = vpop.f32.mrf.mxu3 }
  0xf7   : > { %1204 = vst.msk [vmem:[%s1917_s8 + $0x94] sm:$0xf] %vm1166_vm3, %v1105_v46  ;;  %v883_v50 = vadd.f32 %v1903_v39, %v882_v48  ;;  %v755_v51 = vpop.f32.mrf.mxu0  ;;  %v820_v52 = vpop.f32.mrf.mxu1  ;;  %v948_v4 = vadd.f32 %v1903_v39, %v947_v63 }
  0xf8   : > { %v756_v53 = vadd.f32 %v1903_v39, %v755_v51  ;;  %v821_v54 = vadd.f32 %v1903_v39, %v820_v52  ;;  %1255 = vst.msk [vmem:[%s1917_s8 + $0x160] sm:$0xf] %vm1166_vm3, %v1156_v8 }
  0xf9   : > { %v1033_v55 = vmax.f32 %v883_v50, 0.0  ;;  %v1059_v9 = vmax.f32 %v948_v4, 0.0 }
  0xfa   : > { %v982_v56 = vmax.f32 %v756_v53, 0.0  ;;  %v1008_v57 = vmax.f32 %v821_v54, 0.0 }
  0xfb   : > { %v1131_v58 = vpack.c.bf16 %v1033_v55, %v1033_v55  ;;  %v1157_v15 = vpack.c.bf16 %v1059_v9, %v1059_v9 }
  0xfc   : > { %v1080_v59 = vpack.c.bf16 %v982_v56, %v982_v56  ;;  %v1106_v60 = vpack.c.bf16 %v1008_v57, %v1008_v57 }
  0xfd   : > { %1230 = vst.msk [vmem:[%s1917_s8 + $0xfc] sm:$0xf] %vm1166_vm3, %v1131_v58 }
  0xfe   : > { %1179 = vst.msk [vmem:[%s1917_s8 + $0x30] sm:$0xf] %vm1166_vm3, %v1080_v59  ;;  %v885_v62 = vpop.f32.mrf.mxu2  ;;  %v950_v17 = vpop.f32.mrf.mxu3 }
  0xff   : > { %1205 = vst.msk [vmem:[%s1917_s8 + $0x98] sm:$0xf] %vm1166_vm3, %v1106_v60  ;;  %v886_v0 = vadd.f32 %v1903_v39, %v885_v62  ;;  %v757_v1 = vpop.f32.mrf.mxu0  ;;  %v822_v2 = vpop.f32.mrf.mxu1  ;;  %v951_v29 = vadd.f32 %v1903_v39, %v950_v17 }
 0x100   : > { %v758_v5 = vadd.f32 %v1903_v39, %v757_v1  ;;  %v823_v6 = vadd.f32 %v1903_v39, %v822_v2  ;;  %1256 = vst.msk [vmem:[%s1917_s8 + $0x164] sm:$0xf] %vm1166_vm3, %v1157_v15 }
 0x101   : > { %v1034_v7 = vmax.f32 %v886_v0, 0.0  ;;  %v1060_v35 = vmax.f32 %v951_v29, 0.0 }
 0x102   : > { %v983_v10 = vmax.f32 %v758_v5, 0.0  ;;  %v1009_v11 = vmax.f32 %v823_v6, 0.0 }
 0x103   : > { %v1132_v12 = vpack.c.bf16 %v1034_v7, %v1034_v7  ;;  %v1158_v41 = vpack.c.bf16 %v1060_v35, %v1060_v35 }
 0x104   : > { %v1081_v13 = vpack.c.bf16 %v983_v10, %v983_v10  ;;  %v1107_v14 = vpack.c.bf16 %v1009_v11, %v1009_v11 }
 0x105   : > { %1231 = vst.msk [vmem:[%s1917_s8 + $0x100] sm:$0xf] %vm1166_vm3, %v1132_v12 }
 0x106   : > { %1180 = vst.msk [vmem:[%s1917_s8 + $0x34] sm:$0xf] %vm1166_vm3, %v1081_v13  ;;  %v887_v16 = vpop.f32.mrf.mxu2  ;;  %v952_v31 = vpop.f32.mrf.mxu3 }
 0x107   : > { %1206 = vst.msk [vmem:[%s1917_s8 + $0x9c] sm:$0xf] %vm1166_vm3, %v1107_v14  ;;  %v888_v18 = vadd.f32 %v1903_v39, %v887_v16  ;;  %v760_v19 = vpop.f32.mrf.mxu0  ;;  %v825_v20 = vpop.f32.mrf.mxu1  ;;  %v953_v36 = vadd.f32 %v1903_v39, %v952_v31 }
 0x108   : > { %v761_v21 = vadd.f32 %v1903_v39, %v760_v19  ;;  %v826_v22 = vadd.f32 %v1903_v39, %v825_v20  ;;  %1257 = vst.msk [vmem:[%s1917_s8 + $0x168] sm:$0xf] %vm1166_vm3, %v1158_v41 }
 0x109   : > { %v1035_v23 = vmax.f32 %v888_v18, 0.0  ;;  %v1061_v42 = vmax.f32 %v953_v36, 0.0 }
 0x10a   : > { %v984_v24 = vmax.f32 %v761_v21, 0.0  ;;  %v1010_v25 = vmax.f32 %v826_v22, 0.0 }
 0x10b   : > { %v1133_v26 = vpack.c.bf16 %v1035_v23, %v1035_v23  ;;  %v1159_v48 = vpack.c.bf16 %v1061_v42, %v1061_v42 }
 0x10c   : > { %v1082_v27 = vpack.c.bf16 %v984_v24, %v984_v24  ;;  %v1108_v28 = vpack.c.bf16 %v1010_v25, %v1010_v25 }
 0x10d   : > { %1232 = vst.msk [vmem:[%s1917_s8 + $0x104] sm:$0xf] %vm1166_vm3, %v1133_v26 }
 0x10e   : > { %1181 = vst.msk [vmem:[%s1917_s8 + $0x38] sm:$0xf] %vm1166_vm3, %v1082_v27  ;;  %v890_v30 = vpop.f32.mrf.mxu2  ;;  %v955_v50 = vpop.f32.mrf.mxu3 }
 0x10f   : > { %1207 = vst.msk [vmem:[%s1917_s8 + $0xa0] sm:$0xf] %vm1166_vm3, %v1108_v28  ;;  %v891_v32 = vadd.f32 %v1903_v39, %v890_v30  ;;  %v762_v33 = vpop.f32.mrf.mxu0  ;;  %v827_v34 = vpop.f32.mrf.mxu1  ;;  %v956_v62 = vadd.f32 %v1903_v39, %v955_v50 }
 0x110   : > { %v763_v37 = vadd.f32 %v1903_v39, %v762_v33  ;;  %v828_v38 = vadd.f32 %v1903_v39, %v827_v34  ;;  %1258 = vst.msk [vmem:[%s1917_s8 + $0x16c] sm:$0xf] %vm1166_vm3, %v1159_v48 }
 0x111   : > { %v1036_v40 = vmax.f32 %v891_v32, 0.0  ;;  %v1062_v4 = vmax.f32 %v956_v62, 0.0 }
 0x112   : > { %v985_v43 = vmax.f32 %v763_v37, 0.0  ;;  %v1011_v44 = vmax.f32 %v828_v38, 0.0 }
 0x113   : > { %v1134_v45 = vpack.c.bf16 %v1036_v40, %v1036_v40  ;;  %v1160_v9 = vpack.c.bf16 %v1062_v4, %v1062_v4 }
 0x114   : > { %v1083_v46 = vpack.c.bf16 %v985_v43, %v985_v43  ;;  %v1109_v47 = vpack.c.bf16 %v1011_v44, %v1011_v44 }
 0x115   : > { %1233 = vst.msk [vmem:[%s1917_s8 + $0x108] sm:$0xf] %vm1166_vm3, %v1134_v45 }
 0x116   : > { %1182 = vst.msk [vmem:[%s1917_s8 + $0x3c] sm:$0xf] %vm1166_vm3, %v1083_v46  ;;  %v892_v49 = vpop.f32.mrf.mxu2  ;;  %v957_v0 = vpop.f32.mrf.mxu3 }
 0x117   : > { %1208 = vst.msk [vmem:[%s1917_s8 + $0xa4] sm:$0xf] %vm1166_vm3, %v1109_v47  ;;  %v893_v51 = vadd.f32 %v1903_v39, %v892_v49  ;;  %v765_v52 = vpop.f32.mrf.mxu0  ;;  %v830_v53 = vpop.f32.mrf.mxu1  ;;  %v958_v5 = vadd.f32 %v1903_v39, %v957_v0 }
 0x118   : > { %v766_v54 = vadd.f32 %v1903_v39, %v765_v52  ;;  %v831_v55 = vadd.f32 %v1903_v39, %v830_v53  ;;  %1259 = vst.msk [vmem:[%s1917_s8 + $0x170] sm:$0xf] %vm1166_vm3, %v1160_v9 }
 0x119   : > { %v1037_v56 = vmax.f32 %v893_v51, 0.0  ;;  %v1063_v10 = vmax.f32 %v958_v5, 0.0 }
 0x11a   : > { %v986_v57 = vmax.f32 %v766_v54, 0.0  ;;  %v1012_v58 = vmax.f32 %v831_v55, 0.0 }
 0x11b   : > { %v1135_v59 = vpack.c.bf16 %v1037_v56, %v1037_v56  ;;  %v1161_v16 = vpack.c.bf16 %v1063_v10, %v1063_v10 }
 0x11c   : > { %v1084_v60 = vpack.c.bf16 %v986_v57, %v986_v57  ;;  %v1110_v61 = vpack.c.bf16 %v1012_v58, %v1012_v58 }
 0x11d   : > { %1234 = vst.msk [vmem:[%s1917_s8 + $0x10c] sm:$0xf] %vm1166_vm3, %v1135_v59 }
 0x11e   : > { %1183 = vst.msk [vmem:[%s1917_s8 + $0x40] sm:$0xf] %vm1166_vm3, %v1084_v60  ;;  %v895_v63 = vpop.f32.mrf.mxu2  ;;  %v960_v18 = vpop.f32.mrf.mxu3 }
 0x11f   : > { %1209 = vst.msk [vmem:[%s1917_s8 + $0xa8] sm:$0xf] %vm1166_vm3, %v1110_v61  ;;  %v896_v1 = vadd.f32 %v1903_v39, %v895_v63  ;;  %v767_v2 = vpop.f32.mrf.mxu0  ;;  %v832_v3 = vpop.f32.mrf.mxu1  ;;  %v961_v30 = vadd.f32 %v1903_v39, %v960_v18 }
 0x120   : > { %v768_v6 = vadd.f32 %v1903_v39, %v767_v2  ;;  %v833_v7 = vadd.f32 %v1903_v39, %v832_v3  ;;  %1260 = vst.msk [vmem:[%s1917_s8 + $0x174] sm:$0xf] %vm1166_vm3, %v1161_v16 }
 0x121   : > { %v1038_v8 = vmax.f32 %v896_v1, 0.0  ;;  %v1064_v36 = vmax.f32 %v961_v30, 0.0 }
 0x122   : > { %v987_v11 = vmax.f32 %v768_v6, 0.0  ;;  %v1013_v12 = vmax.f32 %v833_v7, 0.0 }
 0x123   : > { %v1136_v13 = vpack.c.bf16 %v1038_v8, %v1038_v8  ;;  %v1162_v42 = vpack.c.bf16 %v1064_v36, %v1064_v36 }
 0x124   : > { %v1085_v14 = vpack.c.bf16 %v987_v11, %v987_v11  ;;  %v1111_v15 = vpack.c.bf16 %v1013_v12, %v1013_v12 }
 0x125   : > { %1235 = vst.msk [vmem:[%s1917_s8 + $0x110] sm:$0xf] %vm1166_vm3, %v1136_v13 }
 0x126   : > { %1184 = vst.msk [vmem:[%s1917_s8 + $0x44] sm:$0xf] %vm1166_vm3, %v1085_v14  ;;  %v897_v17 = vpop.f32.mrf.mxu2  ;;  %v962_v32 = vpop.f32.mrf.mxu3 }
 0x127   : > { %1210 = vst.msk [vmem:[%s1917_s8 + $0xac] sm:$0xf] %vm1166_vm3, %v1111_v15  ;;  %v898_v19 = vadd.f32 %v1903_v39, %v897_v17  ;;  %v770_v20 = vpop.f32.mrf.mxu0  ;;  %v835_v21 = vpop.f32.mrf.mxu1  ;;  %v963_v37 = vadd.f32 %v1903_v39, %v962_v32 }
 0x128   : > { %v771_v22 = vadd.f32 %v1903_v39, %v770_v20  ;;  %v836_v23 = vadd.f32 %v1903_v39, %v835_v21  ;;  %1261 = vst.msk [vmem:[%s1917_s8 + $0x178] sm:$0xf] %vm1166_vm3, %v1162_v42 }
 0x129   : > { %v1039_v24 = vmax.f32 %v898_v19, 0.0  ;;  %v1065_v43 = vmax.f32 %v963_v37, 0.0 }
 0x12a   : > { %v988_v25 = vmax.f32 %v771_v22, 0.0  ;;  %v1014_v26 = vmax.f32 %v836_v23, 0.0 }
 0x12b   : > { %v1137_v27 = vpack.c.bf16 %v1039_v24, %v1039_v24  ;;  %v1163_v49 = vpack.c.bf16 %v1065_v43, %v1065_v43 }
 0x12c   : > { %v1086_v28 = vpack.c.bf16 %v988_v25, %v988_v25  ;;  %v1112_v29 = vpack.c.bf16 %v1014_v26, %v1014_v26 }
 0x12d   : > { %1236 = vst.msk [vmem:[%s1917_s8 + $0x114] sm:$0xf] %vm1166_vm3, %v1137_v27 }
 0x12e   : > { %1185 = vst.msk [vmem:[%s1917_s8 + $0x48] sm:$0xf] %vm1166_vm3, %v1086_v28  ;;  %v900_v31 = vpop.f32.mrf.mxu2  ;;  %v965_v51 = vpop.f32.mrf.mxu3 }
 0x12f   : > { %1211 = vst.msk [vmem:[%s1917_s8 + $0xb0] sm:$0xf] %vm1166_vm3, %v1112_v29  ;;  %v901_v33 = vadd.f32 %v1903_v39, %v900_v31  ;;  %v772_v34 = vpop.f32.mrf.mxu0  ;;  %v837_v35 = vpop.f32.mrf.mxu1  ;;  %v966_v63 = vadd.f32 %v1903_v39, %v965_v51 }
 0x130   : > { %v773_v38 = vadd.f32 %v1903_v39, %v772_v34  ;;  %v838_v40 = vadd.f32 %v1903_v39, %v837_v35  ;;  %1262 = vst.msk [vmem:[%s1917_s8 + $0x17c] sm:$0xf] %vm1166_vm3, %v1163_v49 }
 0x131   : > { %v1040_v41 = vmax.f32 %v901_v33, 0.0  ;;  %v1066_v5 = vmax.f32 %v966_v63, 0.0 }
 0x132   : > { %v989_v44 = vmax.f32 %v773_v38, 0.0  ;;  %v1015_v45 = vmax.f32 %v838_v40, 0.0 }
 0x133   : > { %v1138_v46 = vpack.c.bf16 %v1040_v41, %v1040_v41  ;;  %v1164_v10 = vpack.c.bf16 %v1066_v5, %v1066_v5 }
 0x134   : > { %v1087_v47 = vpack.c.bf16 %v989_v44, %v989_v44  ;;  %v1113_v48 = vpack.c.bf16 %v1015_v45, %v1015_v45 }
 0x135   : > { %1237 = vst.msk [vmem:[%s1917_s8 + $0x118] sm:$0xf] %vm1166_vm3, %v1138_v46 }
 0x136   : > { %1186 = vst.msk [vmem:[%s1917_s8 + $0x4c] sm:$0xf] %vm1166_vm3, %v1087_v47  ;;  %v902_v50 = vpop.f32.mrf.mxu2  ;;  %v967_v1 = vpop.f32.mrf.mxu3 }
 0x137   : > { %1212 = vst.msk [vmem:[%s1917_s8 + $0xb4] sm:$0xf] %vm1166_vm3, %v1113_v48  ;;  %v903_v52 = vadd.f32 %v1903_v39, %v902_v50  ;;  %v775_v53 = vpop.f32.mrf.mxu0  ;;  %v840_v54 = vpop.f32.mrf.mxu1  ;;  %v968_v6 = vadd.f32 %v1903_v39, %v967_v1 }
 0x138   : > { %v776_v55 = vadd.f32 %v1903_v39, %v775_v53  ;;  %v841_v56 = vadd.f32 %v1903_v39, %v840_v54  ;;  %1263 = vst.msk [vmem:[%s1917_s8 + $0x180] sm:$0xf] %vm1166_vm3, %v1164_v10 }
 0x139   : > { %v1041_v57 = vmax.f32 %v903_v52, 0.0  ;;  %v1067_v11 = vmax.f32 %v968_v6, 0.0 }
 0x13a   : > { %v990_v58 = vmax.f32 %v776_v55, 0.0  ;;  %v1016_v59 = vmax.f32 %v841_v56, 0.0 }
 0x13b   : > { %v1139_v60 = vpack.c.bf16 %v1041_v57, %v1041_v57  ;;  %v1165_v17 = vpack.c.bf16 %v1067_v11, %v1067_v11 }
 0x13c   : > { %v1088_v61 = vpack.c.bf16 %v990_v58, %v990_v58  ;;  %v1114_v62 = vpack.c.bf16 %v1016_v59, %v1016_v59 }
 0x13d   : > { %1238 = vst.msk [vmem:[%s1917_s8 + $0x11c] sm:$0xf] %vm1166_vm3, %v1139_v60  ;;  %v1691_v60 = vld [vmem:[#allocation4] ss:$0 sm:$0xff] }
 0x13e   : > { %1187 = vst.msk [vmem:[%s1917_s8 + $0x50] sm:$0xf] %vm1166_vm3, %v1088_v61  ;;  %v905_v0 = vpop.f32.mrf.mxu2 }
 0x13f   : > { %1213 = vst.msk [vmem:[%s1917_s8 + $0xb8] sm:$0xf] %vm1166_vm3, %v1114_v62  ;;  %v906_v2 = vadd.f32 %v1903_v39, %v905_v0  ;;  %v777_v3 = vpop.f32.mrf.mxu0  ;;  %v842_v4 = vpop.f32.mrf.mxu1 }
 0x140   : > { %v778_v7 = vadd.f32 %v1903_v39, %v777_v3  ;;  %v843_v8 = vadd.f32 %v1903_v39, %v842_v4  ;;  %1264 = vst.msk [vmem:[%s1917_s8 + $0x184] sm:$0xf] %vm1166_vm3, %v1165_v17 }
 0x141   : > { %v1042_v9 = vmax.f32 %v906_v2, 0.0 }
 0x142   : > { %v991_v12 = vmax.f32 %v778_v7, 0.0  ;;  %v1017_v13 = vmax.f32 %v843_v8, 0.0 }
 0x143   : > { %v1140_v14 = vpack.c.bf16 %v1042_v9, %v1042_v9 }
 0x144   : > { %v1089_v15 = vpack.c.bf16 %v991_v12, %v991_v12  ;;  %v1115_v16 = vpack.c.bf16 %v1017_v13, %v1017_v13 }
 0x145   : > { %1239 = vst.msk [vmem:[%s1917_s8 + $0x120] sm:$0xf] %vm1166_vm3, %v1140_v14 }
 0x146   : > { %1188 = vst.msk [vmem:[%s1917_s8 + $0x54] sm:$0xf] %vm1166_vm3, %v1089_v15  ;;  %v907_v18 = vpop.f32.mrf.mxu2 }
 0x147   : > { %1214 = vst.msk [vmem:[%s1917_s8 + $0xbc] sm:$0xf] %vm1166_vm3, %v1115_v16  ;;  %v908_v19 = vadd.f32 %v1903_v39, %v907_v18  ;;  %v780_v20 = vpop.f32.mrf.mxu0  ;;  %v845_v21 = vpop.f32.mrf.mxu1 }
 0x148   : > { %v781_v22 = vadd.f32 %v1903_v39, %v780_v20  ;;  %v846_v23 = vadd.f32 %v1903_v39, %v845_v21 }
 0x149   : > { %v1043_v24 = vmax.f32 %v908_v19, 0.0 }
 0x14a   : > { %v992_v25 = vmax.f32 %v781_v22, 0.0  ;;  %v1018_v26 = vmax.f32 %v846_v23, 0.0 }
 0x14b   : > { %v1141_v27 = vpack.c.bf16 %v1043_v24, %v1043_v24 }
 0x14c   : > { %v1090_v28 = vpack.c.bf16 %v992_v25, %v992_v25  ;;  %v1116_v29 = vpack.c.bf16 %v1018_v26, %v1018_v26 }
 0x14d   : > { %1240 = vst.msk [vmem:[%s1917_s8 + $0x124] sm:$0xf] %vm1166_vm3, %v1141_v27 }
 0x14e   : > { %1189 = vst.msk [vmem:[%s1917_s8 + $0x58] sm:$0xf] %vm1166_vm3, %v1090_v28  ;;  %v910_v30 = vpop.f32.mrf.mxu2 }
 0x14f   : > { %1215 = vst.msk [vmem:[%s1917_s8 + $0xc0] sm:$0xf] %vm1166_vm3, %v1116_v29  ;;  %v911_v31 = vadd.f32 %v1903_v39, %v910_v30  ;;  %v782_v32 = vpop.f32.mrf.mxu0  ;;  %v847_v33 = vpop.f32.mrf.mxu1 }
 0x150   : > { %v783_v34 = vadd.f32 %v1903_v39, %v782_v32  ;;  %v848_v35 = vadd.f32 %v1903_v39, %v847_v33 }
 0x151   : > { %v1044_v36 = vmax.f32 %v911_v31, 0.0 }
 0x152   : > { %v993_v37 = vmax.f32 %v783_v34, 0.0  ;;  %v1019_v38 = vmax.f32 %v848_v35, 0.0 }
 0x153   : > { %v1142_v40 = vpack.c.bf16 %v1044_v36, %v1044_v36 }
 0x154   : > { %v1091_v41 = vpack.c.bf16 %v993_v37, %v993_v37  ;;  %v1117_v42 = vpack.c.bf16 %v1019_v38, %v1019_v38 }
 0x155   : > { %1241 = vst.msk [vmem:[%s1917_s8 + $0x128] sm:$0xf] %vm1166_vm3, %v1142_v40 }
 0x156   : > { %1190 = vst.msk [vmem:[%s1917_s8 + $0x5c] sm:$0xf] %vm1166_vm3, %v1091_v41  ;;  %v912_v43 = vpop.f32.mrf.mxu2 }
 0x157   : > { %1216 = vst.msk [vmem:[%s1917_s8 + $0xc4] sm:$0xf] %vm1166_vm3, %v1117_v42  ;;  %v913_v44 = vadd.f32 %v1903_v39, %v912_v43  ;;  %v785_v45 = vpop.f32.mrf.mxu0  ;;  %v850_v46 = vpop.f32.mrf.mxu1 }
 0x158   : > { %v786_v47 = vadd.f32 %v1903_v39, %v785_v45  ;;  %v851_v48 = vadd.f32 %v1903_v39, %v850_v46 }
 0x159   : > { %v1045_v49 = vmax.f32 %v913_v44, 0.0 }
 0x15a   : > { %v994_v50 = vmax.f32 %v786_v47, 0.0  ;;  %v1020_v51 = vmax.f32 %v851_v48, 0.0 }
 0x15b   : > { %v1143_v52 = vpack.c.bf16 %v1045_v49, %v1045_v49 }
 0x15c   : > { %v1092_v53 = vpack.c.bf16 %v994_v50, %v994_v50  ;;  %v1118_v54 = vpack.c.bf16 %v1020_v51, %v1020_v51 }
 0x15d   : > { %1242 = vst.msk [vmem:[%s1917_s8 + $0x12c] sm:$0xf] %vm1166_vm3, %v1143_v52 }
 0x15e   : > { %1191 = vst.msk [vmem:[%s1917_s8 + $0x60] sm:$0xf] %vm1166_vm3, %v1092_v53  ;;  %v915_v55 = vpop.f32.mrf.mxu2 }
 0x15f   : > { %1217 = vst.msk [vmem:[%s1917_s8 + $0xc8] sm:$0xf] %vm1166_vm3, %v1118_v54  ;;  %v916_v56 = vadd.f32 %v1903_v39, %v915_v55  ;;  %v787_v57 = vpop.f32.mrf.mxu0  ;;  %v852_v58 = vpop.f32.mrf.mxu1 }
 0x160   : > { %v788_v59 = vadd.f32 %v1903_v39, %v787_v57  ;;  %v853_v61 = vadd.f32 %v1691_v60, %v852_v58 }
 0x161   : > { %v1046_v62 = vmax.f32 %v916_v56, 0.0 }
 0x162   : > { %v995_v63 = vmax.f32 %v788_v59, 0.0  ;;  %v1021_v0 = vmax.f32 %v853_v61, 0.0 }
 0x163   : > { %v1144_v1 = vpack.c.bf16 %v1046_v62, %v1046_v62 }
 0x164   : > { %v1093_v2 = vpack.c.bf16 %v995_v63, %v995_v63  ;;  %v1119_v3 = vpack.c.bf16 %v1021_v0, %v1021_v0 }
 0x165   : > { %1243 = vst.msk [vmem:[%s1917_s8 + $0x130] sm:$0xf] %vm1166_vm3, %v1144_v1 }
 0x166   : > { %1192 = vst.msk [vmem:[%s1917_s8 + $0x64] sm:$0xf] %vm1166_vm3, %v1093_v2  ;;  %v917_v4 = vpop.f32.mrf.mxu2 }
 0x167   : > { %1218 = vst.msk [vmem:[%s1917_s8 + $0xcc] sm:$0xf] %vm1166_vm3, %v1119_v3  ;;  %v918_v5 = vadd.f32 %v1691_v60, %v917_v4 }
 0x169   : > { %v1047_v6 = vmax.f32 %v918_v5, 0.0 }
 0x16b   : > { %v1145_v7 = vpack.c.bf16 %v1047_v6, %v1047_v6 }
 0x16d   : > { %1244 = vst.msk [vmem:[%s1917_s8 + $0x134] sm:$0xf] %vm1166_vm3, %v1145_v7 }
 0x16e PF: > { %s15_s12 = sadd.s32 1, %s1766_s12  }
 0x16f   : > { %p12_p7 = scmp.ge.s32.totalorder %s15_s12, 4  }
 0x171   :  { %14 = sbr.rel (!%p12_p7) target bundleno = 2 (0x2), region = 71 }
 0x176   :  { %1287 = vsyncpa [#allocation3], 1 }
 0x177   :  { %1289 = vsyncpa [#allocation3 + $0x1], 1 }
 0x178   :  { %1290 = vsyncpa [#allocation5], 1 }

// kernel: cnnnet_forward.5
= control target key start
LH: loop header
LB: loop body
LE: loop exit
PB: predicated region body
PF: predicated region fallthrough
CT: control target
= control target key end

     0   :  { %s2442_s12 = smov 0   ;;  %s3220_s0 = inlined_call_operand.vmem [shape: bf16[1568,144], index: 0, kind: input, shape index: {}]   ;;  %s3221_s1 = inlined_call_operand.vmem [shape: bf16[144,32], index: 1, kind: input, shape index: {}]   ;;  %s3222_s2 = inlined_call_operand.vmem [shape: f32[1,32], index: 2, kind: input, shape index: {}]   ;;  %s3223_s3 = inlined_call_operand.vmem [shape: bf16[1568,32], index: 3, kind: output, shape index: {}]  }
   0x1 LB: > { %s1800_s13 = sadd.s32 4294967295, %s2420_s12   ;;  %p1804_p0 = scmp.ge.s32.totalorder %s2420_s12, 1  ;;  %s2420_s12 = sphi %s2442_s12, %s13_s12  }
   0x2   : > { %p139_p1 = scmp.lt.s32.totalorder %s2420_s12, 3 }
   0x4   : > { %p140_p2 = pnand %p1804_p0, %p139_p1 }
   0x5   : > { %s164_s18 = smul.u32 (!%p140_p2), 98, %s1800_s13 }
   0x6   : > { %143 = sbr.rel (%p140_p2) target bundleno = 576 (0x240), region = 32 }
   0x7   : > { %p165_p3 = scmp.lt.s32.totalorder (!%p140_p2), %s164_s18, 195 }
   0xb   : > { %v2393_v0 = vld [vmem:[%s3221_s1 + $0x38] sm:$0xff]  ;;  %v2394_v1 = vld [vmem:[%s3221_s1 + $0x40] sm:$0xff]  ;;  %v2392_v2 = vld [vmem:[%s3221_s1 + $0x30] sm:$0xff]  ;;  %s3225_s18 = smov (!%p165_p3, %s164_s18), 195  ;;  %vm793_vm0 = vcmask 130048   ;;  %vm1645_vm1 = vcmask 257024  }
   0xc   : > { %941 = vmatpush.bf16.msra.mxu0 %v2393_v0  ;;  %2395 = vmatpush.bf16.msra.mxu2 %v2393_v0  ;;  %v2391_v3 = vld [vmem:[%s3221_s1 + $0x28] sm:$0xff]  ;;  %s2287_s23 = sshll.u32 %s3225_s18, 3  ;;  %v2390_v7 = vld [vmem:[%s3221_s1 + $0x20] sm:$0xff]  ;;  %v2389_v8 = vld [vmem:[%s3221_s1 + $0x18] sm:$0xff]  ;;  %s1807_s13 = sshll.u32 %s3225_s18, 2 }
   0xd   : > { %1202 = vmatpush.bf16.msra.mxu1 %v2394_v1  ;;  %2403 = vmatpush.bf16.msra.mxu3 %v2394_v1  ;;  %s2468_s26 = scalar_lea.vmem %s3220_s0, %s2287_s23  ;;  %v2388_v9 = vld [vmem:[%s3221_s1 + $0x10] sm:$0xff]  ;;  %v2387_v12 = vld [vmem:[%s3221_s1 + $0x8] sm:$0xff]  ;;  %v2386_v16 = vld [vmem:[%s3221_s1] sm:$0xff]  ;;  %s2590_s16 = scalar_lea.vmem %s3223_s3, %s1807_s13 }
   0xe   : > { %v2288_v4 = vld [vmem:[%s2468_s26 + $0x4] sm:$0xf]  ;;  %v1812_v5 = vld [vmem:[%s2468_s26 + $0x8] sm:$0xf0]  ;;  %v2290_v10 = vld [vmem:[%s2468_s26 + $0x14] sm:$0xf] }
   0xf   : > { %v1815_v6 = vor.u32 %v2288_v4, %v1812_v5  ;;  %v1820_v11 = vld [vmem:[%s2468_s26 + $0x18] sm:$0xf0]  ;;  %v2340_v14 = vld [vmem:[%s2468_s26 + $0x1a4] sm:$0xf]  ;;  %v2020_v15 = vld [vmem:[%s2468_s26 + $0x1a8] sm:$0xf0] }
  0x10   : > { %942 = vmatpush.bf16.msra.mxu0 %v2392_v2  ;;  %2396 = vmatpush.bf16.msra.mxu2 %v2392_v2  ;;  %v1823_v13 = vor.u32 %v2290_v10, %v1820_v11  ;;  %v1810_v17 = vld [vmem:[%s2468_s26] sm:$0xf]  ;;  %v2023_v18 = vor.u32 %v2340_v14, %v2020_v15  ;;  %v2289_v19 = vld [vmem:[%s2468_s26 + $0x4] sm:$0xf0]  ;;  %v2292_v24 = vld [vmem:[%s2468_s26 + $0x24] sm:$0xf] }
  0x11   : > { %2236 = vmatmul.msk.bf16.vlgmr.msra.gmra.mxu1 %vm793_vm0, %v1815_v6  ;;  %v2002_v20 = vld [vmem:[%s2468_s26 + $0x180] sm:$0xf]  ;;  %v2337_v21 = vld [vmem:[%s2468_s26 + $0x184] sm:$0xf0]  ;;  %v1811_v22 = vor.u32 %v2289_v19, %v1810_v17  ;;  %v1828_v25 = vld [vmem:[%s2468_s26 + $0x28] sm:$0xf0] }
  0x12   : > { %2262 = vmatmul.msk.bf16.vlgmr.msra.gmra.mxu3 %vm793_vm0, %v2023_v18  ;;  %v2003_v23 = vor.u32 %v2337_v21, %v2002_v20  ;;  %v1831_v26 = vor.u32 %v2292_v24, %v1828_v25  ;;  %v2342_v27 = vld [vmem:[%s2468_s26 + $0x1b4] sm:$0xf]  ;;  %v2028_v28 = vld [vmem:[%s2468_s26 + $0x1b8] sm:$0xf0]  ;;  %v1818_v29 = vld [vmem:[%s2468_s26 + $0x10] sm:$0xf] }
  0x13   : > { %v2031_v30 = vor.u32 %v2342_v27, %v2028_v28  ;;  %v2291_v31 = vld [vmem:[%s2468_s26 + $0x14] sm:$0xf0]  ;;  %v2010_v32 = vld [vmem:[%s2468_s26 + $0x190] sm:$0xf]  ;;  %v2294_v36 = vld [vmem:[%s2468_s26 + $0x34] sm:$0xf] }
  0x14   : > { %943 = vmatpush.bf16.msra.mxu0 %v2391_v3  ;;  %2397 = vmatpush.bf16.msra.mxu2 %v2391_v3  ;;  %v2339_v33 = vld [vmem:[%s2468_s26 + $0x194] sm:$0xf0]  ;;  %v1819_v34 = vor.u32 %v2291_v31, %v1818_v29  ;;  %v1836_v37 = vld [vmem:[%s2468_s26 + $0x38] sm:$0xf0]  ;;  %v2344_v39 = vld [vmem:[%s2468_s26 + $0x1c4] sm:$0xf] }
  0x15   : > { %v2011_v35 = vor.u32 %v2339_v33, %v2010_v32  ;;  %v1839_v38 = vor.u32 %v2294_v36, %v1836_v37  ;;  %v2036_v40 = vld [vmem:[%s2468_s26 + $0x1c8] sm:$0xf0]  ;;  %v1826_v41 = vld [vmem:[%s2468_s26 + $0x20] sm:$0xf]  ;;  %v2293_v43 = vld [vmem:[%s2468_s26 + $0x24] sm:$0xf0] }
  0x16   : > { %v2039_v42 = vor.u32 %v2344_v39, %v2036_v40  ;;  %v2018_v44 = vld [vmem:[%s2468_s26 + $0x1a0] sm:$0xf]  ;;  %v2341_v45 = vld [vmem:[%s2468_s26 + $0x1a4] sm:$0xf0]  ;;  %v1827_v46 = vor.u32 %v2293_v43, %v1826_v41  ;;  %v2296_v48 = vld [vmem:[%s2468_s26 + $0x44] sm:$0xf] }
  0x17   : > { %v2019_v47 = vor.u32 %v2341_v45, %v2018_v44  ;;  %v1844_v49 = vld [vmem:[%s2468_s26 + $0x48] sm:$0xf0]  ;;  %v2346_v51 = vld [vmem:[%s2468_s26 + $0x1d4] sm:$0xf]  ;;  %v2044_v52 = vld [vmem:[%s2468_s26 + $0x1d8] sm:$0xf0] }
  0x18   : > { %944 = vmatpush.bf16.msra.mxu0 %v2390_v7  ;;  %2398 = vmatpush.bf16.msra.mxu2 %v2390_v7  ;;  %v1847_v50 = vor.u32 %v2296_v48, %v1844_v49  ;;  %v1834_v53 = vld [vmem:[%s2468_s26 + $0x30] sm:$0xf]  ;;  %v2047_v54 = vor.u32 %v2346_v51, %v2044_v52  ;;  %v2295_v55 = vld [vmem:[%s2468_s26 + $0x34] sm:$0xf0]  ;;  %v2298_v60 = vld [vmem:[%s2468_s26 + $0x54] sm:$0xf] }
  0x19   : > { %v2026_v56 = vld [vmem:[%s2468_s26 + $0x1b0] sm:$0xf]  ;;  %v2343_v57 = vld [vmem:[%s2468_s26 + $0x1b4] sm:$0xf0]  ;;  %v1835_v58 = vor.u32 %v2295_v55, %v1834_v53  ;;  %v1852_v61 = vld [vmem:[%s2468_s26 + $0x58] sm:$0xf0] }
  0x1a   : > { %v2027_v59 = vor.u32 %v2343_v57, %v2026_v56  ;;  %v1855_v62 = vor.u32 %v2298_v60, %v1852_v61  ;;  %v2348_v63 = vld [vmem:[%s2468_s26 + $0x1e4] sm:$0xf]  ;;  %v2052_v0 = vld [vmem:[%s2468_s26 + $0x1e8] sm:$0xf0]  ;;  %v1842_v1 = vld [vmem:[%s2468_s26 + $0x40] sm:$0xf] }
  0x1b   : > { %v2055_v2 = vor.u32 %v2348_v63, %v2052_v0  ;;  %v2297_v3 = vld [vmem:[%s2468_s26 + $0x44] sm:$0xf0]  ;;  %v2034_v4 = vld [vmem:[%s2468_s26 + $0x1c0] sm:$0xf]  ;;  %v2350_v11 = vld [vmem:[%s2468_s26 + $0x1f4] sm:$0xf] }
  0x1c   : > { %945 = vmatpush.bf16.msra.mxu0 %v2389_v8  ;;  %2399 = vmatpush.bf16.msra.mxu2 %v2389_v8  ;;  %v2345_v5 = vld [vmem:[%s2468_s26 + $0x1c4] sm:$0xf0]  ;;  %v1843_v6 = vor.u32 %v2297_v3, %v1842_v1  ;;  %v2300_v8 = vld [vmem:[%s2468_s26 + $0x64] sm:$0xf]  ;;  %v2299_v14 = vld [vmem:[%s2468_s26 + $0x54] sm:$0xf0] }
  0x1d   : > { %v2035_v7 = vor.u32 %v2345_v5, %v2034_v4  ;;  %v2042_v15 = vld [vmem:[%s2468_s26 + $0x1d0] sm:$0xf]  ;;  %v2302_v20 = vld [vmem:[%s2468_s26 + $0x74] sm:$0xf]  ;;  %v1868_v21 = vld [vmem:[%s2468_s26 + $0x78] sm:$0xf0] }
  0x1e   : > { %v1858_v24 = vld [vmem:[%s2468_s26 + $0x60] sm:$0xf]  ;;  %v2068_v25 = vld [vmem:[%s2468_s26 + $0x208] sm:$0xf0]  ;;  %v2349_v28 = vld [vmem:[%s2468_s26 + $0x1e4] sm:$0xf0] }
  0x1f   : > { %v2050_v27 = vld [vmem:[%s2468_s26 + $0x1e0] sm:$0xf]  ;;  %v2304_v32 = vld [vmem:[%s2468_s26 + $0x84] sm:$0xf]  ;;  %v1876_v33 = vld [vmem:[%s2468_s26 + $0x88] sm:$0xf0] }
  0x20   : > { %946 = vmatpush.bf16.msra.mxu0 %v2388_v9  ;;  %2400 = vmatpush.bf16.msra.mxu2 %v2388_v9  ;;  %v1860_v9 = vld [vmem:[%s2468_s26 + $0x68] sm:$0xf0]  ;;  %v2051_v31 = vor.u32 %v2349_v28, %v2050_v27  ;;  %v2354_v36 = vld [vmem:[%s2468_s26 + $0x214] sm:$0xf]  ;;  %v1866_v37 = vld [vmem:[%s2468_s26 + $0x70] sm:$0xf] }
  0x21   : > { %2237 = vmatmul.msk.bf16.gmra.mxu1 %vm793_vm0, %v1823_v13  ;;  %v1863_v10 = vor.u32 %v2300_v8, %v1860_v9  ;;  %v2060_v13 = vld [vmem:[%s2468_s26 + $0x1f8] sm:$0xf0]  ;;  %v2303_v39 = vld [vmem:[%s2468_s26 + $0x74] sm:$0xf0]  ;;  %v2058_v40 = vld [vmem:[%s2468_s26 + $0x1f0] sm:$0xf] }
  0x22   : > { %2263 = vmatmul.msk.bf16.gmra.mxu3 %vm793_vm0, %v2031_v30  ;;  %v2063_v17 = vor.u32 %v2350_v11, %v2060_v13  ;;  %v2351_v41 = vld [vmem:[%s2468_s26 + $0x1f4] sm:$0xf0]  ;;  %v1867_v43 = vor.u32 %v2303_v39, %v1866_v37  ;;  %v1874_v51 = vld [vmem:[%s2468_s26 + $0x80] sm:$0xf]  ;;  %v2084_v52 = vld [vmem:[%s2468_s26 + $0x228] sm:$0xf0] }
  0x23   : > { %v2059_v44 = vor.u32 %v2351_v41, %v2058_v40  ;;  %v2305_v53 = vld [vmem:[%s2468_s26 + $0x84] sm:$0xf0]  ;;  %v2580_v57 = vld [vmem:[%s3222_s2] ss:$0 sm:$0xff]  ;;  %v2308_v3 = vld [vmem:[%s2468_s26 + $0xa4] sm:$0xf] }
  0x24   : > { %947 = vmatpush.bf16.msra.mxu0 %v2387_v12  ;;  %2401 = vmatpush.bf16.msra.mxu2 %v2387_v12  ;;  %v1850_v12 = vld [vmem:[%s2468_s26 + $0x50] sm:$0xf]  ;;  %v2353_v55 = vld [vmem:[%s2468_s26 + $0x204] sm:$0xf0]  ;;  %v1892_v4 = vld [vmem:[%s2468_s26 + $0xa8] sm:$0xf0] }
  0x25   : > { %v1851_v18 = vor.u32 %v2299_v14, %v1850_v12  ;;  %v1895_v9 = vor.u32 %v2308_v3, %v1892_v4  ;;  %v2358_v11 = vld [vmem:[%s2468_s26 + $0x234] sm:$0xf]  ;;  %v1882_v13 = vld [vmem:[%s2468_s26 + $0x90] sm:$0xf]  ;;  %v2092_v14 = vld [vmem:[%s2468_s26 + $0x238] sm:$0xf0] }
  0x26   : > { %v2360_v39 = vld [vmem:[%s2468_s26 + $0x244] sm:$0xf]  ;;  %v1890_v41 = vld [vmem:[%s2468_s26 + $0xa0] sm:$0xf] }
  0x28   : > { %948 = vmatpush.bf16.msra.mxu0 %v2386_v16  ;;  %2402 = vmatpush.bf16.msra.mxu2 %v2386_v16  ;;  %v2347_v16 = vld [vmem:[%s2468_s26 + $0x1d4] sm:$0xf0] }
  0x29   : > { %v2043_v19 = vor.u32 %v2347_v16, %v2042_v15  ;;  %v2307_v15 = vld [vmem:[%s2468_s26 + $0x94] sm:$0xf0]  ;;  %v2074_v16 = vld [vmem:[%s2468_s26 + $0x210] sm:$0xf] }
  0x2b   : > { %949 = vmatmul.bf16.vlgmr.msra.gmra.mxu0 %v1811_v22  ;;  %1069 = vmatmul.bf16.vlgmr.msra.gmra.mxu2 %v2003_v23  ;;  %v1871_v22 = vor.u32 %v2302_v20, %v1868_v21  ;;  %v2352_v23 = vld [vmem:[%s2468_s26 + $0x204] sm:$0xf] }
  0x2c   : > { %v2071_v29 = vor.u32 %v2352_v23, %v2068_v25 }
  0x31   : > { %2238 = vmatmul.msk.bf16.gmra.mxu1 %vm793_vm0, %v1831_v26  ;;  %v2301_v26 = vld [vmem:[%s2468_s26 + $0x64] sm:$0xf0] }
  0x32   : > { %2264 = vmatmul.msk.bf16.gmra.mxu3 %vm793_vm0, %v2039_v42  ;;  %v1859_v30 = vor.u32 %v2301_v26, %v1858_v24 }
  0x3b   : > { %954 = vmatmul.bf16.gmra.mxu0 %v1819_v34  ;;  %1074 = vmatmul.bf16.gmra.mxu2 %v2011_v35  ;;  %v1879_v34 = vor.u32 %v2304_v32, %v1876_v33  ;;  %v1900_v32 = vld [vmem:[%s2468_s26 + $0xb8] sm:$0xf0] }
  0x41   : > { %2239 = vmatmul.msk.bf16.gmra.mxu1 %vm793_vm0, %v1839_v38  ;;  %v2076_v38 = vld [vmem:[%s2468_s26 + $0x218] sm:$0xf0] }
  0x42   : > { %2265 = vmatmul.msk.bf16.gmra.mxu3 %vm793_vm0, %v2047_v54  ;;  %v2079_v42 = vor.u32 %v2354_v36, %v2076_v38  ;;  %v2066_v54 = vld [vmem:[%s2468_s26 + $0x200] sm:$0xf] }
  0x4b   : > { %959 = vmatmul.bf16.gmra.mxu0 %v1827_v46  ;;  %1079 = vmatmul.bf16.gmra.mxu2 %v2019_v47  ;;  %v2306_v46 = vld [vmem:[%s2468_s26 + $0x94] sm:$0xf]  ;;  %v1884_v47 = vld [vmem:[%s2468_s26 + $0x98] sm:$0xf0] }
  0x4c   : > { %v1887_v48 = vor.u32 %v2306_v46, %v1884_v47 }
  0x51   : > { %2240 = vmatmul.msk.bf16.gmra.mxu1 %vm793_vm0, %v1847_v50  ;;  %v2356_v50 = vld [vmem:[%s2468_s26 + $0x224] sm:$0xf] }
  0x52   : > { %2266 = vmatmul.msk.bf16.gmra.mxu3 %vm793_vm0, %v2055_v2  ;;  %v2087_v56 = vor.u32 %v2356_v50, %v2084_v52 }
  0x5b   : > { %964 = vmatmul.bf16.gmra.mxu0 %v1835_v58  ;;  %1084 = vmatmul.bf16.gmra.mxu2 %v2027_v59  ;;  %v1875_v58 = vor.u32 %v2305_v53, %v1874_v51  ;;  %v2067_v59 = vor.u32 %v2353_v55, %v2066_v54 }
  0x61   : > { %2241 = vmatmul.msk.bf16.gmra.mxu1 %vm793_vm0, %v1855_v62 }
  0x62   : > { %2267 = vmatmul.msk.bf16.gmra.mxu3 %vm793_vm0, %v2063_v17  ;;  %v2355_v17 = vld [vmem:[%s2468_s26 + $0x214] sm:$0xf0] }
  0x63   : > { %v2075_v23 = vor.u32 %v2355_v17, %v2074_v16  ;;  %v2359_v16 = vld [vmem:[%s2468_s26 + $0x234] sm:$0xf0] }
  0x6b   : > { %969 = vmatmul.bf16.gmra.mxu0 %v1843_v6  ;;  %1089 = vmatmul.bf16.gmra.mxu2 %v2035_v7 }
  0x71   : > { %2242 = vmatmul.msk.bf16.gmra.mxu1 %vm793_vm0, %v1863_v10 }
  0x72   : > { %2268 = vmatmul.msk.bf16.gmra.mxu3 %vm793_vm0, %v2071_v29 }
  0x7b   : > { %974 = vmatmul.bf16.gmra.mxu0 %v1851_v18  ;;  %1094 = vmatmul.bf16.gmra.mxu2 %v2043_v19  ;;  %v2095_v18 = vor.u32 %v2358_v11, %v2092_v14  ;;  %v2311_v14 = vld [vmem:[%s2468_s26 + $0xb4] sm:$0xf0] }
  0x81   : > { %2243 = vmatmul.msk.bf16.gmra.mxu1 %vm793_vm0, %v1871_v22  ;;  %v1883_v22 = vor.u32 %v2307_v15, %v1882_v13  ;;  %v2108_v13 = vld [vmem:[%s2468_s26 + $0x258] sm:$0xf0]  ;;  %v2090_v15 = vld [vmem:[%s2468_s26 + $0x230] sm:$0xf] }
  0x82   : > { %2269 = vmatmul.msk.bf16.gmra.mxu3 %vm793_vm0, %v2079_v42  ;;  %v2100_v42 = vld [vmem:[%s2468_s26 + $0x248] sm:$0xf0] }
  0x83   : > { %v2103_v46 = vor.u32 %v2360_v39, %v2100_v42  ;;  %v2314_v39 = vld [vmem:[%s2468_s26 + $0xd4] sm:$0xf] }
  0x8b   : > { %979 = vmatmul.bf16.gmra.mxu0 %v1859_v30  ;;  %1099 = vmatmul.bf16.gmra.mxu2 %v2051_v31  ;;  %v2310_v31 = vld [vmem:[%s2468_s26 + $0xb4] sm:$0xf] }
  0x8c   : > { %v1903_v37 = vor.u32 %v2310_v31, %v1900_v32 }
  0x8e   : > { %v1204_v35 = vpop.f32.mrf.mxu1 }
  0x91   : > { %2244 = vmatmul.msk.bf16.gmra.mxu1 %vm793_vm0, %v1879_v34 }
  0x92   : > { %2270 = vmatmul.msk.bf16.gmra.mxu3 %vm793_vm0, %v2087_v56 }
  0x95   : > { %v2583_v61 = vpop.f32.mrf.mxu3 }
  0x96   : > { %v1206_v45 = vpop.f32.mrf.mxu1 }
  0x9b   : > { %984 = vmatmul.bf16.gmra.mxu0 %v1867_v43  ;;  %1104 = vmatmul.bf16.gmra.mxu2 %v2059_v44  ;;  %v2309_v43 = vld [vmem:[%s2468_s26 + $0xa4] sm:$0xf0]  ;;  %v2082_v44 = vld [vmem:[%s2468_s26 + $0x220] sm:$0xf] }
  0x9c   : > { %v1891_v50 = vor.u32 %v2309_v43, %v1890_v41 }
  0x9d   : > { %v2596_v7 = vpop.f32.mrf.mxu3 }
  0x9e   : > { %v1209_v49 = vpop.f32.mrf.mxu1 }
  0xa1   : > { %2245 = vmatmul.msk.bf16.gmra.mxu1 %vm793_vm0, %v1887_v48 }
  0xa2   : > { %2271 = vmatmul.msk.bf16.gmra.mxu3 %vm793_vm0, %v2095_v18 }
  0xa5   : > { %v2611_v25 = vpop.f32.mrf.mxu3 }
  0xa6   : > { %v1211_v63 = vpop.f32.mrf.mxu1 }
  0xa8   : > { %v950_v60 = vpop.f32.mrf.mxu0 }
  0xa9   : > { %v951_v62 = vadd.f32 %v2580_v57, %v950_v60  ;;  %v2312_v60 = vld [vmem:[%s2468_s26 + $0xc4] sm:$0xf] }
  0xab   : > { %v1205_v0 = vadd.f32 %v1204_v35, %v951_v62  ;;  %989 = vmatmul.bf16.gmra.mxu0 %v1875_v58  ;;  %1109 = vmatmul.bf16.gmra.mxu2 %v2067_v59  ;;  %v1908_v62 = vld [vmem:[%s2468_s26 + $0xc8] sm:$0xf0] }
  0xad   : > { %v1449_v1 = vmax.f32 %v1205_v0, 0.0  ;;  %v2620_v35 = vpop.f32.mrf.mxu3 }
  0xae   : > { %v2592_v2 = vpop.f32.mrf.mxu2  ;;  %v1214_v10 = vpop.f32.mrf.mxu1 }
  0xaf   : > { %v1547_v5 = vpack.c.bf16 %v1449_v1, %v1449_v1 }
  0xb0   : > { %v952_v6 = vpop.f32.mrf.mxu0 }
  0xb1   : > { %1646 = vst.msk [vmem:[%s2590_s16] sm:$0xf] %vm1645_vm1, %v1547_v5  ;;  %v953_v8 = vadd.f32 %v2580_v57, %v952_v6  ;;  %2246 = vmatmul.msk.bf16.gmra.mxu1 %vm793_vm0, %v1895_v9  ;;  %v1911_v6 = vor.u32 %v2312_v60, %v1908_v62  ;;  %v2362_v9 = vld [vmem:[%s2468_s26 + $0x254] sm:$0xf] }
  0xb2   : > { %2272 = vmatmul.msk.bf16.gmra.mxu3 %vm793_vm0, %v2103_v46  ;;  %v2111_v17 = vor.u32 %v2362_v9, %v2108_v13 }
  0xb3   : > { %v1207_v12 = vadd.f32 %v1206_v45, %v953_v8  ;;  %v2357_v45 = vld [vmem:[%s2468_s26 + $0x224] sm:$0xf0] }
  0xb4   : > { %v2083_v51 = vor.u32 %v2357_v45, %v2082_v44 }
  0xb5   : > { %v1450_v19 = vmax.f32 %v1207_v12, 0.0  ;;  %v2637_v53 = vpop.f32.mrf.mxu3  ;;  %v1898_v12 = vld [vmem:[%s2468_s26 + $0xb0] sm:$0xf] }
  0xb6   : > { %v2608_v20 = vpop.f32.mrf.mxu2  ;;  %v1216_v27 = vpop.f32.mrf.mxu1 }
  0xb7   : > { %v1548_v21 = vpack.c.bf16 %v1450_v19, %v1450_v19 }
  0xb8   : > { %v955_v24 = vpop.f32.mrf.mxu0 }
  0xb9   : > { %1647 = vst.msk [vmem:[%s2590_s16 + $0x4] sm:$0xf] %vm1645_vm1, %v1548_v21  ;;  %v956_v26 = vadd.f32 %v2580_v57, %v955_v24  ;;  %v2091_v24 = vor.u32 %v2359_v16, %v2090_v15  ;;  %v2316_v16 = vld [vmem:[%s2468_s26 + $0xe4] sm:$0xf] }
  0xbb   : > { %v1210_v28 = vadd.f32 %v1209_v49, %v956_v26  ;;  %994 = vmatmul.bf16.gmra.mxu0 %v1883_v22  ;;  %1114 = vmatmul.bf16.gmra.mxu2 %v2075_v23  ;;  %v1899_v23 = vor.u32 %v2311_v14, %v1898_v12 }
  0xbd   : > { %v1451_v29 = vmax.f32 %v1210_v28, 0.0  ;;  %v2647_v3 = vpop.f32.mrf.mxu3 }
  0xbe   : > { %v2616_v30 = vpop.f32.mrf.mxu2  ;;  %v2625_v38 = vpop.f32.mrf.mxu1 }
  0xbf   : > { %v1549_v33 = vpack.c.bf16 %v1451_v29, %v1451_v29 }
  0xc0   : > { %v957_v34 = vpop.f32.mrf.mxu0 }
  0xc1   : > { %1648 = vst.msk [vmem:[%s2590_s16 + $0x8] sm:$0xf] %vm1645_vm1, %v1549_v33  ;;  %v958_v36 = vadd.f32 %v2580_v57, %v957_v34  ;;  %2247 = vmatmul.msk.bf16.gmra.mxu1 %vm793_vm0, %v1903_v37 }
  0xc2   : > { %2273 = vmatmul.msk.bf16.gmra.mxu3 %vm793_vm0, %v2111_v17  ;;  %v1924_v17 = vld [vmem:[%s2468_s26 + $0xe8] sm:$0xf0] }
  0xc3   : > { %v1212_v40 = vadd.f32 %v1211_v63, %v958_v36 }
  0xc5   : > { %v1452_v47 = vmax.f32 %v1212_v40, 0.0  ;;  %v1916_v40 = vld [vmem:[%s2468_s26 + $0xd8] sm:$0xf0] }
  0xc6   : > { %v2634_v48 = vpop.f32.mrf.mxu2  ;;  %v2642_v55 = vpop.f32.mrf.mxu1  ;;  %v1919_v45 = vor.u32 %v2314_v39, %v1916_v40 }
  0xc7   : > { %v1550_v49 = vpack.c.bf16 %v1452_v47, %v1452_v47  ;;  %v2364_v47 = vld [vmem:[%s2468_s26 + $0x264] sm:$0xf] }
  0xc8   : > { %v960_v52 = vpop.f32.mrf.mxu0 }
  0xc9   : > { %1649 = vst.msk [vmem:[%s2590_s16 + $0xc] sm:$0xf] %vm1645_vm1, %v1550_v49  ;;  %v961_v54 = vadd.f32 %v2580_v57, %v960_v52  ;;  %v2116_v52 = vld [vmem:[%s2468_s26 + $0x268] sm:$0xf0] }
  0xcb   : > { %v1215_v56 = vadd.f32 %v1214_v10, %v961_v54  ;;  %999 = vmatmul.bf16.gmra.mxu0 %v1891_v50  ;;  %1119 = vmatmul.bf16.gmra.mxu2 %v2083_v51  ;;  %v1906_v51 = vld [vmem:[%s2468_s26 + $0xc0] sm:$0xf]  ;;  %v2313_v54 = vld [vmem:[%s2468_s26 + $0xc4] sm:$0xf0] }
  0xcd   : > { %v1453_v58 = vmax.f32 %v1215_v56, 0.0  ;;  %v2098_v56 = vld [vmem:[%s2468_s26 + $0x240] sm:$0xf] }
  0xce   : > { %v1080_v59 = vpop.f32.mrf.mxu2  ;;  %v2653_v8 = vpop.f32.mrf.mxu1 }
  0xcf   : > { %v1551_v63 = vpack.c.bf16 %v1453_v58, %v1453_v58  ;;  %v1081_v0 = vadd.f32 %v2580_v57, %v1080_v59  ;;  %v2361_v58 = vld [vmem:[%s2468_s26 + $0x244] sm:$0xf0]  ;;  %v2119_v59 = vor.u32 %v2364_v47, %v2116_v52 }
  0xd0   : > { %v962_v1 = vpop.f32.mrf.mxu0 }
  0xd1   : > { %1650 = vst.msk [vmem:[%s2590_s16 + $0x10] sm:$0xf] %vm1645_vm1, %v1551_v63  ;;  %v1335_v4 = vadd.f32 %v2583_v61, %v1081_v0  ;;  %v963_v5 = vadd.f32 %v2580_v57, %v962_v1  ;;  %2248 = vmatmul.msk.bf16.gmra.mxu1 %vm793_vm0, %v1911_v6  ;;  %v2099_v1 = vor.u32 %v2361_v58, %v2098_v56  ;;  %v2318_v58 = vld [vmem:[%s2468_s26 + $0xf4] sm:$0xf] }
  0xd2   : > { %2274 = vmatmul.msk.bf16.gmra.mxu3 %vm793_vm0, %v2119_v59 }
  0xd3   : > { %v1501_v10 = vmax.f32 %v1335_v4, 0.0  ;;  %v1217_v11 = vadd.f32 %v1216_v27, %v963_v5  ;;  %v2666_v27 = vpop.f32.mrf.mxu3 }
  0xd5   : > { %v1599_v18 = vpack.c.bf16 %v1501_v10, %v1501_v10  ;;  %v1454_v19 = vmax.f32 %v1217_v11, 0.0 }
  0xd6   : > { %v1082_v61 = vpop.f32.mrf.mxu2  ;;  %v2672_v31 = vpop.f32.mrf.mxu1 }
  0xd7   : > { %1698 = vst.msk [vmem:[%s2590_s16 + $0xd0] sm:$0xf] %vm1645_vm1, %v1599_v18  ;;  %v1552_v21 = vpack.c.bf16 %v1454_v19, %v1454_v19  ;;  %v1083_v22 = vadd.f32 %v2580_v57, %v1082_v61 }
  0xd8   : > { %v965_v26 = vpop.f32.mrf.mxu0 }
  0xd9   : > { %1651 = vst.msk [vmem:[%s2590_s16 + $0x14] sm:$0xf] %vm1645_vm1, %v1552_v21  ;;  %v1337_v28 = vadd.f32 %v2596_v7, %v1083_v22  ;;  %v966_v29 = vadd.f32 %v2580_v57, %v965_v26  ;;  %v1927_v22 = vor.u32 %v2316_v16, %v1924_v17 }
  0xdb   : > { %v1502_v32 = vmax.f32 %v1337_v28, 0.0  ;;  %v1220_v33 = vadd.f32 %v2625_v38, %v966_v29  ;;  %1004 = vmatmul.bf16.gmra.mxu0 %v1899_v23  ;;  %1124 = vmatmul.bf16.gmra.mxu2 %v2091_v24  ;;  %v2680_v38 = vpop.f32.mrf.mxu3  ;;  %v2366_v24 = vld [vmem:[%s2468_s26 + $0x274] sm:$0xf]  ;;  %v1914_v29 = vld [vmem:[%s2468_s26 + $0xd0] sm:$0xf] }
  0xdd   : > { %v1600_v34 = vpack.c.bf16 %v1502_v32, %v1502_v32  ;;  %v1455_v36 = vmax.f32 %v1220_v33, 0.0  ;;  %v2124_v32 = vld [vmem:[%s2468_s26 + $0x278] sm:$0xf0]  ;;  %v2315_v33 = vld [vmem:[%s2468_s26 + $0xd4] sm:$0xf0] }
  0xde   : > { %v1085_v37 = vpop.f32.mrf.mxu2  ;;  %v2686_v46 = vpop.f32.mrf.mxu1 }
  0xdf   : > { %1699 = vst.msk [vmem:[%s2590_s16 + $0xd4] sm:$0xf] %vm1645_vm1, %v1600_v34  ;;  %v1553_v7 = vpack.c.bf16 %v1455_v36, %v1455_v36  ;;  %v1086_v41 = vadd.f32 %v2580_v57, %v1085_v37  ;;  %v2106_v34 = vld [vmem:[%s2468_s26 + $0x250] sm:$0xf]  ;;  %v2363_v36 = vld [vmem:[%s2468_s26 + $0x254] sm:$0xf0]  ;;  %v2127_v37 = vor.u32 %v2366_v24, %v2124_v32 }
  0xe0   : > { %v967_v42 = vpop.f32.mrf.mxu0 }
  0xe1   : > { %1652 = vst.msk [vmem:[%s2590_s16 + $0x18] sm:$0xf] %vm1645_vm1, %v1553_v7  ;;  %v1340_v43 = vadd.f32 %v2611_v25, %v1086_v41  ;;  %v968_v44 = vadd.f32 %v2580_v57, %v967_v42  ;;  %2249 = vmatmul.msk.bf16.gmra.mxu1 %vm793_vm0, %v1919_v45  ;;  %v2107_v42 = vor.u32 %v2363_v36, %v2106_v34  ;;  %v2320_v36 = vld [vmem:[%s2468_s26 + $0x104] sm:$0xf] }
  0xe2   : > { %2275 = vmatmul.msk.bf16.gmra.mxu3 %vm793_vm0, %v2127_v37 }
  0xe3   : > { %v1503_v49 = vmax.f32 %v1340_v43, 0.0  ;;  %v1222_v50 = vadd.f32 %v2642_v55, %v968_v44  ;;  %v1907_v55 = vor.u32 %v2313_v54, %v1906_v51  ;;  %v2700_v5 = vpop.f32.mrf.mxu3 }
  0xe5   : > { %v1601_v60 = vpack.c.bf16 %v1503_v49, %v1503_v49  ;;  %v1456_v62 = vmax.f32 %v1222_v50, 0.0 }
  0xe6   : > { %v1087_v25 = vpop.f32.mrf.mxu2  ;;  %v2706_v10 = vpop.f32.mrf.mxu1 }
  0xe7   : > { %1700 = vst.msk [vmem:[%s2590_s16 + $0xd8] sm:$0xf] %vm1645_vm1, %v1601_v60  ;;  %v1554_v63 = vpack.c.bf16 %v1456_v62, %v1456_v62  ;;  %v1088_v0 = vadd.f32 %v2580_v57, %v1087_v25 }
  0xe8   : > { %v970_v4 = vpop.f32.mrf.mxu0 }
  0xe9   : > { %1653 = vst.msk [vmem:[%s2590_s16 + $0x1c] sm:$0xf] %vm1645_vm1, %v1554_v63  ;;  %v1342_v6 = vadd.f32 %v2620_v35, %v1088_v0  ;;  %v971_v9 = vadd.f32 %v2580_v57, %v970_v4 }
  0xeb   : > { %v1504_v11 = vmax.f32 %v1342_v6, 0.0  ;;  %v1225_v12 = vadd.f32 %v2653_v8, %v971_v9  ;;  %1009 = vmatmul.bf16.gmra.mxu0 %v1907_v55  ;;  %1129 = vmatmul.bf16.gmra.mxu2 %v2099_v1  ;;  %v2714_v8 = vpop.f32.mrf.mxu3  ;;  %v2368_v1 = vld [vmem:[%s2468_s26 + $0x284] sm:$0xf]  ;;  %v1922_v9 = vld [vmem:[%s2468_s26 + $0xe0] sm:$0xf] }
  0xed   : > { %v1602_v13 = vpack.c.bf16 %v1504_v11, %v1504_v11  ;;  %v1457_v14 = vmax.f32 %v1225_v12, 0.0  ;;  %v2132_v11 = vld [vmem:[%s2468_s26 + $0x288] sm:$0xf0]  ;;  %v2317_v12 = vld [vmem:[%s2468_s26 + $0xe4] sm:$0xf0] }
  0xee   : > { %v1090_v15 = vpop.f32.mrf.mxu2  ;;  %v2720_v23 = vpop.f32.mrf.mxu1 }
  0xef   : > { %1701 = vst.msk [vmem:[%s2590_s16 + $0xdc] sm:$0xf] %vm1645_vm1, %v1602_v13  ;;  %v1555_v35 = vpack.c.bf16 %v1457_v14, %v1457_v14  ;;  %v1091_v18 = vadd.f32 %v2580_v57, %v1090_v15  ;;  %v2114_v13 = vld [vmem:[%s2468_s26 + $0x260] sm:$0xf]  ;;  %v2365_v14 = vld [vmem:[%s2468_s26 + $0x264] sm:$0xf0]  ;;  %v2135_v15 = vor.u32 %v2368_v1, %v2132_v11 }
  0xf0   : > { %v972_v19 = vpop.f32.mrf.mxu0 }
  0xf1   : > { %1654 = vst.msk [vmem:[%s2590_s16 + $0x20] sm:$0xf] %vm1645_vm1, %v1555_v35  ;;  %v1345_v61 = vadd.f32 %v2637_v53, %v1091_v18  ;;  %v973_v21 = vadd.f32 %v2580_v57, %v972_v19  ;;  %2250 = vmatmul.msk.bf16.gmra.mxu1 %vm793_vm0, %v1927_v22  ;;  %v2115_v19 = vor.u32 %v2365_v14, %v2114_v13  ;;  %v2322_v14 = vld [vmem:[%s2468_s26 + $0x114] sm:$0xf] }
  0xf2   : > { %2276 = vmatmul.msk.bf16.gmra.mxu3 %vm793_vm0, %v2135_v15 }
  0xf3   : > { %v1505_v26 = vmax.f32 %v1345_v61, 0.0  ;;  %v1227_v28 = vadd.f32 %v2672_v31, %v973_v21  ;;  %v1915_v31 = vor.u32 %v2315_v33, %v1914_v29  ;;  %v2738_v47 = vpop.f32.mrf.mxu3 }
  0xf5   : > { %v1603_v39 = vpack.c.bf16 %v1505_v26, %v1505_v26  ;;  %v1458_v40 = vmax.f32 %v1227_v28, 0.0 }
  0xf6   : > { %v1092_v53 = vpop.f32.mrf.mxu2  ;;  %v2740_v49 = vpop.f32.mrf.mxu1 }
  0xf7   : > { %1702 = vst.msk [vmem:[%s2590_s16 + $0xe0] sm:$0xf] %vm1645_vm1, %v1603_v39  ;;  %v1556_v7 = vpack.c.bf16 %v1458_v40, %v1458_v40  ;;  %v1093_v41 = vadd.f32 %v2580_v57, %v1092_v53 }
  0xf8   : > { %v975_v43 = vpop.f32.mrf.mxu0 }
  0xf9   : > { %1655 = vst.msk [vmem:[%s2590_s16 + $0x24] sm:$0xf] %vm1645_vm1, %v1556_v7  ;;  %v1347_v44 = vadd.f32 %v2647_v3, %v1093_v41  ;;  %v976_v45 = vadd.f32 %v2580_v57, %v975_v43  ;;  %v1932_v3 = vld [vmem:[%s2468_s26 + $0xf8] sm:$0xf0] }
  0xfa   : > { %v1935_v63 = vor.u32 %v2318_v58, %v1932_v3 }
  0xfb   : > { %v1506_v50 = vmax.f32 %v1347_v44, 0.0  ;;  %v1230_v51 = vadd.f32 %v2686_v46, %v976_v45  ;;  %1014 = vmatmul.bf16.gmra.mxu0 %v1915_v31  ;;  %1134 = vmatmul.bf16.gmra.mxu2 %v2107_v42  ;;  %v2752_v0 = vpop.f32.mrf.mxu3  ;;  %v2370_v42 = vld [vmem:[%s2468_s26 + $0x294] sm:$0xf]  ;;  %v1930_v45 = vld [vmem:[%s2468_s26 + $0xf0] sm:$0xf] }
  0xfd   : > { %v1604_v52 = vpack.c.bf16 %v1506_v50, %v1506_v50  ;;  %v1459_v54 = vmax.f32 %v1230_v51, 0.0  ;;  %v2140_v50 = vld [vmem:[%s2468_s26 + $0x298] sm:$0xf0]  ;;  %v2319_v51 = vld [vmem:[%s2468_s26 + $0xf4] sm:$0xf0] }
  0xfe   : > { %v1095_v56 = vpop.f32.mrf.mxu2  ;;  %v2754_v55 = vpop.f32.mrf.mxu1 }
  0xff   : > { %1703 = vst.msk [vmem:[%s2590_s16 + $0xe4] sm:$0xf] %vm1645_vm1, %v1604_v52  ;;  %v1557_v59 = vpack.c.bf16 %v1459_v54, %v1459_v54  ;;  %v1096_v60 = vadd.f32 %v2580_v57, %v1095_v56  ;;  %v2122_v52 = vld [vmem:[%s2468_s26 + $0x270] sm:$0xf]  ;;  %v2367_v54 = vld [vmem:[%s2468_s26 + $0x274] sm:$0xf0]  ;;  %v2143_v56 = vor.u32 %v2370_v42, %v2140_v50 }
 0x100   : > { %v977_v62 = vpop.f32.mrf.mxu0 }
 0x101   : > { %1656 = vst.msk [vmem:[%s2590_s16 + $0x28] sm:$0xf] %vm1645_vm1, %v1557_v59  ;;  %v1350_v46 = vadd.f32 %v2666_v27, %v1096_v60  ;;  %v978_v25 = vadd.f32 %v2580_v57, %v977_v62  ;;  %2251 = vmatmul.msk.bf16.gmra.mxu1 %vm793_vm0, %v1935_v63  ;;  %v2123_v62 = vor.u32 %v2367_v54, %v2122_v52  ;;  %v2324_v54 = vld [vmem:[%s2468_s26 + $0x124] sm:$0xf] }
 0x102   : > { %2277 = vmatmul.msk.bf16.gmra.mxu3 %vm793_vm0, %v2143_v56 }
 0x103   : > { %v1507_v4 = vmax.f32 %v1350_v46, 0.0  ;;  %v1232_v6 = vadd.f32 %v2706_v10, %v978_v25  ;;  %v1923_v10 = vor.u32 %v2317_v12, %v1922_v9  ;;  %v2772_v24 = vpop.f32.mrf.mxu3 }
 0x105   : > { %v1605_v27 = vpack.c.bf16 %v1507_v4, %v1507_v4  ;;  %v1460_v16 = vmax.f32 %v1232_v6, 0.0 }
 0x106   : > { %v1097_v17 = vpop.f32.mrf.mxu2  ;;  %v2774_v26 = vpop.f32.mrf.mxu1 }
 0x107   : > { %1704 = vst.msk [vmem:[%s2590_s16 + $0xe8] sm:$0xf] %vm1645_vm1, %v1605_v27  ;;  %v1558_v35 = vpack.c.bf16 %v1460_v16, %v1460_v16  ;;  %v1098_v18 = vadd.f32 %v2580_v57, %v1097_v17 }
 0x108   : > { %v980_v61 = vpop.f32.mrf.mxu0 }
 0x109   : > { %1657 = vst.msk [vmem:[%s2590_s16 + $0x2c] sm:$0xf] %vm1645_vm1, %v1558_v35  ;;  %v1352_v21 = vadd.f32 %v2680_v38, %v1098_v18  ;;  %v981_v22 = vadd.f32 %v2580_v57, %v980_v61  ;;  %v1940_v38 = vld [vmem:[%s2468_s26 + $0x108] sm:$0xf0] }
 0x10a   : > { %v1943_v7 = vor.u32 %v2320_v36, %v1940_v38 }
 0x10b   : > { %v1508_v28 = vmax.f32 %v1352_v21, 0.0  ;;  %v1235_v29 = vadd.f32 %v2720_v23, %v981_v22  ;;  %1019 = vmatmul.bf16.gmra.mxu0 %v1923_v10  ;;  %1139 = vmatmul.bf16.gmra.mxu2 %v2115_v19  ;;  %v2786_v41 = vpop.f32.mrf.mxu3  ;;  %v2372_v19 = vld [vmem:[%s2468_s26 + $0x2a4] sm:$0xf]  ;;  %v1938_v22 = vld [vmem:[%s2468_s26 + $0x100] sm:$0xf] }
 0x10d   : > { %v1606_v32 = vpack.c.bf16 %v1508_v28, %v1508_v28  ;;  %v1461_v33 = vmax.f32 %v1235_v29, 0.0  ;;  %v2148_v28 = vld [vmem:[%s2468_s26 + $0x2a8] sm:$0xf0]  ;;  %v2321_v29 = vld [vmem:[%s2468_s26 + $0x104] sm:$0xf0] }
 0x10e   : > { %v1100_v34 = vpop.f32.mrf.mxu2  ;;  %v2788_v31 = vpop.f32.mrf.mxu1 }
 0x10f   : > { %1705 = vst.msk [vmem:[%s2590_s16 + $0xec] sm:$0xf] %vm1645_vm1, %v1606_v32  ;;  %v1559_v37 = vpack.c.bf16 %v1461_v33, %v1461_v33  ;;  %v1101_v39 = vadd.f32 %v2580_v57, %v1100_v34  ;;  %v2130_v32 = vld [vmem:[%s2468_s26 + $0x280] sm:$0xf]  ;;  %v2369_v33 = vld [vmem:[%s2468_s26 + $0x284] sm:$0xf0]  ;;  %v2151_v34 = vor.u32 %v2372_v19, %v2148_v28 }
 0x110   : > { %v982_v40 = vpop.f32.mrf.mxu0 }
 0x111   : > { %1658 = vst.msk [vmem:[%s2590_s16 + $0x30] sm:$0xf] %vm1645_vm1, %v1559_v37  ;;  %v1355_v23 = vadd.f32 %v2700_v5, %v1101_v39  ;;  %v983_v53 = vadd.f32 %v2580_v57, %v982_v40  ;;  %2252 = vmatmul.msk.bf16.gmra.mxu1 %vm793_vm0, %v1943_v7  ;;  %v2131_v40 = vor.u32 %v2369_v33, %v2130_v32  ;;  %v2326_v33 = vld [vmem:[%s2468_s26 + $0x134] sm:$0xf] }
 0x112   : > { %2278 = vmatmul.msk.bf16.gmra.mxu3 %vm793_vm0, %v2151_v34 }
 0x113   : > { %v1509_v43 = vmax.f32 %v1355_v23, 0.0  ;;  %v1237_v44 = vadd.f32 %v2740_v49, %v983_v53  ;;  %v1931_v49 = vor.u32 %v2319_v51, %v1930_v45  ;;  %v2806_v1 = vpop.f32.mrf.mxu3 }
 0x115   : > { %v1607_v5 = vpack.c.bf16 %v1509_v43, %v1509_v43  ;;  %v1462_v58 = vmax.f32 %v1237_v44, 0.0 }
 0x116   : > { %v1102_v3 = vpop.f32.mrf.mxu2  ;;  %v2808_v4 = vpop.f32.mrf.mxu1 }
 0x117   : > { %1706 = vst.msk [vmem:[%s2590_s16 + $0xf0] sm:$0xf] %vm1645_vm1, %v1607_v5  ;;  %v1560_v59 = vpack.c.bf16 %v1462_v58, %v1462_v58  ;;  %v1103_v60 = vadd.f32 %v2580_v57, %v1102_v3 }
 0x118   : > { %v985_v46 = vpop.f32.mrf.mxu0 }
 0x119   : > { %1659 = vst.msk [vmem:[%s2590_s16 + $0x34] sm:$0xf] %vm1645_vm1, %v1560_v59  ;;  %v1357_v25 = vadd.f32 %v2714_v8, %v1103_v60  ;;  %v986_v63 = vadd.f32 %v2580_v57, %v985_v46  ;;  %v1948_v8 = vld [vmem:[%s2468_s26 + $0x118] sm:$0xf0] }
 0x11a   : > { %v1951_v35 = vor.u32 %v2322_v14, %v1948_v8 }
 0x11b   : > { %v1510_v6 = vmax.f32 %v1357_v25, 0.0  ;;  %v1240_v9 = vadd.f32 %v2754_v55, %v986_v63  ;;  %1024 = vmatmul.bf16.gmra.mxu0 %v1931_v49  ;;  %1144 = vmatmul.bf16.gmra.mxu2 %v2123_v62  ;;  %v2820_v18 = vpop.f32.mrf.mxu3  ;;  %v2374_v62 = vld [vmem:[%s2468_s26 + $0x2b4] sm:$0xf]  ;;  %v1946_v63 = vld [vmem:[%s2468_s26 + $0x110] sm:$0xf] }
 0x11d   : > { %v1608_v11 = vpack.c.bf16 %v1510_v6, %v1510_v6  ;;  %v1463_v12 = vmax.f32 %v1240_v9, 0.0  ;;  %v2156_v6 = vld [vmem:[%s2468_s26 + $0x2b8] sm:$0xf0]  ;;  %v2323_v9 = vld [vmem:[%s2468_s26 + $0x114] sm:$0xf0] }
 0x11e   : > { %v1105_v13 = vpop.f32.mrf.mxu2  ;;  %v2822_v10 = vpop.f32.mrf.mxu1 }
 0x11f   : > { %1707 = vst.msk [vmem:[%s2590_s16 + $0xf4] sm:$0xf] %vm1645_vm1, %v1608_v11  ;;  %v1561_v15 = vpack.c.bf16 %v1463_v12, %v1463_v12  ;;  %v1106_v27 = vadd.f32 %v2580_v57, %v1105_v13  ;;  %v2138_v11 = vld [vmem:[%s2468_s26 + $0x290] sm:$0xf]  ;;  %v2371_v12 = vld [vmem:[%s2468_s26 + $0x294] sm:$0xf0]  ;;  %v2159_v13 = vor.u32 %v2374_v62, %v2156_v6 }
 0x120   : > { %v987_v16 = vpop.f32.mrf.mxu0 }
 0x121   : > { %1660 = vst.msk [vmem:[%s2590_s16 + $0x38] sm:$0xf] %vm1645_vm1, %v1561_v15  ;;  %v1360_v55 = vadd.f32 %v2738_v47, %v1106_v27  ;;  %v988_v17 = vadd.f32 %v2580_v57, %v987_v16  ;;  %2253 = vmatmul.msk.bf16.gmra.mxu1 %vm793_vm0, %v1951_v35  ;;  %v2139_v16 = vor.u32 %v2371_v12, %v2138_v11  ;;  %v2328_v12 = vld [vmem:[%s2468_s26 + $0x144] sm:$0xf] }
 0x122   : > { %2279 = vmatmul.msk.bf16.gmra.mxu3 %vm793_vm0, %v2159_v13 }
 0x123   : > { %v1511_v61 = vmax.f32 %v1360_v55, 0.0  ;;  %v1242_v21 = vadd.f32 %v2774_v26, %v988_v17  ;;  %v1939_v26 = vor.u32 %v2321_v29, %v1938_v22  ;;  %v2840_v42 = vpop.f32.mrf.mxu3 }
 0x125   : > { %v1609_v47 = vpack.c.bf16 %v1511_v61, %v1511_v61  ;;  %v1464_v36 = vmax.f32 %v1242_v21, 0.0 }
 0x126   : > { %v1107_v38 = vpop.f32.mrf.mxu2  ;;  %v2842_v43 = vpop.f32.mrf.mxu1 }
 0x127   : > { %1708 = vst.msk [vmem:[%s2590_s16 + $0xf8] sm:$0xf] %vm1645_vm1, %v1609_v47  ;;  %v1562_v37 = vpack.c.bf16 %v1464_v36, %v1464_v36  ;;  %v1108_v39 = vadd.f32 %v2580_v57, %v1107_v38 }
 0x128   : > { %v990_v23 = vpop.f32.mrf.mxu0 }
 0x129   : > { %1661 = vst.msk [vmem:[%s2590_s16 + $0x3c] sm:$0xf] %vm1645_vm1, %v1562_v37  ;;  %v1362_v53 = vadd.f32 %v2752_v0, %v1108_v39  ;;  %v991_v7 = vadd.f32 %v2580_v57, %v990_v23  ;;  %v1956_v0 = vld [vmem:[%s2468_s26 + $0x128] sm:$0xf0] }
 0x12a   : > { %v1959_v59 = vor.u32 %v2324_v54, %v1956_v0 }
 0x12b   : > { %v1512_v44 = vmax.f32 %v1362_v53, 0.0  ;;  %v1245_v45 = vadd.f32 %v2788_v31, %v991_v7  ;;  %1029 = vmatmul.bf16.gmra.mxu0 %v1939_v26  ;;  %1149 = vmatmul.bf16.gmra.mxu2 %v2131_v40  ;;  %v2854_v60 = vpop.f32.mrf.mxu3  ;;  %v2376_v40 = vld [vmem:[%s2468_s26 + $0x2c4] sm:$0xf]  ;;  %v1954_v7 = vld [vmem:[%s2468_s26 + $0x120] sm:$0xf] }
 0x12d   : > { %v1610_v50 = vpack.c.bf16 %v1512_v44, %v1512_v44  ;;  %v1465_v51 = vmax.f32 %v1245_v45, 0.0  ;;  %v2164_v44 = vld [vmem:[%s2468_s26 + $0x2c8] sm:$0xf0]  ;;  %v2325_v45 = vld [vmem:[%s2468_s26 + $0x124] sm:$0xf0] }
 0x12e   : > { %v1110_v52 = vpop.f32.mrf.mxu2  ;;  %v2856_v49 = vpop.f32.mrf.mxu1 }
 0x12f   : > { %1709 = vst.msk [vmem:[%s2590_s16 + $0xfc] sm:$0xf] %vm1645_vm1, %v1610_v50  ;;  %v1563_v56 = vpack.c.bf16 %v1465_v51, %v1465_v51  ;;  %v1111_v5 = vadd.f32 %v2580_v57, %v1110_v52  ;;  %v2146_v50 = vld [vmem:[%s2468_s26 + $0x2a0] sm:$0xf]  ;;  %v2373_v51 = vld [vmem:[%s2468_s26 + $0x2a4] sm:$0xf0]  ;;  %v2167_v52 = vor.u32 %v2376_v40, %v2164_v44 }
 0x130   : > { %v992_v58 = vpop.f32.mrf.mxu0 }
 0x131   : > { %1662 = vst.msk [vmem:[%s2590_s16 + $0x40] sm:$0xf] %vm1645_vm1, %v1563_v56  ;;  %v1365_v31 = vadd.f32 %v2772_v24, %v1111_v5  ;;  %v993_v3 = vadd.f32 %v2580_v57, %v992_v58  ;;  %2254 = vmatmul.msk.bf16.gmra.mxu1 %vm793_vm0, %v1959_v59  ;;  %v2147_v58 = vor.u32 %v2373_v51, %v2146_v50  ;;  %v2330_v51 = vld [vmem:[%s2468_s26 + $0x154] sm:$0xf] }
 0x132   : > { %2280 = vmatmul.msk.bf16.gmra.mxu3 %vm793_vm0, %v2167_v52 }
 0x133   : > { %v1513_v46 = vmax.f32 %v1365_v31, 0.0  ;;  %v1247_v25 = vadd.f32 %v2808_v4, %v993_v3  ;;  %v1947_v4 = vor.u32 %v2323_v9, %v1946_v63  ;;  %v2874_v19 = vpop.f32.mrf.mxu3 }
 0x135   : > { %v1611_v24 = vpack.c.bf16 %v1513_v46, %v1513_v46  ;;  %v1466_v14 = vmax.f32 %v1247_v25, 0.0 }
 0x136   : > { %v1112_v8 = vpop.f32.mrf.mxu2  ;;  %v2876_v61 = vpop.f32.mrf.mxu1 }
 0x137   : > { %1710 = vst.msk [vmem:[%s2590_s16 + $0x100] sm:$0xf] %vm1645_vm1, %v1611_v24  ;;  %v1564_v15 = vpack.c.bf16 %v1466_v14, %v1466_v14  ;;  %v1113_v27 = vadd.f32 %v2580_v57, %v1112_v8 }
 0x138   : > { %v995_v55 = vpop.f32.mrf.mxu0 }
 0x139   : > { %1663 = vst.msk [vmem:[%s2590_s16 + $0x44] sm:$0xf] %vm1645_vm1, %v1564_v15  ;;  %v1367_v17 = vadd.f32 %v2786_v41, %v1113_v27  ;;  %v996_v35 = vadd.f32 %v2580_v57, %v995_v55  ;;  %v1964_v41 = vld [vmem:[%s2468_s26 + $0x138] sm:$0xf0] }
 0x13a   : > { %v1967_v37 = vor.u32 %v2326_v33, %v1964_v41 }
 0x13b   : > { %v1514_v21 = vmax.f32 %v1367_v17, 0.0  ;;  %v1250_v22 = vadd.f32 %v2822_v10, %v996_v35  ;;  %1034 = vmatmul.bf16.gmra.mxu0 %v1947_v4  ;;  %1154 = vmatmul.bf16.gmra.mxu2 %v2139_v16  ;;  %v2888_v39 = vpop.f32.mrf.mxu3  ;;  %v2378_v16 = vld [vmem:[%s2468_s26 + $0x2d4] sm:$0xf]  ;;  %v1962_v35 = vld [vmem:[%s2468_s26 + $0x130] sm:$0xf] }
 0x13d   : > { %v1612_v28 = vpack.c.bf16 %v1514_v21, %v1514_v21  ;;  %v1467_v29 = vmax.f32 %v1250_v22, 0.0  ;;  %v2172_v21 = vld [vmem:[%s2468_s26 + $0x2d8] sm:$0xf0]  ;;  %v2327_v22 = vld [vmem:[%s2468_s26 + $0x134] sm:$0xf0] }
 0x13e   : > { %v1115_v32 = vpop.f32.mrf.mxu2  ;;  %v2890_v26 = vpop.f32.mrf.mxu1 }
 0x13f   : > { %1711 = vst.msk [vmem:[%s2590_s16 + $0x104] sm:$0xf] %vm1645_vm1, %v1612_v28  ;;  %v1565_v34 = vpack.c.bf16 %v1467_v29, %v1467_v29  ;;  %v1116_v47 = vadd.f32 %v2580_v57, %v1115_v32  ;;  %v2154_v28 = vld [vmem:[%s2468_s26 + $0x2b0] sm:$0xf]  ;;  %v2375_v29 = vld [vmem:[%s2468_s26 + $0x2b4] sm:$0xf0]  ;;  %v2175_v32 = vor.u32 %v2378_v16, %v2172_v21 }
 0x140   : > { %v997_v36 = vpop.f32.mrf.mxu0 }
 0x141   : > { %1664 = vst.msk [vmem:[%s2590_s16 + $0x48] sm:$0xf] %vm1645_vm1, %v1565_v34  ;;  %v1370_v10 = vadd.f32 %v2806_v1, %v1116_v47  ;;  %v998_v38 = vadd.f32 %v2580_v57, %v997_v36  ;;  %2255 = vmatmul.msk.bf16.gmra.mxu1 %vm793_vm0, %v1967_v37  ;;  %v2155_v36 = vor.u32 %v2375_v29, %v2154_v28  ;;  %v2332_v28 = vld [vmem:[%s2468_s26 + $0x164] sm:$0xf]  ;;  %v1988_v29 = vld [vmem:[%s2468_s26 + $0x168] sm:$0xf0] }
 0x142   : > { %2281 = vmatmul.msk.bf16.gmra.mxu3 %vm793_vm0, %v2175_v32 }
 0x143   : > { %v1515_v23 = vmax.f32 %v1370_v10, 0.0  ;;  %v1252_v53 = vadd.f32 %v2842_v43, %v998_v38  ;;  %v1955_v43 = vor.u32 %v2325_v45, %v1954_v7  ;;  %v2908_v62 = vpop.f32.mrf.mxu3 }
 0x145   : > { %v1613_v1 = vpack.c.bf16 %v1515_v23, %v1515_v23  ;;  %v1468_v54 = vmax.f32 %v1252_v53, 0.0 }
 0x146   : > { %v1117_v0 = vpop.f32.mrf.mxu2  ;;  %v2910_v46 = vpop.f32.mrf.mxu1 }
 0x147   : > { %1712 = vst.msk [vmem:[%s2590_s16 + $0x108] sm:$0xf] %vm1645_vm1, %v1613_v1  ;;  %v1566_v56 = vpack.c.bf16 %v1468_v54, %v1468_v54  ;;  %v1118_v5 = vadd.f32 %v2580_v57, %v1117_v0 }
 0x148   : > { %v1000_v31 = vpop.f32.mrf.mxu0 }
 0x149   : > { %1665 = vst.msk [vmem:[%s2590_s16 + $0x4c] sm:$0xf] %vm1645_vm1, %v1566_v56  ;;  %v1372_v3 = vadd.f32 %v2820_v18, %v1118_v5  ;;  %v1001_v59 = vadd.f32 %v2580_v57, %v1000_v31  ;;  %v1972_v18 = vld [vmem:[%s2468_s26 + $0x148] sm:$0xf0] }
 0x14a   : > { %v1975_v15 = vor.u32 %v2328_v12, %v1972_v18 }
 0x14b   : > { %v1516_v25 = vmax.f32 %v1372_v3, 0.0  ;;  %v1255_v63 = vadd.f32 %v2856_v49, %v1001_v59  ;;  %1039 = vmatmul.bf16.gmra.mxu0 %v1955_v43  ;;  %1159 = vmatmul.bf16.gmra.mxu2 %v2147_v58  ;;  %v2922_v27 = vpop.f32.mrf.mxu3  ;;  %v2380_v58 = vld [vmem:[%s2468_s26 + $0x2e4] sm:$0xf]  ;;  %v1970_v59 = vld [vmem:[%s2468_s26 + $0x140] sm:$0xf] }
 0x14d   : > { %v1614_v6 = vpack.c.bf16 %v1516_v25, %v1516_v25  ;;  %v1469_v9 = vmax.f32 %v1255_v63, 0.0  ;;  %v2180_v25 = vld [vmem:[%s2468_s26 + $0x2e8] sm:$0xf0]  ;;  %v2329_v63 = vld [vmem:[%s2468_s26 + $0x144] sm:$0xf0] }
 0x14e   : > { %v1120_v11 = vpop.f32.mrf.mxu2  ;;  %v2924_v4 = vpop.f32.mrf.mxu1 }
 0x14f   : > { %1713 = vst.msk [vmem:[%s2590_s16 + $0x10c] sm:$0xf] %vm1645_vm1, %v1614_v6  ;;  %v1567_v13 = vpack.c.bf16 %v1469_v9, %v1469_v9  ;;  %v1121_v24 = vadd.f32 %v2580_v57, %v1120_v11  ;;  %v2162_v6 = vld [vmem:[%s2468_s26 + $0x2c0] sm:$0xf]  ;;  %v2377_v9 = vld [vmem:[%s2468_s26 + $0x2c4] sm:$0xf0]  ;;  %v2183_v11 = vor.u32 %v2380_v58, %v2180_v25 }
 0x150   : > { %v1002_v14 = vpop.f32.mrf.mxu0 }
 0x151   : > { %1666 = vst.msk [vmem:[%s2590_s16 + $0x50] sm:$0xf] %vm1645_vm1, %v1567_v13  ;;  %v1375_v49 = vadd.f32 %v2840_v42, %v1121_v24  ;;  %v1003_v8 = vadd.f32 %v2580_v57, %v1002_v14  ;;  %2256 = vmatmul.msk.bf16.gmra.mxu1 %vm793_vm0, %v1975_v15  ;;  %v2163_v14 = vor.u32 %v2377_v9, %v2162_v6  ;;  %v2978_v15 = vld [vmem:[%s3222_s2] ss:$0 sm:$0xff]  ;;  %v2334_v9 = vld [vmem:[%s2468_s26 + $0x174] sm:$0xf] }
 0x152   : > { %2282 = vmatmul.msk.bf16.gmra.mxu3 %vm793_vm0, %v2183_v11 }
 0x153   : > { %v1517_v55 = vmax.f32 %v1375_v49, 0.0  ;;  %v1257_v17 = vadd.f32 %v2876_v61, %v1003_v8  ;;  %v1963_v61 = vor.u32 %v2327_v22, %v1962_v35  ;;  %v2942_v40 = vpop.f32.mrf.mxu3 }
 0x155   : > { %v1615_v42 = vpack.c.bf16 %v1517_v55, %v1517_v55  ;;  %v1470_v33 = vmax.f32 %v1257_v17, 0.0 }
 0x156   : > { %v1122_v41 = vpop.f32.mrf.mxu2  ;;  %v2944_v23 = vpop.f32.mrf.mxu1 }
 0x157   : > { %1714 = vst.msk [vmem:[%s2590_s16 + $0x110] sm:$0xf] %vm1645_vm1, %v1615_v42  ;;  %v1568_v34 = vpack.c.bf16 %v1470_v33, %v1470_v33  ;;  %v1123_v47 = vadd.f32 %v2580_v57, %v1122_v41 }
 0x158   : > { %v1005_v10 = vpop.f32.mrf.mxu0 }
 0x159   : > { %1667 = vst.msk [vmem:[%s2590_s16 + $0x54] sm:$0xf] %vm1645_vm1, %v1568_v34  ;;  %v1377_v38 = vadd.f32 %v2854_v60, %v1123_v47  ;;  %v1006_v37 = vadd.f32 %v2580_v57, %v1005_v10  ;;  %v1980_v60 = vld [vmem:[%s2468_s26 + $0x158] sm:$0xf0]  ;;  %v1991_v34 = vor.u32 %v2332_v28, %v1988_v29 }
 0x15a   : > { %v1983_v56 = vor.u32 %v2330_v51, %v1980_v60 }
 0x15b   : > { %v1518_v53 = vmax.f32 %v1377_v38, 0.0  ;;  %v1260_v7 = vadd.f32 %v2890_v26, %v1006_v37  ;;  %1044 = vmatmul.bf16.gmra.mxu0 %v1963_v61  ;;  %1164 = vmatmul.bf16.gmra.mxu2 %v2155_v36  ;;  %v2956_v5 = vpop.f32.mrf.mxu3  ;;  %v2382_v36 = vld [vmem:[%s2468_s26 + $0x2f4] sm:$0xf]  ;;  %v1978_v37 = vld [vmem:[%s2468_s26 + $0x150] sm:$0xf] }
 0x15d   : > { %v1616_v44 = vpack.c.bf16 %v1518_v53, %v1518_v53  ;;  %v1471_v45 = vmax.f32 %v1260_v7, 0.0  ;;  %v2188_v53 = vld [vmem:[%s2468_s26 + $0x2f8] sm:$0xf0]  ;;  %v2331_v7 = vld [vmem:[%s2468_s26 + $0x154] sm:$0xf0] }
 0x15e   : > { %v1125_v50 = vpop.f32.mrf.mxu2  ;;  %v2958_v43 = vpop.f32.mrf.mxu1 }
 0x15f   : > { %1715 = vst.msk [vmem:[%s2590_s16 + $0x114] sm:$0xf] %vm1645_vm1, %v1616_v44  ;;  %v1569_v52 = vpack.c.bf16 %v1471_v45, %v1471_v45  ;;  %v1126_v1 = vadd.f32 %v2580_v57, %v1125_v50  ;;  %v2170_v44 = vld [vmem:[%s2468_s26 + $0x2d0] sm:$0xf]  ;;  %v2379_v45 = vld [vmem:[%s2468_s26 + $0x2d4] sm:$0xf0]  ;;  %v2191_v50 = vor.u32 %v2382_v36, %v2188_v53 }
 0x160   : > { %v1007_v54 = vpop.f32.mrf.mxu0 }
 0x161   : > { %1668 = vst.msk [vmem:[%s2590_s16 + $0x58] sm:$0xf] %vm1645_vm1, %v1569_v52  ;;  %v1380_v26 = vadd.f32 %v2874_v19, %v1126_v1  ;;  %v1008_v0 = vadd.f32 %v2580_v57, %v1007_v54  ;;  %2257 = vmatmul.msk.bf16.gmra.mxu1 %vm793_vm0, %v1983_v56  ;;  %v2171_v54 = vor.u32 %v2379_v45, %v2170_v44  ;;  %v2336_v44 = vld [vmem:[%s2468_s26 + $0x184] sm:$0xf]  ;;  %v2004_v45 = vld [vmem:[%s2468_s26 + $0x188] sm:$0xf0] }
 0x162   : > { %2283 = vmatmul.msk.bf16.gmra.mxu3 %vm793_vm0, %v2191_v50 }
 0x163   : > { %v1519_v31 = vmax.f32 %v1380_v26, 0.0  ;;  %v1262_v3 = vadd.f32 %v2910_v46, %v1008_v0  ;;  %v1971_v46 = vor.u32 %v2329_v63, %v1970_v59  ;;  %v2981_v55 = vpop.f32.mrf.mxu3 }
 0x165   : > { %v1617_v19 = vpack.c.bf16 %v1519_v31, %v1519_v31  ;;  %v1472_v12 = vmax.f32 %v1262_v3, 0.0 }
 0x166   : > { %v1127_v18 = vpop.f32.mrf.mxu2 }
 0x167   : > { %1716 = vst.msk [vmem:[%s2590_s16 + $0x118] sm:$0xf] %vm1645_vm1, %v1617_v19  ;;  %v1570_v13 = vpack.c.bf16 %v1472_v12, %v1472_v12  ;;  %v1128_v24 = vadd.f32 %v2580_v57, %v1127_v18  ;;  %v2983_v57 = vpop.f32.mrf.mxu1 }
 0x168   : > { %v1010_v49 = vpop.f32.mrf.mxu0 }
 0x169   : > { %1669 = vst.msk [vmem:[%s2590_s16 + $0x5c] sm:$0xf] %vm1645_vm1, %v1570_v13  ;;  %v1382_v8 = vadd.f32 %v2888_v39, %v1128_v24  ;;  %v1011_v16 = vadd.f32 %v2978_v15, %v1010_v49 }
 0x16b   : > { %v1520_v17 = vmax.f32 %v1382_v8, 0.0  ;;  %v1265_v35 = vadd.f32 %v2924_v4, %v1011_v16  ;;  %1049 = vmatmul.bf16.gmra.mxu0 %v1971_v46  ;;  %1169 = vmatmul.bf16.gmra.mxu2 %v2163_v14  ;;  %v2995_v47 = vpop.f32.mrf.mxu3  ;;  %v2384_v46 = vld [vmem:[%s2468_s26 + $0x304] sm:$0xf]  ;;  %v1986_v8 = vld [vmem:[%s2468_s26 + $0x160] sm:$0xf] }
 0x16c   : > { %v2196_v16 = vld [vmem:[%s2468_s26 + $0x308] sm:$0xf0] }
 0x16d   : > { %v1618_v21 = vpack.c.bf16 %v1520_v17, %v1520_v17  ;;  %v1473_v39 = vmax.f32 %v1265_v35, 0.0  ;;  %v2333_v17 = vld [vmem:[%s2468_s26 + $0x164] sm:$0xf0]  ;;  %v2178_v35 = vld [vmem:[%s2468_s26 + $0x2e0] sm:$0xf] }
 0x16e   : > { %v1130_v22 = vpop.f32.mrf.mxu2 }
 0x16f   : > { %1717 = vst.msk [vmem:[%s2590_s16 + $0x11c] sm:$0xf] %vm1645_vm1, %v1618_v21  ;;  %v1571_v32 = vpack.c.bf16 %v1473_v39, %v1473_v39  ;;  %v1131_v42 = vadd.f32 %v2978_v15, %v1130_v22  ;;  %v2997_v61 = vpop.f32.mrf.mxu1  ;;  %v2381_v21 = vld [vmem:[%s2468_s26 + $0x2e4] sm:$0xf0]  ;;  %v2199_v22 = vor.u32 %v2384_v46, %v2196_v16  ;;  %v2012_v16 = vld [vmem:[%s2468_s26 + $0x198] sm:$0xf0] }
 0x170   : > { %v1012_v33 = vpop.f32.mrf.mxu0 }
 0x171   : > { %1670 = vst.msk [vmem:[%s2590_s16 + $0x60] sm:$0xf] %vm1645_vm1, %v1571_v32  ;;  %v1385_v4 = vadd.f32 %v2908_v62, %v1131_v42  ;;  %v1013_v41 = vadd.f32 %v2978_v15, %v1012_v33  ;;  %2258 = vmatmul.msk.bf16.gmra.mxu1 %vm793_vm0, %v1991_v34  ;;  %v1987_v42 = vor.u32 %v2333_v17, %v1986_v8  ;;  %v2338_v8 = vld [vmem:[%s2468_s26 + $0x194] sm:$0xf] }
 0x172   : > { %2284 = vmatmul.msk.bf16.gmra.mxu3 %vm793_vm0, %v2199_v22  ;;  %v2179_v33 = vor.u32 %v2381_v21, %v2178_v35  ;;  %v2015_v22 = vor.u32 %v2338_v8, %v2012_v16 }
 0x173   : > { %v1521_v10 = vmax.f32 %v1385_v4, 0.0  ;;  %v1267_v38 = vadd.f32 %v2944_v23, %v1013_v41  ;;  %v1979_v23 = vor.u32 %v2331_v7, %v1978_v37  ;;  %v3017_v31 = vpop.f32.mrf.mxu3 }
 0x175   : > { %v1619_v62 = vpack.c.bf16 %v1521_v10, %v1521_v10  ;;  %v1474_v51 = vmax.f32 %v1267_v38, 0.0 }
 0x176   : > { %v1132_v60 = vpop.f32.mrf.mxu2 }
 0x177   : > { %1718 = vst.msk [vmem:[%s2590_s16 + $0x120] sm:$0xf] %vm1645_vm1, %v1619_v62  ;;  %v1572_v52 = vpack.c.bf16 %v1474_v51, %v1474_v51  ;;  %v1133_v1 = vadd.f32 %v2978_v15, %v1132_v60  ;;  %v3015_v58 = vpop.f32.mrf.mxu1 }
 0x178   : > { %v1015_v26 = vpop.f32.mrf.mxu0 }
 0x179   : > { %1671 = vst.msk [vmem:[%s2590_s16 + $0x64] sm:$0xf] %vm1645_vm1, %v1572_v52  ;;  %v1387_v0 = vadd.f32 %v2922_v27, %v1133_v1  ;;  %v1016_v56 = vadd.f32 %v2978_v15, %v1015_v26  ;;  %v1996_v27 = vld [vmem:[%s2468_s26 + $0x178] sm:$0xf0]  ;;  %v2007_v52 = vor.u32 %v2336_v44, %v2004_v45  ;;  %v1994_v26 = vld [vmem:[%s2468_s26 + $0x170] sm:$0xf] }
 0x17a   : > { %v1999_v13 = vor.u32 %v2334_v9, %v1996_v27 }
 0x17b   : > { %v1522_v3 = vmax.f32 %v1387_v0, 0.0  ;;  %v1270_v59 = vadd.f32 %v2958_v43, %v1016_v56  ;;  %1054 = vmatmul.bf16.gmra.mxu0 %v1979_v23  ;;  %1174 = vmatmul.bf16.gmra.mxu2 %v2171_v54  ;;  %v3038_v39 = vpop.f32.mrf.mxu3  ;;  %v2335_v0 = vld [vmem:[%s2468_s26 + $0x174] sm:$0xf0]  ;;  %v2186_v56 = vld [vmem:[%s2468_s26 + $0x2f0] sm:$0xf] }
 0x17c   : > { %v1995_v9 = vor.u32 %v2335_v0, %v1994_v26 }
 0x17d   : > { %v1620_v25 = vpack.c.bf16 %v1522_v3, %v1522_v3  ;;  %v1475_v63 = vmax.f32 %v1270_v59, 0.0  ;;  %v2383_v3 = vld [vmem:[%s2468_s26 + $0x2f4] sm:$0xf0] }
 0x17e   : > { %v1135_v6 = vpop.f32.mrf.mxu2  ;;  %v2187_v27 = vor.u32 %v2383_v3, %v2186_v56 }
 0x17f   : > { %1719 = vst.msk [vmem:[%s2590_s16 + $0x124] sm:$0xf] %vm1645_vm1, %v1620_v25  ;;  %v1573_v11 = vpack.c.bf16 %v1475_v63, %v1475_v63  ;;  %v1136_v19 = vadd.f32 %v2978_v15, %v1135_v6  ;;  %v3029_v24 = vpop.f32.mrf.mxu1 }
 0x180   : > { %v1017_v12 = vpop.f32.mrf.mxu0 }
 0x181   : > { %1672 = vst.msk [vmem:[%s2590_s16 + $0x68] sm:$0xf] %vm1645_vm1, %v1573_v11  ;;  %v1390_v43 = vadd.f32 %v2942_v40, %v1136_v19  ;;  %v1018_v18 = vadd.f32 %v2978_v15, %v1017_v12  ;;  %2259 = vmatmul.msk.bf16.gmra.mxu1 %vm793_vm0, %v1999_v13 }
 0x183   : > { %v1523_v14 = vmax.f32 %v1390_v43, 0.0  ;;  %v1272_v49 = vadd.f32 %v2983_v57, %v1018_v18  ;;  %v3052_v50 = vpop.f32.mrf.mxu3 }
 0x185   : > { %v1621_v40 = vpack.c.bf16 %v1523_v14, %v1523_v14  ;;  %v1476_v28 = vmax.f32 %v1272_v49, 0.0 }
 0x186   : > { %v1137_v29 = vpop.f32.mrf.mxu2 }
 0x187   : > { %1720 = vst.msk [vmem:[%s2590_s16 + $0x128] sm:$0xf] %vm1645_vm1, %v1621_v40  ;;  %v1574_v32 = vpack.c.bf16 %v1476_v28, %v1476_v28  ;;  %v1138_v57 = vadd.f32 %v2978_v15, %v1137_v29  ;;  %v1281_v36 = vpop.f32.mrf.mxu1 }
 0x188   : > { %v1020_v4 = vpop.f32.mrf.mxu0 }
 0x189   : > { %1673 = vst.msk [vmem:[%s2590_s16 + $0x6c] sm:$0xf] %vm1645_vm1, %v1574_v32  ;;  %v1392_v41 = vadd.f32 %v2956_v5, %v1138_v57  ;;  %v1021_v34 = vadd.f32 %v2978_v15, %v1020_v4  ;;  %v2194_v57 = vld [vmem:[%s2468_s26 + $0x300] sm:$0xf] }
 0x18b   : > { %v1524_v10 = vmax.f32 %v1392_v41, 0.0  ;;  %v1275_v38 = vadd.f32 %v2997_v61, %v1021_v34  ;;  %1059 = vmatmul.bf16.gmra.mxu0 %v1987_v42  ;;  %1179 = vmatmul.bf16.gmra.mxu2 %v2179_v33  ;;  %v3070_v11 = vpop.f32.mrf.mxu3  ;;  %v2385_v42 = vld [vmem:[%s2468_s26 + $0x304] sm:$0xf0] }
 0x18d   : > { %v1622_v37 = vpack.c.bf16 %v1524_v10, %v1524_v10  ;;  %v1477_v53 = vmax.f32 %v1275_v38, 0.0  ;;  %v2195_v10 = vor.u32 %v2385_v42, %v2194_v57 }
 0x18e   : > { %v1140_v7 = vpop.f32.mrf.mxu2 }
 0x18f   : > { %1721 = vst.msk [vmem:[%s2590_s16 + $0x12c] sm:$0xf] %vm1645_vm1, %v1622_v37  ;;  %v1575_v5 = vpack.c.bf16 %v1477_v53, %v1477_v53  ;;  %v1141_v62 = vadd.f32 %v2978_v15, %v1140_v7  ;;  %v1284_v1 = vpop.f32.mrf.mxu1 }
 0x190   : > { %v1022_v51 = vpop.f32.mrf.mxu0 }
 0x191   : > { %1674 = vst.msk [vmem:[%s2590_s16 + $0x70] sm:$0xf] %vm1645_vm1, %v1575_v5  ;;  %v1395_v61 = vadd.f32 %v2981_v55, %v1141_v62  ;;  %v1023_v60 = vadd.f32 %v2978_v15, %v1022_v51  ;;  %2260 = vmatmul.msk.bf16.gmra.mxu1 %vm793_vm0, %v2007_v52 }
 0x193   : > { %v1525_v23 = vmax.f32 %v1395_v61, 0.0  ;;  %v1277_v54 = vadd.f32 %v3015_v58, %v1023_v60  ;;  %v1409_v28 = vpop.f32.mrf.mxu3 }
 0x195   : > { %v1623_v59 = vpack.c.bf16 %v1525_v23, %v1525_v23  ;;  %v1478_v25 = vmax.f32 %v1277_v54, 0.0 }
 0x196   : > { %v1142_v63 = vpop.f32.mrf.mxu2 }
 0x197   : > { %1722 = vst.msk [vmem:[%s2590_s16 + $0x130] sm:$0xf] %vm1645_vm1, %v1623_v59  ;;  %v1576_v55 = vpack.c.bf16 %v1478_v25, %v1478_v25  ;;  %v1143_v6 = vadd.f32 %v2978_v15, %v1142_v63  ;;  %v1286_v43 = vpop.f32.mrf.mxu1 }
 0x198   : > { %v1025_v58 = vpop.f32.mrf.mxu0 }
 0x199   : > { %1675 = vst.msk [vmem:[%s2590_s16 + $0x74] sm:$0xf] %vm1645_vm1, %v1576_v55  ;;  %v1397_v19 = vadd.f32 %v2995_v47, %v1143_v6  ;;  %v1026_v12 = vadd.f32 %v2978_v15, %v1025_v58 }
 0x19b   : > { %v1526_v18 = vmax.f32 %v1397_v19, 0.0  ;;  %v1280_v13 = vadd.f32 %v3029_v24, %v1026_v12  ;;  %1064 = vmatmul.bf16.gmra.mxu0 %v1995_v9  ;;  %1184 = vmatmul.bf16.gmra.mxu2 %v2187_v27  ;;  %v1411_v45 = vpop.f32.mrf.mxu3 }
 0x19d   : > { %v1624_v46 = vpack.c.bf16 %v1526_v18, %v1526_v18  ;;  %v1479_v14 = vmax.f32 %v1280_v13, 0.0 }
 0x19e   : > { %v1145_v49 = vpop.f32.mrf.mxu2 }
 0x19f   : > { %1723 = vst.msk [vmem:[%s2590_s16 + $0x134] sm:$0xf] %vm1645_vm1, %v1624_v46  ;;  %v1577_v17 = vpack.c.bf16 %v1479_v14, %v1479_v14  ;;  %v1146_v47 = vadd.f32 %v2978_v15, %v1145_v49  ;;  %v1289_v40 = vpop.f32.mrf.mxu1 }
 0x1a0   : > { %v1027_v35 = vpop.f32.mrf.mxu0 }
 0x1a1   : > { %1676 = vst.msk [vmem:[%s2590_s16 + $0x78] sm:$0xf] %vm1645_vm1, %v1577_v17  ;;  %v1400_v24 = vadd.f32 %v3017_v31, %v1146_v47  ;;  %v1028_v21 = vadd.f32 %v2978_v15, %v1027_v35  ;;  %2261 = vmatmul.msk.bf16.gmra.mxu1 %vm793_vm0, %v2015_v22 }
 0x1a3   : > { %v1527_v29 = vmax.f32 %v1400_v24, 0.0  ;;  %v1282_v32 = vadd.f32 %v1281_v36, %v1028_v21  ;;  %v1414_v59 = vpop.f32.mrf.mxu3 }
 0x1a5   : > { %v1625_v33 = vpack.c.bf16 %v1527_v29, %v1527_v29  ;;  %v1480_v4 = vmax.f32 %v1282_v32, 0.0 }
 0x1a6   : > { %v1147_v41 = vpop.f32.mrf.mxu2 }
 0x1a7   : > { %1724 = vst.msk [vmem:[%s2590_s16 + $0x138] sm:$0xf] %vm1645_vm1, %v1625_v33  ;;  %v1578_v34 = vpack.c.bf16 %v1480_v4, %v1480_v4  ;;  %v1148_v31 = vadd.f32 %v2978_v15, %v1147_v41  ;;  %v1291_v53 = vpop.f32.mrf.mxu1 }
 0x1a8   : > { %v1030_v38 = vpop.f32.mrf.mxu0 }
 0x1a9   : > { %1677 = vst.msk [vmem:[%s2590_s16 + $0x7c] sm:$0xf] %vm1645_vm1, %v1578_v34  ;;  %v1402_v36 = vadd.f32 %v3038_v39, %v1148_v31  ;;  %v1031_v37 = vadd.f32 %v2978_v15, %v1030_v38 }
 0x1ab   : > { %v1528_v7 = vmax.f32 %v1402_v36, 0.0  ;;  %v1285_v44 = vadd.f32 %v1284_v1, %v1031_v37  ;;  %1189 = vmatmul.bf16.gmra.mxu2 %v2195_v10  ;;  %v1416_v14 = vpop.f32.mrf.mxu3 }
 0x1ad   : > { %v1626_v5 = vpack.c.bf16 %v1528_v7, %v1528_v7  ;;  %v1481_v62 = vmax.f32 %v1285_v44, 0.0 }
 0x1ae   : > { %v1150_v51 = vpop.f32.mrf.mxu2 }
 0x1af   : > { %1725 = vst.msk [vmem:[%s2590_s16 + $0x13c] sm:$0xf] %vm1645_vm1, %v1626_v5  ;;  %v1579_v61 = vpack.c.bf16 %v1481_v62, %v1481_v62  ;;  %v1151_v60 = vadd.f32 %v2978_v15, %v1150_v51  ;;  %v1294_v1 = vpop.f32.mrf.mxu1 }
 0x1b0   : > { %v1032_v52 = vpop.f32.mrf.mxu0 }
 0x1b1   : > { %1678 = vst.msk [vmem:[%s2590_s16 + $0x80] sm:$0xf] %vm1645_vm1, %v1579_v61  ;;  %v1405_v39 = vadd.f32 %v3052_v50, %v1151_v60  ;;  %v1033_v23 = vadd.f32 %v2978_v15, %v1032_v52 }
 0x1b3   : > { %v1529_v54 = vmax.f32 %v1405_v39, 0.0  ;;  %v1287_v26 = vadd.f32 %v1286_v43, %v1033_v23  ;;  %v1419_v57 = vpop.f32.mrf.mxu3 }
 0x1b5   : > { %v1627_v0 = vpack.c.bf16 %v1529_v54, %v1529_v54  ;;  %v1482_v56 = vmax.f32 %v1287_v26, 0.0 }
 0x1b6   : > { %v1152_v3 = vpop.f32.mrf.mxu2 }
 0x1b7   : > { %1726 = vst.msk [vmem:[%s2590_s16 + $0x140] sm:$0xf] %vm1645_vm1, %v1627_v0  ;;  %v1580_v25 = vpack.c.bf16 %v1482_v56, %v1482_v56  ;;  %v1153_v63 = vadd.f32 %v2978_v15, %v1152_v3  ;;  %v1296_v9 = vpop.f32.mrf.mxu1 }
 0x1b8   : > { %v1035_v55 = vpop.f32.mrf.mxu0 }
 0x1b9   : > { %1679 = vst.msk [vmem:[%s2590_s16 + $0x84] sm:$0xf] %vm1645_vm1, %v1580_v25  ;;  %v1407_v50 = vadd.f32 %v3070_v11, %v1153_v63  ;;  %v1036_v6 = vadd.f32 %v2978_v15, %v1035_v55 }
 0x1bb   : > { %v1530_v27 = vmax.f32 %v1407_v50, 0.0  ;;  %v1290_v58 = vadd.f32 %v1289_v40, %v1036_v6 }
 0x1bd   : > { %v1628_v19 = vpack.c.bf16 %v1530_v27, %v1530_v27  ;;  %v1483_v12 = vmax.f32 %v1290_v58, 0.0 }
 0x1be   : > { %v1155_v43 = vpop.f32.mrf.mxu2 }
 0x1bf   : > { %1727 = vst.msk [vmem:[%s2590_s16 + $0x144] sm:$0xf] %vm1645_vm1, %v1628_v19  ;;  %v1581_v18 = vpack.c.bf16 %v1483_v12, %v1483_v12  ;;  %v1156_v13 = vadd.f32 %v2978_v15, %v1155_v43  ;;  %v1299_v8 = vpop.f32.mrf.mxu1 }
 0x1c0   : > { %v1037_v46 = vpop.f32.mrf.mxu0 }
 0x1c1   : > { %1680 = vst.msk [vmem:[%s2590_s16 + $0x88] sm:$0xf] %vm1645_vm1, %v1581_v18  ;;  %v1410_v11 = vadd.f32 %v1409_v28, %v1156_v13  ;;  %v1038_v49 = vadd.f32 %v2978_v15, %v1037_v46 }
 0x1c3   : > { %v1531_v16 = vmax.f32 %v1410_v11, 0.0  ;;  %v1292_v17 = vadd.f32 %v1291_v53, %v1038_v49 }
 0x1c5   : > { %v1629_v47 = vpack.c.bf16 %v1531_v16, %v1531_v16  ;;  %v1484_v35 = vmax.f32 %v1292_v17, 0.0 }
 0x1c6   : > { %v1157_v24 = vpop.f32.mrf.mxu2 }
 0x1c7   : > { %1728 = vst.msk [vmem:[%s2590_s16 + $0x148] sm:$0xf] %vm1645_vm1, %v1629_v47  ;;  %v1582_v21 = vpack.c.bf16 %v1484_v35, %v1484_v35  ;;  %v1158_v22 = vadd.f32 %v2978_v15, %v1157_v24  ;;  %v1301_v32 = vpop.f32.mrf.mxu1 }
 0x1c8   : > { %v1040_v40 = vpop.f32.mrf.mxu0 }
 0x1c9   : > { %1681 = vst.msk [vmem:[%s2590_s16 + $0x8c] sm:$0xf] %vm1645_vm1, %v1582_v21  ;;  %v1412_v29 = vadd.f32 %v1411_v45, %v1158_v22  ;;  %v1041_v28 = vadd.f32 %v2978_v15, %v1040_v40  ;;  %v1421_v45 = vpop.f32.mrf.mxu3 }
 0x1cb   : > { %v1532_v42 = vmax.f32 %v1412_v29, 0.0  ;;  %v1295_v33 = vadd.f32 %v1294_v1, %v1041_v28 }
 0x1cd   : > { %v1630_v4 = vpack.c.bf16 %v1532_v42, %v1532_v42  ;;  %v1485_v41 = vmax.f32 %v1295_v33, 0.0 }
 0x1ce   : > { %v1160_v34 = vpop.f32.mrf.mxu2 }
 0x1cf   : > { %1729 = vst.msk [vmem:[%s2590_s16 + $0x14c] sm:$0xf] %vm1645_vm1, %v1630_v4  ;;  %v1583_v31 = vpack.c.bf16 %v1485_v41, %v1485_v41  ;;  %v1161_v10 = vadd.f32 %v2978_v15, %v1160_v34  ;;  %v1304_v53 = vpop.f32.mrf.mxu1 }
 0x1d0   : > { %v1042_v38 = vpop.f32.mrf.mxu0 }
 0x1d1   : > { %1682 = vst.msk [vmem:[%s2590_s16 + $0x90] sm:$0xf] %vm1645_vm1, %v1583_v31  ;;  %v1415_v36 = vadd.f32 %v1414_v59, %v1161_v10  ;;  %v1043_v37 = vadd.f32 %v2978_v15, %v1042_v38  ;;  %v1424_v59 = vpop.f32.mrf.mxu3 }
 0x1d3   : > { %v1533_v7 = vmax.f32 %v1415_v36, 0.0  ;;  %v1297_v44 = vadd.f32 %v1296_v9, %v1043_v37 }
 0x1d5   : > { %v1631_v5 = vpack.c.bf16 %v1533_v7, %v1533_v7  ;;  %v1486_v62 = vmax.f32 %v1297_v44, 0.0 }
 0x1d6   : > { %v1162_v51 = vpop.f32.mrf.mxu2 }
 0x1d7   : > { %1730 = vst.msk [vmem:[%s2590_s16 + $0x150] sm:$0xf] %vm1645_vm1, %v1631_v5  ;;  %v1584_v61 = vpack.c.bf16 %v1486_v62, %v1486_v62  ;;  %v1163_v60 = vadd.f32 %v2978_v15, %v1162_v51  ;;  %v1306_v1 = vpop.f32.mrf.mxu1 }
 0x1d8   : > { %v1045_v52 = vpop.f32.mrf.mxu0 }
 0x1d9   : > { %1683 = vst.msk [vmem:[%s2590_s16 + $0x94] sm:$0xf] %vm1645_vm1, %v1584_v61  ;;  %v1417_v39 = vadd.f32 %v1416_v14, %v1163_v60  ;;  %v1046_v23 = vadd.f32 %v2978_v15, %v1045_v52  ;;  %v1426_v14 = vpop.f32.mrf.mxu3 }
 0x1db   : > { %v1534_v54 = vmax.f32 %v1417_v39, 0.0  ;;  %v1300_v26 = vadd.f32 %v1299_v8, %v1046_v23 }
 0x1dd   : > { %v1632_v0 = vpack.c.bf16 %v1534_v54, %v1534_v54  ;;  %v1487_v56 = vmax.f32 %v1300_v26, 0.0 }
 0x1de   : > { %v1165_v3 = vpop.f32.mrf.mxu2 }
 0x1df   : > { %1731 = vst.msk [vmem:[%s2590_s16 + $0x154] sm:$0xf] %vm1645_vm1, %v1632_v0  ;;  %v1585_v25 = vpack.c.bf16 %v1487_v56, %v1487_v56  ;;  %v1166_v63 = vadd.f32 %v2978_v15, %v1165_v3  ;;  %v1309_v9 = vpop.f32.mrf.mxu1 }
 0x1e0   : > { %v1047_v55 = vpop.f32.mrf.mxu0 }
 0x1e1   : > { %1684 = vst.msk [vmem:[%s2590_s16 + $0x98] sm:$0xf] %vm1645_vm1, %v1585_v25  ;;  %v1420_v50 = vadd.f32 %v1419_v57, %v1166_v63  ;;  %v1048_v6 = vadd.f32 %v2978_v15, %v1047_v55  ;;  %v1429_v57 = vpop.f32.mrf.mxu3 }
 0x1e3   : > { %v1535_v27 = vmax.f32 %v1420_v50, 0.0  ;;  %v1302_v58 = vadd.f32 %v1301_v32, %v1048_v6 }
 0x1e5   : > { %v1633_v19 = vpack.c.bf16 %v1535_v27, %v1535_v27  ;;  %v1488_v12 = vmax.f32 %v1302_v58, 0.0 }
 0x1e6   : > { %v1167_v43 = vpop.f32.mrf.mxu2 }
 0x1e7   : > { %1732 = vst.msk [vmem:[%s2590_s16 + $0x158] sm:$0xf] %vm1645_vm1, %v1633_v19  ;;  %v1586_v18 = vpack.c.bf16 %v1488_v12, %v1488_v12  ;;  %v1168_v13 = vadd.f32 %v2978_v15, %v1167_v43  ;;  %v1311_v8 = vpop.f32.mrf.mxu1 }
 0x1e8   : > { %v1050_v46 = vpop.f32.mrf.mxu0 }
 0x1e9   : > { %1685 = vst.msk [vmem:[%s2590_s16 + $0x9c] sm:$0xf] %vm1645_vm1, %v1586_v18  ;;  %v1422_v11 = vadd.f32 %v1421_v45, %v1168_v13  ;;  %v1051_v49 = vadd.f32 %v2978_v15, %v1050_v46  ;;  %v1431_v45 = vpop.f32.mrf.mxu3 }
 0x1eb   : > { %v1536_v16 = vmax.f32 %v1422_v11, 0.0  ;;  %v1305_v17 = vadd.f32 %v1304_v53, %v1051_v49  ;;  %v1071_v11 = vadd.f32 %v2978_v15, %v2592_v2 }
 0x1ed   : > { %v1634_v47 = vpack.c.bf16 %v1536_v16, %v1536_v16  ;;  %v1489_v35 = vmax.f32 %v1305_v17, 0.0 }
 0x1ee   : > { %v1170_v24 = vpop.f32.mrf.mxu2 }
 0x1ef   : > { %1733 = vst.msk [vmem:[%s2590_s16 + $0x15c] sm:$0xf] %vm1645_vm1, %v1634_v47  ;;  %v1587_v21 = vpack.c.bf16 %v1489_v35, %v1489_v35  ;;  %v1171_v22 = vadd.f32 %v2978_v15, %v1170_v24  ;;  %v1314_v32 = vpop.f32.mrf.mxu1 }
 0x1f0   : > { %v1052_v40 = vpop.f32.mrf.mxu0 }
 0x1f1   : > { %1686 = vst.msk [vmem:[%s2590_s16 + $0xa0] sm:$0xf] %vm1645_vm1, %v1587_v21  ;;  %v1425_v29 = vadd.f32 %v1424_v59, %v1171_v22  ;;  %v1053_v28 = vadd.f32 %v2978_v15, %v1052_v40  ;;  %v1434_v59 = vpop.f32.mrf.mxu3 }
 0x1f3   : > { %v1537_v42 = vmax.f32 %v1425_v29, 0.0  ;;  %v1307_v33 = vadd.f32 %v1306_v1, %v1053_v28 }
 0x1f5   : > { %v1635_v4 = vpack.c.bf16 %v1537_v42, %v1537_v42  ;;  %v1490_v41 = vmax.f32 %v1307_v33, 0.0 }
 0x1f6   : > { %v1172_v34 = vpop.f32.mrf.mxu2 }
 0x1f7   : > { %1734 = vst.msk [vmem:[%s2590_s16 + $0x160] sm:$0xf] %vm1645_vm1, %v1635_v4  ;;  %v1588_v31 = vpack.c.bf16 %v1490_v41, %v1490_v41  ;;  %v1173_v10 = vadd.f32 %v2978_v15, %v1172_v34  ;;  %v1316_v53 = vpop.f32.mrf.mxu1 }
 0x1f8   : > { %v1055_v38 = vpop.f32.mrf.mxu0 }
 0x1f9   : > { %1687 = vst.msk [vmem:[%s2590_s16 + $0xa4] sm:$0xf] %vm1645_vm1, %v1588_v31  ;;  %v1427_v36 = vadd.f32 %v1426_v14, %v1173_v10  ;;  %v1056_v37 = vadd.f32 %v2978_v15, %v1055_v38  ;;  %v1436_v14 = vpop.f32.mrf.mxu3 }
 0x1fb   : > { %v1538_v7 = vmax.f32 %v1427_v36, 0.0  ;;  %v1310_v44 = vadd.f32 %v1309_v9, %v1056_v37 }
 0x1fd   : > { %v1636_v5 = vpack.c.bf16 %v1538_v7, %v1538_v7  ;;  %v1491_v62 = vmax.f32 %v1310_v44, 0.0 }
 0x1fe   : > { %v1175_v51 = vpop.f32.mrf.mxu2 }
 0x1ff   : > { %1735 = vst.msk [vmem:[%s2590_s16 + $0x164] sm:$0xf] %vm1645_vm1, %v1636_v5  ;;  %v1589_v61 = vpack.c.bf16 %v1491_v62, %v1491_v62  ;;  %v1176_v60 = vadd.f32 %v2978_v15, %v1175_v51  ;;  %v1319_v1 = vpop.f32.mrf.mxu1  ;;  %v1076_v5 = vadd.f32 %v2978_v15, %v2616_v30 }
 0x200   : > { %v1057_v52 = vpop.f32.mrf.mxu0 }
 0x201   : > { %1688 = vst.msk [vmem:[%s2590_s16 + $0xa8] sm:$0xf] %vm1645_vm1, %v1589_v61  ;;  %v1430_v39 = vadd.f32 %v1429_v57, %v1176_v60  ;;  %v1058_v23 = vadd.f32 %v2978_v15, %v1057_v52  ;;  %v1073_v57 = vadd.f32 %v2978_v15, %v2608_v20  ;;  %v1439_v4 = vpop.f32.mrf.mxu3 }
 0x203   : > { %v1539_v54 = vmax.f32 %v1430_v39, 0.0  ;;  %v1312_v26 = vadd.f32 %v1311_v8, %v1058_v23 }
 0x205   : > { %v1637_v0 = vpack.c.bf16 %v1539_v54, %v1539_v54  ;;  %v1492_v56 = vmax.f32 %v1312_v26, 0.0 }
 0x206   : > { %v1177_v3 = vpop.f32.mrf.mxu2 }
 0x207   : > { %1736 = vst.msk [vmem:[%s2590_s16 + $0x168] sm:$0xf] %vm1645_vm1, %v1637_v0  ;;  %v1590_v25 = vpack.c.bf16 %v1492_v56, %v1492_v56  ;;  %v1178_v63 = vadd.f32 %v2978_v15, %v1177_v3  ;;  %v1321_v9 = vpop.f32.mrf.mxu1 }
 0x208   : > { %v1060_v55 = vpop.f32.mrf.mxu0 }
 0x209   : > { %1689 = vst.msk [vmem:[%s2590_s16 + $0xac] sm:$0xf] %vm1645_vm1, %v1590_v25  ;;  %v1432_v50 = vadd.f32 %v1431_v45, %v1178_v63  ;;  %v1061_v6 = vadd.f32 %v2978_v15, %v1060_v55  ;;  %v1441_v23 = vpop.f32.mrf.mxu3 }
 0x20b   : > { %v1540_v27 = vmax.f32 %v1432_v50, 0.0  ;;  %v1315_v58 = vadd.f32 %v1314_v32, %v1061_v6 }
 0x20d   : > { %v1638_v19 = vpack.c.bf16 %v1540_v27, %v1540_v27  ;;  %v1493_v12 = vmax.f32 %v1315_v58, 0.0 }
 0x20e   : > { %v1180_v43 = vpop.f32.mrf.mxu2 }
 0x20f   : > { %1737 = vst.msk [vmem:[%s2590_s16 + $0x16c] sm:$0xf] %vm1645_vm1, %v1638_v19  ;;  %v1591_v18 = vpack.c.bf16 %v1493_v12, %v1493_v12  ;;  %v1181_v13 = vadd.f32 %v2978_v15, %v1180_v43  ;;  %v1324_v16 = vpop.f32.mrf.mxu1 }
 0x210   : > { %v1062_v46 = vpop.f32.mrf.mxu0  ;;  %v1325_v35 = vadd.f32 %v1324_v16, %v1071_v11 }
 0x211   : > { %1690 = vst.msk [vmem:[%s2590_s16 + $0xb0] sm:$0xf] %vm1645_vm1, %v1591_v18  ;;  %v1435_v49 = vadd.f32 %v1434_v59, %v1181_v13  ;;  %v1063_v8 = vadd.f32 %v2978_v15, %v1062_v46  ;;  %v1078_v59 = vadd.f32 %v2978_v15, %v2634_v48  ;;  %v1444_v27 = vpop.f32.mrf.mxu3 }
 0x212   : > { %v1497_v22 = vmax.f32 %v1325_v35, 0.0 }
 0x213   : > { %v1541_v17 = vmax.f32 %v1435_v49, 0.0  ;;  %v1317_v47 = vadd.f32 %v1316_v53, %v1063_v8 }
 0x214   : > { %v1595_v28 = vpack.c.bf16 %v1497_v22, %v1497_v22 }
 0x215   : > { %v1639_v24 = vpack.c.bf16 %v1541_v17, %v1541_v17  ;;  %v1494_v21 = vmax.f32 %v1317_v47, 0.0 }
 0x216   : > { %v1182_v40 = vpop.f32.mrf.mxu2  ;;  %1694 = vst.msk [vmem:[%s2590_s16 + $0xc0] sm:$0xf] %vm1645_vm1, %v1595_v28 }
 0x217   : > { %1738 = vst.msk [vmem:[%s2590_s16 + $0x170] sm:$0xf] %vm1645_vm1, %v1639_v24  ;;  %v1592_v29 = vpack.c.bf16 %v1494_v21, %v1494_v21  ;;  %v1183_v2 = vadd.f32 %v2978_v15, %v1182_v40  ;;  %v1326_v41 = vpop.f32.mrf.mxu1 }
 0x218   : > { %v1065_v32 = vpop.f32.mrf.mxu0  ;;  %v1327_v10 = vadd.f32 %v1326_v41, %v1073_v57 }
 0x219   : > { %1691 = vst.msk [vmem:[%s2590_s16 + $0xb4] sm:$0xf] %vm1645_vm1, %v1592_v29  ;;  %v1437_v42 = vadd.f32 %v1436_v14, %v1183_v2  ;;  %v1066_v33 = vadd.f32 %v2978_v15, %v1065_v32  ;;  %v1446_v14 = vpop.f32.mrf.mxu3 }
 0x21a   : > { %v1498_v37 = vmax.f32 %v1327_v10, 0.0 }
 0x21b   : > { %v1542_v34 = vmax.f32 %v1437_v42, 0.0  ;;  %v1320_v31 = vadd.f32 %v1319_v1, %v1066_v33 }
 0x21c   : > { %v1596_v7 = vpack.c.bf16 %v1498_v37, %v1498_v37 }
 0x21d   : > { %v1640_v38 = vpack.c.bf16 %v1542_v34, %v1542_v34  ;;  %v1495_v36 = vmax.f32 %v1320_v31, 0.0 }
 0x21e   : > { %v1185_v53 = vpop.f32.mrf.mxu2  ;;  %1695 = vst.msk [vmem:[%s2590_s16 + $0xc4] sm:$0xf] %vm1645_vm1, %v1596_v7 }
 0x21f   : > { %1739 = vst.msk [vmem:[%s2590_s16 + $0x174] sm:$0xf] %vm1645_vm1, %v1640_v38  ;;  %v1593_v20 = vpack.c.bf16 %v1495_v36, %v1495_v36  ;;  %v1186_v44 = vadd.f32 %v2978_v15, %v1185_v53  ;;  %v1329_v61 = vpop.f32.mrf.mxu1 }
 0x220   : > { %v1067_v45 = vpop.f32.mrf.mxu0  ;;  %v1330_v39 = vadd.f32 %v1329_v61, %v1076_v5 }
 0x221   : > { %1692 = vst.msk [vmem:[%s2590_s16 + $0xb8] sm:$0xf] %vm1645_vm1, %v1593_v20  ;;  %v1440_v62 = vadd.f32 %v1439_v4, %v1186_v44  ;;  %v1068_v51 = vadd.f32 %v2978_v15, %v1067_v45 }
 0x222   : > { %v1499_v26 = vmax.f32 %v1330_v39, 0.0 }
 0x223   : > { %v1543_v60 = vmax.f32 %v1440_v62, 0.0  ;;  %v1322_v52 = vadd.f32 %v1321_v9, %v1068_v51 }
 0x224   : > { %v1597_v56 = vpack.c.bf16 %v1499_v26, %v1499_v26 }
 0x225   : > { %v1641_v1 = vpack.c.bf16 %v1543_v60, %v1543_v60  ;;  %v1496_v54 = vmax.f32 %v1322_v52, 0.0 }
 0x226   : > { %v1187_v0 = vpop.f32.mrf.mxu2  ;;  %1696 = vst.msk [vmem:[%s2590_s16 + $0xc8] sm:$0xf] %vm1645_vm1, %v1597_v56 }
 0x227   : > { %1740 = vst.msk [vmem:[%s2590_s16 + $0x178] sm:$0xf] %vm1645_vm1, %v1641_v1  ;;  %v1594_v30 = vpack.c.bf16 %v1496_v54, %v1496_v54  ;;  %v1188_v3 = vadd.f32 %v2978_v15, %v1187_v0  ;;  %v1331_v63 = vpop.f32.mrf.mxu1 }
 0x228   : > { %v1332_v50 = vadd.f32 %v1331_v63, %v1078_v59 }
 0x229   : > { %1693 = vst.msk [vmem:[%s2590_s16 + $0xbc] sm:$0xf] %vm1645_vm1, %v1594_v30  ;;  %v1442_v25 = vadd.f32 %v1441_v23, %v1188_v3 }
 0x22a   : > { %v1500_v9 = vmax.f32 %v1332_v50, 0.0 }
 0x22b   : > { %v1544_v55 = vmax.f32 %v1442_v25, 0.0 }
 0x22c   : > { %v1598_v19 = vpack.c.bf16 %v1500_v9, %v1500_v9 }
 0x22d   : > { %v1642_v6 = vpack.c.bf16 %v1544_v55, %v1544_v55 }
 0x22e   : > { %v1190_v58 = vpop.f32.mrf.mxu2  ;;  %1697 = vst.msk [vmem:[%s2590_s16 + $0xcc] sm:$0xf] %vm1645_vm1, %v1598_v19 }
 0x22f   : > { %1741 = vst.msk [vmem:[%s2590_s16 + $0x17c] sm:$0xf] %vm1645_vm1, %v1642_v6  ;;  %v1191_v12 = vadd.f32 %v2978_v15, %v1190_v58 }
 0x231   : > { %v1445_v48 = vadd.f32 %v1444_v27, %v1191_v12 }
 0x233   : > { %v1545_v43 = vmax.f32 %v1445_v48, 0.0 }
 0x235   : > { %v1643_v18 = vpack.c.bf16 %v1545_v43, %v1545_v43 }
 0x236   : > { %v1192_v13 = vpop.f32.mrf.mxu2 }
 0x237   : > { %1742 = vst.msk [vmem:[%s2590_s16 + $0x180] sm:$0xf] %vm1645_vm1, %v1643_v18  ;;  %v1193_v46 = vadd.f32 %v2978_v15, %v1192_v13 }
 0x239   : > { %v1447_v11 = vadd.f32 %v1446_v14, %v1193_v46 }
 0x23b   : > { %v1546_v49 = vmax.f32 %v1447_v11, 0.0 }
 0x23d   : > { %v1644_v8 = vpack.c.bf16 %v1546_v49, %v1546_v49 }
 0x23f   : > { %1743 = vst.msk [vmem:[%s2590_s16 + $0x184] sm:$0xf] %vm1645_vm1, %v1644_v8 }
 0x240 PF: > { %s13_s12 = sadd.s32 1, %s2420_s12  }
 0x241   : > { %p10_p4 = scmp.ge.s32.totalorder %s13_s12, 4  }
 0x243   :  { %12 = sbr.rel (!%p10_p4) target bundleno = 1 (0x1), region = 62 }

// kernel: cnnnet_forward.6
= control target key start
LH: loop header
LB: loop body
LE: loop exit
PB: predicated region body
PF: predicated region fallthrough
CT: control target
= control target key end

     0   :  { %s1769_s21 = smov 0   ;;  %s2001_s0 = inlined_call_operand.vmem [shape: bf16[2,196,32], index: 0, kind: input, shape index: {}]   ;;  %s2002_s1 = inlined_call_operand.vmem [shape: bf16[2,196,32], index: 1, kind: input, shape index: {}]   ;;  %s2003_s2 = inlined_call_operand.vmem [shape: bf16[2,196,32], index: 2, kind: input, shape index: {}]   ;;  %s2004_s3 = inlined_call_operand.vmem [shape: bf16[2,196,32], index: 3, kind: input, shape index: {}]   ;;  %s2005_s4 = inlined_call_operand.vmem [shape: bf16[32,32], index: 4, kind: input, shape index: {}]   ;;  %s2006_s5 = inlined_call_operand.vmem [shape: f32[1,32], index: 5, kind: input, shape index: {}]   ;;  %s2007_s6 = inlined_call_operand.vmem [shape: bf16[2,196,32], index: 6, kind: output, shape index: {}]  }
   0x1 LB: > { %s1402_s22 = sadd.s32 4294967295, %s1732_s21   ;;  %p1406_p0 = scmp.ge.s32.totalorder %s1732_s21, 1  ;;  %s1732_s21 = sphi %s1769_s21, %s16_s21  }
   0x2   : > { %p242_p1 = scmp.lt.s32.totalorder %s1732_s21, 3 }
   0x4   : > { %p243_p2 = pnand %p1406_p0, %p242_p1 }
   0x5   : > { %p287_p3 = scmp.lt.s32.totalorder (!%p243_p2), %s1402_s22, 1 }
   0x6   : > { %246 = sbr.rel (%p243_p2) target bundleno = 355 (0x163), region = 44 }
   0xb   : > { %v1667_v0 = vld [vmem:[%s2005_s4 + $0x8] sm:$0xff]  ;;  %v1666_v1 = vld [vmem:[%s2005_s4] sm:$0xff]  ;;  %s2009_s22 = smov (!%p287_p3, %s1402_s22), 1  ;;  %vm417_vm0 = vcmask 261120   ;;  %vm1284_vm1 = vcmask 257024   ;;  %vm1309_vm2 = vcmask 254976  }
   0xc   : > { %463 = vmatpush.bf16.msra.mxu0 %v1667_v0  ;;  %663 = vmatpush.bf16.msra.mxu1 %v1667_v0  ;;  %s1783_s27 = smul.u32 100, %s2009_s22  ;;  %v1884_v44 = vld [vmem:[%s2006_s5] ss:$0 sm:$0xff] }
   0xd   : > { %863 = vmatpush.bf16.msra.mxu2 %v1667_v0  ;;  %1063 = vmatpush.bf16.msra.mxu3 %v1667_v0 }
   0xe   : > { %s1789_s30 = scalar_lea.vmem %s2001_s0, %s1783_s27  ;;  %s1795_s9 = scalar_lea.vmem %s2002_s1, %s1783_s27 }
   0xf   : > { %v1668_v2 = vld [vmem:[%s1789_s30] sm:$0xff]  ;;  %s1803_s12 = scalar_lea.vmem %s2003_s2, %s1783_s27  ;;  %s1809_s15 = scalar_lea.vmem %s2004_s3, %s1783_s27  ;;  %v1669_v6 = vld [vmem:[%s1789_s30 + $0x8] sm:$0xff]  ;;  %v1670_v10 = vld [vmem:[%s1789_s30 + $0x10] sm:$0xff] }
  0x10   : > { %464 = vmatpush.bf16.msra.mxu0 %v1666_v1  ;;  %664 = vmatpush.bf16.msra.mxu1 %v1666_v1  ;;  %v1680_v3 = vld [vmem:[%s1795_s9] sm:$0xff]  ;;  %v1681_v7 = vld [vmem:[%s1795_s9 + $0x8] sm:$0xff]  ;;  %v1682_v11 = vld [vmem:[%s1795_s9 + $0x10] sm:$0xff]  ;;  %s1891_s20 = scalar_lea.vmem %s2007_s6, %s1783_s27 }
  0x11   : > { %864 = vmatpush.bf16.msra.mxu2 %v1666_v1  ;;  %1064 = vmatpush.bf16.msra.mxu3 %v1666_v1  ;;  %v1692_v4 = vld [vmem:[%s1803_s12] sm:$0xff]  ;;  %v1693_v8 = vld [vmem:[%s1803_s12 + $0x8] sm:$0xff]  ;;  %v1694_v12 = vld [vmem:[%s1803_s12 + $0x10] sm:$0xff] }
  0x12   : > { %v1704_v5 = vld [vmem:[%s1809_s15] sm:$0xff]  ;;  %v1705_v9 = vld [vmem:[%s1809_s15 + $0x8] sm:$0xff]  ;;  %v1706_v13 = vld [vmem:[%s1809_s15 + $0x10] sm:$0xff] }
  0x13   : > { %1468 = vmatmul.msk.bf16.vlgmr.msra.gmra.mxu0 %vm417_vm0, %v1668_v2  ;;  %1529 = vmatmul.msk.bf16.vlgmr.msra.gmra.mxu1 %vm417_vm0, %v1680_v3  ;;  %v1671_v14 = vld [vmem:[%s1789_s30 + $0x18] sm:$0xff]  ;;  %v1672_v18 = vld [vmem:[%s1789_s30 + $0x20] sm:$0xff]  ;;  %v1673_v22 = vld [vmem:[%s1789_s30 + $0x28] sm:$0xff] }
  0x14   : > { %1590 = vmatmul.msk.bf16.vlgmr.msra.gmra.mxu2 %vm417_vm0, %v1692_v4  ;;  %1651 = vmatmul.msk.bf16.vlgmr.msra.gmra.mxu3 %vm417_vm0, %v1704_v5  ;;  %v1683_v15 = vld [vmem:[%s1795_s9 + $0x18] sm:$0xff]  ;;  %v1684_v19 = vld [vmem:[%s1795_s9 + $0x20] sm:$0xff]  ;;  %v1685_v23 = vld [vmem:[%s1795_s9 + $0x28] sm:$0xff] }
  0x15   : > { %v1695_v16 = vld [vmem:[%s1803_s12 + $0x18] sm:$0xff]  ;;  %v1696_v20 = vld [vmem:[%s1803_s12 + $0x20] sm:$0xff]  ;;  %v1697_v24 = vld [vmem:[%s1803_s12 + $0x28] sm:$0xff] }
  0x16   : > { %v1707_v17 = vld [vmem:[%s1809_s15 + $0x18] sm:$0xff]  ;;  %v1708_v21 = vld [vmem:[%s1809_s15 + $0x20] sm:$0xff]  ;;  %v1709_v25 = vld [vmem:[%s1809_s15 + $0x28] sm:$0xff] }
  0x17   : > { %v1674_v26 = vld [vmem:[%s1789_s30 + $0x30] sm:$0xff]  ;;  %v1675_v30 = vld [vmem:[%s1789_s30 + $0x38] sm:$0xff]  ;;  %v1676_v34 = vld [vmem:[%s1789_s30 + $0x40] sm:$0xff] }
  0x18   : > { %v1686_v27 = vld [vmem:[%s1795_s9 + $0x30] sm:$0xff]  ;;  %v1687_v31 = vld [vmem:[%s1795_s9 + $0x38] sm:$0xff]  ;;  %v1688_v35 = vld [vmem:[%s1795_s9 + $0x40] sm:$0xff] }
  0x19   : > { %v1698_v28 = vld [vmem:[%s1803_s12 + $0x30] sm:$0xff]  ;;  %v1699_v32 = vld [vmem:[%s1803_s12 + $0x38] sm:$0xff]  ;;  %v1700_v38 = vld [vmem:[%s1803_s12 + $0x40] sm:$0xff] }
  0x1a   : > { %v1710_v29 = vld [vmem:[%s1809_s15 + $0x30] sm:$0xff]  ;;  %v1711_v33 = vld [vmem:[%s1809_s15 + $0x38] sm:$0xff]  ;;  %v1712_v39 = vld [vmem:[%s1809_s15 + $0x40] sm:$0xff] }
  0x1b   : > { %v1677_v52 = vld [vmem:[%s1789_s30 + $0x48] sm:$0xff] }
  0x1c   : > { %v1689_v53 = vld [vmem:[%s1795_s9 + $0x48] sm:$0xff] }
  0x1d   : > { %v1701_v59 = vld [vmem:[%s1803_s12 + $0x48] sm:$0xff] }
  0x1e   : > { %v1713_v60 = vld [vmem:[%s1809_s15 + $0x48] sm:$0xff] }
  0x23   : > { %1469 = vmatmul.msk.bf16.gmra.mxu0 %vm417_vm0, %v1669_v6  ;;  %1530 = vmatmul.msk.bf16.gmra.mxu1 %vm417_vm0, %v1681_v7 }
  0x24   : > { %1591 = vmatmul.msk.bf16.gmra.mxu2 %vm417_vm0, %v1693_v8  ;;  %1652 = vmatmul.msk.bf16.gmra.mxu3 %vm417_vm0, %v1705_v9 }
  0x33   : > { %1470 = vmatmul.msk.bf16.gmra.mxu0 %vm417_vm0, %v1670_v10  ;;  %1531 = vmatmul.msk.bf16.gmra.mxu1 %vm417_vm0, %v1682_v11 }
  0x34   : > { %1592 = vmatmul.msk.bf16.gmra.mxu2 %vm417_vm0, %v1694_v12  ;;  %1653 = vmatmul.msk.bf16.gmra.mxu3 %vm417_vm0, %v1706_v13  ;;  %v1678_v12 = vld [vmem:[%s1789_s30 + $0x50] sm:$0xff] }
  0x35   : > { %v1690_v13 = vld [vmem:[%s1795_s9 + $0x50] sm:$0xff] }
  0x43   : > { %1471 = vmatmul.msk.bf16.gmra.mxu0 %vm417_vm0, %v1671_v14  ;;  %1532 = vmatmul.msk.bf16.gmra.mxu1 %vm417_vm0, %v1683_v15 }
  0x44   : > { %1593 = vmatmul.msk.bf16.gmra.mxu2 %vm417_vm0, %v1695_v16  ;;  %1654 = vmatmul.msk.bf16.gmra.mxu3 %vm417_vm0, %v1707_v17 }
  0x53   : > { %1472 = vmatmul.msk.bf16.gmra.mxu0 %vm417_vm0, %v1672_v18  ;;  %1533 = vmatmul.msk.bf16.gmra.mxu1 %vm417_vm0, %v1684_v19  ;;  %v1702_v19 = vld [vmem:[%s1803_s12 + $0x50] sm:$0xff] }
  0x54   : > { %1594 = vmatmul.msk.bf16.gmra.mxu2 %vm417_vm0, %v1696_v20  ;;  %1655 = vmatmul.msk.bf16.gmra.mxu3 %vm417_vm0, %v1708_v21  ;;  %v1714_v20 = vld [vmem:[%s1809_s15 + $0x50] sm:$0xff] }
  0x63   : > { %1473 = vmatmul.msk.bf16.gmra.mxu0 %vm417_vm0, %v1673_v22  ;;  %1534 = vmatmul.msk.bf16.gmra.mxu1 %vm417_vm0, %v1685_v23 }
  0x64   : > { %1595 = vmatmul.msk.bf16.gmra.mxu2 %vm417_vm0, %v1697_v24  ;;  %1656 = vmatmul.msk.bf16.gmra.mxu3 %vm417_vm0, %v1709_v25 }
  0x73   : > { %1474 = vmatmul.msk.bf16.gmra.mxu0 %vm417_vm0, %v1674_v26  ;;  %1535 = vmatmul.msk.bf16.gmra.mxu1 %vm417_vm0, %v1686_v27 }
  0x74   : > { %1596 = vmatmul.msk.bf16.gmra.mxu2 %vm417_vm0, %v1698_v28  ;;  %1657 = vmatmul.msk.bf16.gmra.mxu3 %vm417_vm0, %v1710_v29 }
  0x83   : > { %1475 = vmatmul.msk.bf16.gmra.mxu0 %vm417_vm0, %v1675_v30  ;;  %1536 = vmatmul.msk.bf16.gmra.mxu1 %vm417_vm0, %v1687_v31 }
  0x84   : > { %1597 = vmatmul.msk.bf16.gmra.mxu2 %vm417_vm0, %v1699_v32  ;;  %1658 = vmatmul.msk.bf16.gmra.mxu3 %vm417_vm0, %v1711_v33 }
  0x90   : > { %v466_v36 = vpop.f32.mrf.mxu0  ;;  %v666_v37 = vpop.f32.mrf.mxu1 }
  0x91   : > { %v1130_v40 = vmax.f32 %v466_v36, %v666_v37  ;;  %v1679_v36 = vld [vmem:[%s1789_s30 + $0x58] sm:$0xff] }
  0x92   : > { %v1691_v37 = vld [vmem:[%s1795_s9 + $0x58] sm:$0xff] }
  0x93   : > { %1476 = vmatmul.msk.bf16.gmra.mxu0 %vm417_vm0, %v1676_v34  ;;  %1537 = vmatmul.msk.bf16.gmra.mxu1 %vm417_vm0, %v1688_v35 }
  0x94   : > { %1598 = vmatmul.msk.bf16.gmra.mxu2 %vm417_vm0, %v1700_v38  ;;  %1659 = vmatmul.msk.bf16.gmra.mxu3 %vm417_vm0, %v1712_v39 }
  0x97   : > { %v866_v41 = vpop.f32.mrf.mxu2  ;;  %v1066_v42 = vpop.f32.mrf.mxu3 }
  0x98   : > { %v1155_v43 = vmax.f32 %v866_v41, %v1066_v42  ;;  %v468_v45 = vpop.f32.mrf.mxu0  ;;  %v668_v46 = vpop.f32.mrf.mxu1 }
  0x99   : > { %v1131_v55 = vmax.f32 %v468_v45, %v668_v46  ;;  %v1715_v45 = vld [vmem:[%s1809_s15 + $0x58] sm:$0xff] }
  0x9a   : > { %v1180_v47 = vmax.f32 %v1130_v40, %v1155_v43  ;;  %v1703_v43 = vld [vmem:[%s1803_s12 + $0x58] sm:$0xff] }
  0x9c   : > { %v1209_v48 = vadd.f32 %v1884_v44, %v1180_v47 }
  0x9e   : > { %v1234_v49 = vmax.f32 %v1209_v48, 0.0 }
  0x9f   : > { %v868_v50 = vpop.f32.mrf.mxu2  ;;  %v1068_v51 = vpop.f32.mrf.mxu3 }
  0xa0   : > { %v1259_v54 = vpack.c.bf16 %v1234_v49, %v1234_v49  ;;  %v1156_v56 = vmax.f32 %v868_v50, %v1068_v51  ;;  %v471_v57 = vpop.f32.mrf.mxu0  ;;  %v671_v58 = vpop.f32.mrf.mxu1 }
  0xa1   : > { %v1132_v0 = vmax.f32 %v471_v57, %v671_v58  ;;  %v554_v57 = vld [vmem:[%s1795_s9 + $0x60] sm:$0x3] }
  0xa2   : > { %1285 = vst.msk [vmem:[%s1891_s20] sm:$0xf] %vm1284_vm1, %v1259_v54  ;;  %v1181_v61 = vmax.f32 %v1131_v55, %v1156_v56  ;;  %v341_v56 = vld [vmem:[%s1789_s30 + $0x60] sm:$0x3] }
  0xa3   : > { %1477 = vmatmul.msk.bf16.gmra.mxu0 %vm417_vm0, %v1677_v52  ;;  %1538 = vmatmul.msk.bf16.gmra.mxu1 %vm417_vm0, %v1689_v53  ;;  %v754_v58 = vld [vmem:[%s1803_s12 + $0x60] sm:$0x3] }
  0xa4   : > { %v1210_v62 = vadd.f32 %v1884_v44, %v1181_v61  ;;  %1599 = vmatmul.msk.bf16.gmra.mxu2 %vm417_vm0, %v1701_v59  ;;  %1660 = vmatmul.msk.bf16.gmra.mxu3 %vm417_vm0, %v1713_v60  ;;  %v954_v59 = vld [vmem:[%s1809_s15 + $0x60] sm:$0x3]  ;;  %v391_v61 = vunpack.c.l.b16 %v341_v56 }
  0xa6   : > { %v1235_v63 = vmax.f32 %v1210_v62, 0.0  ;;  %v604_v62 = vunpack.c.l.b16 %v554_v57 }
  0xa7   : > { %v871_v1 = vpop.f32.mrf.mxu2  ;;  %v1071_v2 = vpop.f32.mrf.mxu3 }
  0xa8   : > { %v1260_v3 = vpack.c.bf16 %v1235_v63, %v1235_v63  ;;  %v1157_v4 = vmax.f32 %v871_v1, %v1071_v2  ;;  %v473_v5 = vpop.f32.mrf.mxu0  ;;  %v673_v6 = vpop.f32.mrf.mxu1  ;;  %v804_v63 = vunpack.c.l.b16 %v754_v58  ;;  %v1004_v1 = vunpack.c.l.b16 %v954_v59 }
  0xa9   : > { %v1133_v15 = vmax.f32 %v473_v5, %v673_v6  ;;  %v404_v5 = vpack.c.b16 %v391_v61, %v391_v61  ;;  %v617_v6 = vpack.c.b16 %v604_v62, %v604_v62 }
  0xaa   : > { %1286 = vst.msk [vmem:[%s1891_s20 + $0x4] sm:$0xf] %vm1284_vm1, %v1260_v3  ;;  %v1182_v7 = vmax.f32 %v1132_v0, %v1157_v4 }
  0xac   : > { %v1211_v8 = vadd.f32 %v1884_v44, %v1182_v7  ;;  %v817_v7 = vpack.c.b16 %v804_v63, %v804_v63 }
  0xae   : > { %v1236_v9 = vmax.f32 %v1211_v8, 0.0 }
  0xaf   : > { %v873_v10 = vpop.f32.mrf.mxu2  ;;  %v1073_v11 = vpop.f32.mrf.mxu3 }
  0xb0   : > { %v1261_v14 = vpack.c.bf16 %v1236_v9, %v1236_v9  ;;  %v1158_v16 = vmax.f32 %v873_v10, %v1073_v11  ;;  %v476_v17 = vpop.f32.mrf.mxu0  ;;  %v676_v18 = vpop.f32.mrf.mxu1 }
  0xb1   : > { %v1134_v24 = vmax.f32 %v476_v17, %v676_v18 }
  0xb2   : > { %1287 = vst.msk [vmem:[%s1891_s20 + $0x8] sm:$0xf] %vm1284_vm1, %v1261_v14  ;;  %v1183_v21 = vmax.f32 %v1133_v15, %v1158_v16 }
  0xb3   : > { %1478 = vmatmul.msk.bf16.gmra.mxu0 %vm417_vm0, %v1678_v12  ;;  %1539 = vmatmul.msk.bf16.gmra.mxu1 %vm417_vm0, %v1690_v13  ;;  %v1017_v13 = vpack.c.b16 %v1004_v1, %v1004_v1 }
  0xb4   : > { %v1212_v22 = vadd.f32 %v1884_v44, %v1183_v21  ;;  %1600 = vmatmul.msk.bf16.gmra.mxu2 %vm417_vm0, %v1702_v19  ;;  %1661 = vmatmul.msk.bf16.gmra.mxu3 %vm417_vm0, %v1714_v20 }
  0xb6   : > { %v1237_v23 = vmax.f32 %v1212_v22, 0.0 }
  0xb7   : > { %v876_v25 = vpop.f32.mrf.mxu2  ;;  %v1076_v26 = vpop.f32.mrf.mxu3 }
  0xb8   : > { %v1262_v27 = vpack.c.bf16 %v1237_v23, %v1237_v23  ;;  %v1159_v28 = vmax.f32 %v876_v25, %v1076_v26  ;;  %v478_v29 = vpop.f32.mrf.mxu0  ;;  %v678_v30 = vpop.f32.mrf.mxu1 }
  0xb9   : > { %v1135_v39 = vmax.f32 %v478_v29, %v678_v30 }
  0xba   : > { %1288 = vst.msk [vmem:[%s1891_s20 + $0xc] sm:$0xf] %vm1284_vm1, %v1262_v27  ;;  %v1184_v31 = vmax.f32 %v1134_v24, %v1159_v28 }
  0xbc   : > { %v1213_v32 = vadd.f32 %v1884_v44, %v1184_v31 }
  0xbe   : > { %v1238_v33 = vmax.f32 %v1213_v32, 0.0 }
  0xbf   : > { %v878_v34 = vpop.f32.mrf.mxu2  ;;  %v1078_v35 = vpop.f32.mrf.mxu3 }
  0xc0   : > { %v1263_v38 = vpack.c.bf16 %v1238_v33, %v1238_v33  ;;  %v1160_v40 = vmax.f32 %v878_v34, %v1078_v35  ;;  %v481_v41 = vpop.f32.mrf.mxu0  ;;  %v681_v42 = vpop.f32.mrf.mxu1 }
  0xc1   : > { %v1136_v49 = vmax.f32 %v481_v41, %v681_v42 }
  0xc2   : > { %1289 = vst.msk [vmem:[%s1891_s20 + $0x10] sm:$0xf] %vm1284_vm1, %v1263_v38  ;;  %v1185_v46 = vmax.f32 %v1135_v39, %v1160_v40 }
  0xc3   : > { %1479 = vmatmul.msk.bf16.gmra.mxu0 %vm417_vm0, %v1679_v36  ;;  %1540 = vmatmul.msk.bf16.gmra.mxu1 %vm417_vm0, %v1691_v37 }
  0xc4   : > { %v1214_v47 = vadd.f32 %v1884_v44, %v1185_v46  ;;  %1601 = vmatmul.msk.bf16.gmra.mxu2 %vm417_vm0, %v1703_v43  ;;  %1662 = vmatmul.msk.bf16.gmra.mxu3 %vm417_vm0, %v1715_v45 }
  0xc6   : > { %v1239_v48 = vmax.f32 %v1214_v47, 0.0 }
  0xc7   : > { %v881_v50 = vpop.f32.mrf.mxu2  ;;  %v1081_v51 = vpop.f32.mrf.mxu3 }
  0xc8   : > { %v1264_v52 = vpack.c.bf16 %v1239_v48, %v1239_v48  ;;  %v1161_v53 = vmax.f32 %v881_v50, %v1081_v51  ;;  %v483_v54 = vpop.f32.mrf.mxu0  ;;  %v683_v55 = vpop.f32.mrf.mxu1 }
  0xc9   : > { %v1137_v9 = vmax.f32 %v483_v54, %v683_v55 }
  0xca   : > { %1290 = vst.msk [vmem:[%s1891_s20 + $0x14] sm:$0xf] %vm1284_vm1, %v1264_v52  ;;  %v1186_v60 = vmax.f32 %v1136_v49, %v1161_v53 }
  0xcc   : > { %v1215_v0 = vadd.f32 %v1884_v44, %v1186_v60 }
  0xce   : > { %v1240_v2 = vmax.f32 %v1215_v0, 0.0 }
  0xcf   : > { %v883_v3 = vpop.f32.mrf.mxu2  ;;  %v1083_v4 = vpop.f32.mrf.mxu3 }
  0xd0   : > { %v1265_v8 = vpack.c.bf16 %v1240_v2, %v1240_v2  ;;  %v1162_v10 = vmax.f32 %v883_v3, %v1083_v4  ;;  %v486_v11 = vpop.f32.mrf.mxu0  ;;  %v686_v12 = vpop.f32.mrf.mxu1 }
  0xd1   : > { %v1138_v17 = vmax.f32 %v486_v11, %v686_v12 }
  0xd2   : > { %1291 = vst.msk [vmem:[%s1891_s20 + $0x18] sm:$0xf] %vm1284_vm1, %v1265_v8  ;;  %v1187_v14 = vmax.f32 %v1137_v9, %v1162_v10 }
  0xd3   : > { %1480 = vmatmul.msk.bf16.gmra.mxu0 %vm417_vm0, %v404_v5  ;;  %1541 = vmatmul.msk.bf16.gmra.mxu1 %vm417_vm0, %v617_v6 }
  0xd4   : > { %v1216_v15 = vadd.f32 %v1884_v44, %v1187_v14  ;;  %1602 = vmatmul.msk.bf16.gmra.mxu2 %vm417_vm0, %v817_v7  ;;  %1663 = vmatmul.msk.bf16.gmra.mxu3 %vm417_vm0, %v1017_v13 }
  0xd6   : > { %v1241_v16 = vmax.f32 %v1216_v15, 0.0 }
  0xd7   : > { %v886_v18 = vpop.f32.mrf.mxu2  ;;  %v1086_v19 = vpop.f32.mrf.mxu3 }
  0xd8   : > { %v1266_v20 = vpack.c.bf16 %v1241_v16, %v1241_v16  ;;  %v1163_v21 = vmax.f32 %v886_v18, %v1086_v19  ;;  %v488_v22 = vpop.f32.mrf.mxu0  ;;  %v688_v23 = vpop.f32.mrf.mxu1 }
  0xd9   : > { %v1139_v30 = vmax.f32 %v488_v22, %v688_v23 }
  0xda   : > { %1292 = vst.msk [vmem:[%s1891_s20 + $0x1c] sm:$0xf] %vm1284_vm1, %v1266_v20  ;;  %v1188_v24 = vmax.f32 %v1138_v17, %v1163_v21 }
  0xdc   : > { %v1217_v25 = vadd.f32 %v1884_v44, %v1188_v24 }
  0xde   : > { %v1242_v26 = vmax.f32 %v1217_v25, 0.0 }
  0xdf   : > { %v888_v27 = vpop.f32.mrf.mxu2  ;;  %v1088_v28 = vpop.f32.mrf.mxu3 }
  0xe0   : > { %v1267_v29 = vpack.c.bf16 %v1242_v26, %v1242_v26  ;;  %v1164_v31 = vmax.f32 %v888_v27, %v1088_v28  ;;  %v491_v32 = vpop.f32.mrf.mxu0  ;;  %v691_v33 = vpop.f32.mrf.mxu1 }
  0xe1   : > { %v1140_v37 = vmax.f32 %v491_v32, %v691_v33 }
  0xe2   : > { %1293 = vst.msk [vmem:[%s1891_s20 + $0x20] sm:$0xf] %vm1284_vm1, %v1267_v29  ;;  %v1189_v34 = vmax.f32 %v1139_v30, %v1164_v31 }
  0xe4   : > { %v1218_v35 = vadd.f32 %v1884_v44, %v1189_v34 }
  0xe6   : > { %v1243_v36 = vmax.f32 %v1218_v35, 0.0 }
  0xe7   : > { %v891_v38 = vpop.f32.mrf.mxu2  ;;  %v1091_v39 = vpop.f32.mrf.mxu3 }
  0xe8   : > { %v1268_v40 = vpack.c.bf16 %v1243_v36, %v1243_v36  ;;  %v1165_v41 = vmax.f32 %v891_v38, %v1091_v39  ;;  %v493_v42 = vpop.f32.mrf.mxu0  ;;  %v693_v43 = vpop.f32.mrf.mxu1 }
  0xe9   : > { %v1141_v51 = vmax.f32 %v493_v42, %v693_v43 }
  0xea   : > { %1294 = vst.msk [vmem:[%s1891_s20 + $0x24] sm:$0xf] %vm1284_vm1, %v1268_v40  ;;  %v1190_v45 = vmax.f32 %v1140_v37, %v1165_v41 }
  0xec   : > { %v1219_v46 = vadd.f32 %v1884_v44, %v1190_v45 }
  0xee   : > { %v1244_v47 = vmax.f32 %v1219_v46, 0.0 }
  0xef   : > { %v893_v48 = vpop.f32.mrf.mxu2  ;;  %v1093_v49 = vpop.f32.mrf.mxu3 }
  0xf0   : > { %v1269_v50 = vpack.c.bf16 %v1244_v47, %v1244_v47  ;;  %v1166_v52 = vmax.f32 %v893_v48, %v1093_v49  ;;  %v496_v53 = vpop.f32.mrf.mxu0  ;;  %v696_v54 = vpop.f32.mrf.mxu1 }
  0xf1   : > { %v1142_v58 = vmax.f32 %v496_v53, %v696_v54 }
  0xf2   : > { %1295 = vst.msk [vmem:[%s1891_s20 + $0x28] sm:$0xf] %vm1284_vm1, %v1269_v50  ;;  %v1191_v55 = vmax.f32 %v1141_v51, %v1166_v52 }
  0xf4   : > { %v1220_v56 = vadd.f32 %v1884_v44, %v1191_v55 }
  0xf6   : > { %v1245_v57 = vmax.f32 %v1220_v56, 0.0 }
  0xf7   : > { %v896_v59 = vpop.f32.mrf.mxu2  ;;  %v1096_v60 = vpop.f32.mrf.mxu3 }
  0xf8   : > { %v1270_v61 = vpack.c.bf16 %v1245_v57, %v1245_v57  ;;  %v1167_v62 = vmax.f32 %v896_v59, %v1096_v60  ;;  %v498_v63 = vpop.f32.mrf.mxu0  ;;  %v698_v0 = vpop.f32.mrf.mxu1 }
  0xf9   : > { %v1143_v7 = vmax.f32 %v498_v63, %v698_v0 }
  0xfa   : > { %1296 = vst.msk [vmem:[%s1891_s20 + $0x2c] sm:$0xf] %vm1284_vm1, %v1270_v61  ;;  %v1192_v1 = vmax.f32 %v1142_v58, %v1167_v62 }
  0xfc   : > { %v1221_v2 = vadd.f32 %v1884_v44, %v1192_v1 }
  0xfe   : > { %v1246_v3 = vmax.f32 %v1221_v2, 0.0 }
  0xff   : > { %v898_v4 = vpop.f32.mrf.mxu2  ;;  %v1098_v5 = vpop.f32.mrf.mxu3 }
 0x100   : > { %v1271_v6 = vpack.c.bf16 %v1246_v3, %v1246_v3  ;;  %v1168_v8 = vmax.f32 %v898_v4, %v1098_v5  ;;  %v501_v9 = vpop.f32.mrf.mxu0  ;;  %v701_v10 = vpop.f32.mrf.mxu1 }
 0x101   : > { %v1144_v14 = vmax.f32 %v501_v9, %v701_v10 }
 0x102   : > { %1297 = vst.msk [vmem:[%s1891_s20 + $0x30] sm:$0xf] %vm1284_vm1, %v1271_v6  ;;  %v1193_v11 = vmax.f32 %v1143_v7, %v1168_v8 }
 0x104   : > { %v1222_v12 = vadd.f32 %v1884_v44, %v1193_v11 }
 0x106   : > { %v1247_v13 = vmax.f32 %v1222_v12, 0.0 }
 0x107   : > { %v901_v15 = vpop.f32.mrf.mxu2  ;;  %v1101_v16 = vpop.f32.mrf.mxu3 }
 0x108   : > { %v1272_v17 = vpack.c.bf16 %v1247_v13, %v1247_v13  ;;  %v1169_v18 = vmax.f32 %v901_v15, %v1101_v16  ;;  %v503_v19 = vpop.f32.mrf.mxu0  ;;  %v703_v20 = vpop.f32.mrf.mxu1 }
 0x109   : > { %v1145_v27 = vmax.f32 %v503_v19, %v703_v20 }
 0x10a   : > { %1298 = vst.msk [vmem:[%s1891_s20 + $0x34] sm:$0xf] %vm1284_vm1, %v1272_v17  ;;  %v1194_v21 = vmax.f32 %v1144_v14, %v1169_v18 }
 0x10c   : > { %v1223_v22 = vadd.f32 %v1884_v44, %v1194_v21 }
 0x10e   : > { %v1248_v23 = vmax.f32 %v1223_v22, 0.0 }
 0x10f   : > { %v903_v24 = vpop.f32.mrf.mxu2  ;;  %v1103_v25 = vpop.f32.mrf.mxu3 }
 0x110   : > { %v1273_v26 = vpack.c.bf16 %v1248_v23, %v1248_v23  ;;  %v1170_v28 = vmax.f32 %v903_v24, %v1103_v25  ;;  %v506_v29 = vpop.f32.mrf.mxu0  ;;  %v706_v30 = vpop.f32.mrf.mxu1 }
 0x111   : > { %v1146_v34 = vmax.f32 %v506_v29, %v706_v30 }
 0x112   : > { %1299 = vst.msk [vmem:[%s1891_s20 + $0x38] sm:$0xf] %vm1284_vm1, %v1273_v26  ;;  %v1195_v31 = vmax.f32 %v1145_v27, %v1170_v28 }
 0x114   : > { %v1224_v32 = vadd.f32 %v1884_v44, %v1195_v31 }
 0x116   : > { %v1249_v33 = vmax.f32 %v1224_v32, 0.0 }
 0x117   : > { %v906_v35 = vpop.f32.mrf.mxu2  ;;  %v1106_v36 = vpop.f32.mrf.mxu3 }
 0x118   : > { %v1274_v37 = vpack.c.bf16 %v1249_v33, %v1249_v33  ;;  %v1171_v38 = vmax.f32 %v906_v35, %v1106_v36  ;;  %v508_v39 = vpop.f32.mrf.mxu0  ;;  %v708_v40 = vpop.f32.mrf.mxu1 }
 0x119   : > { %v1147_v48 = vmax.f32 %v508_v39, %v708_v40 }
 0x11a   : > { %1300 = vst.msk [vmem:[%s1891_s20 + $0x3c] sm:$0xf] %vm1284_vm1, %v1274_v37  ;;  %v1196_v41 = vmax.f32 %v1146_v34, %v1171_v38 }
 0x11c   : > { %v1225_v42 = vadd.f32 %v1884_v44, %v1196_v41 }
 0x11e   : > { %v1250_v43 = vmax.f32 %v1225_v42, 0.0 }
 0x11f   : > { %v908_v45 = vpop.f32.mrf.mxu2  ;;  %v1108_v46 = vpop.f32.mrf.mxu3 }
 0x120   : > { %v1275_v47 = vpack.c.bf16 %v1250_v43, %v1250_v43  ;;  %v1172_v49 = vmax.f32 %v908_v45, %v1108_v46  ;;  %v511_v50 = vpop.f32.mrf.mxu0  ;;  %v711_v51 = vpop.f32.mrf.mxu1 }
 0x121   : > { %v1148_v55 = vmax.f32 %v511_v50, %v711_v51 }
 0x122   : > { %1301 = vst.msk [vmem:[%s1891_s20 + $0x40] sm:$0xf] %vm1284_vm1, %v1275_v47  ;;  %v1197_v52 = vmax.f32 %v1147_v48, %v1172_v49 }
 0x124   : > { %v1226_v53 = vadd.f32 %v1884_v44, %v1197_v52 }
 0x126   : > { %v1251_v54 = vmax.f32 %v1226_v53, 0.0 }
 0x127   : > { %v911_v56 = vpop.f32.mrf.mxu2  ;;  %v1111_v57 = vpop.f32.mrf.mxu3 }
 0x128   : > { %v1276_v58 = vpack.c.bf16 %v1251_v54, %v1251_v54  ;;  %v1173_v59 = vmax.f32 %v911_v56, %v1111_v57  ;;  %v513_v60 = vpop.f32.mrf.mxu0  ;;  %v713_v61 = vpop.f32.mrf.mxu1 }
 0x129   : > { %v1149_v4 = vmax.f32 %v513_v60, %v713_v61 }
 0x12a   : > { %1302 = vst.msk [vmem:[%s1891_s20 + $0x44] sm:$0xf] %vm1284_vm1, %v1276_v58  ;;  %v1198_v62 = vmax.f32 %v1148_v55, %v1173_v59 }
 0x12c   : > { %v1227_v63 = vadd.f32 %v1884_v44, %v1198_v62 }
 0x12e   : > { %v1252_v0 = vmax.f32 %v1227_v63, 0.0 }
 0x12f   : > { %v913_v1 = vpop.f32.mrf.mxu2  ;;  %v1113_v2 = vpop.f32.mrf.mxu3 }
 0x130   : > { %v1277_v3 = vpack.c.bf16 %v1252_v0, %v1252_v0  ;;  %v1174_v5 = vmax.f32 %v913_v1, %v1113_v2  ;;  %v516_v6 = vpop.f32.mrf.mxu0  ;;  %v716_v7 = vpop.f32.mrf.mxu1 }
 0x131   : > { %v1150_v11 = vmax.f32 %v516_v6, %v716_v7 }
 0x132   : > { %1303 = vst.msk [vmem:[%s1891_s20 + $0x48] sm:$0xf] %vm1284_vm1, %v1277_v3  ;;  %v1199_v8 = vmax.f32 %v1149_v4, %v1174_v5 }
 0x134   : > { %v1228_v9 = vadd.f32 %v1884_v44, %v1199_v8 }
 0x136   : > { %v1253_v10 = vmax.f32 %v1228_v9, 0.0 }
 0x137   : > { %v916_v12 = vpop.f32.mrf.mxu2  ;;  %v1116_v13 = vpop.f32.mrf.mxu3 }
 0x138   : > { %v1278_v14 = vpack.c.bf16 %v1253_v10, %v1253_v10  ;;  %v1175_v15 = vmax.f32 %v916_v12, %v1116_v13  ;;  %v518_v16 = vpop.f32.mrf.mxu0  ;;  %v718_v17 = vpop.f32.mrf.mxu1 }
 0x139   : > { %v1151_v24 = vmax.f32 %v518_v16, %v718_v17 }
 0x13a   : > { %1304 = vst.msk [vmem:[%s1891_s20 + $0x4c] sm:$0xf] %vm1284_vm1, %v1278_v14  ;;  %v1200_v18 = vmax.f32 %v1150_v11, %v1175_v15 }
 0x13c   : > { %v1229_v19 = vadd.f32 %v1884_v44, %v1200_v18 }
 0x13e   : > { %v1254_v20 = vmax.f32 %v1229_v19, 0.0 }
 0x13f   : > { %v918_v21 = vpop.f32.mrf.mxu2  ;;  %v1118_v22 = vpop.f32.mrf.mxu3 }
 0x140   : > { %v1279_v23 = vpack.c.bf16 %v1254_v20, %v1254_v20  ;;  %v1176_v25 = vmax.f32 %v918_v21, %v1118_v22  ;;  %v521_v26 = vpop.f32.mrf.mxu0  ;;  %v721_v27 = vpop.f32.mrf.mxu1 }
 0x141   : > { %v1152_v31 = vmax.f32 %v521_v26, %v721_v27 }
 0x142   : > { %1305 = vst.msk [vmem:[%s1891_s20 + $0x50] sm:$0xf] %vm1284_vm1, %v1279_v23  ;;  %v1201_v28 = vmax.f32 %v1151_v24, %v1176_v25 }
 0x144   : > { %v1230_v29 = vadd.f32 %v1884_v44, %v1201_v28 }
 0x146   : > { %v1255_v30 = vmax.f32 %v1230_v29, 0.0 }
 0x147   : > { %v921_v32 = vpop.f32.mrf.mxu2  ;;  %v1121_v33 = vpop.f32.mrf.mxu3 }
 0x148   : > { %v1280_v34 = vpack.c.bf16 %v1255_v30, %v1255_v30  ;;  %v1177_v35 = vmax.f32 %v921_v32, %v1121_v33  ;;  %v523_v36 = vpop.f32.mrf.mxu0  ;;  %v723_v37 = vpop.f32.mrf.mxu1 }
 0x149   : > { %v1153_v45 = vmax.f32 %v523_v36, %v723_v37 }
 0x14a   : > { %1306 = vst.msk [vmem:[%s1891_s20 + $0x54] sm:$0xf] %vm1284_vm1, %v1280_v34  ;;  %v1202_v38 = vmax.f32 %v1152_v31, %v1177_v35 }
 0x14c   : > { %v1231_v39 = vadd.f32 %v1884_v44, %v1202_v38 }
 0x14e   : > { %v1256_v40 = vmax.f32 %v1231_v39, 0.0 }
 0x14f   : > { %v923_v41 = vpop.f32.mrf.mxu2  ;;  %v1123_v42 = vpop.f32.mrf.mxu3 }
 0x150   : > { %v1281_v43 = vpack.c.bf16 %v1256_v40, %v1256_v40  ;;  %v1178_v46 = vmax.f32 %v923_v41, %v1123_v42  ;;  %v526_v47 = vpop.f32.mrf.mxu0  ;;  %v726_v48 = vpop.f32.mrf.mxu1 }
 0x151   : > { %v1154_v52 = vmax.f32 %v526_v47, %v726_v48 }
 0x152   : > { %1307 = vst.msk [vmem:[%s1891_s20 + $0x58] sm:$0xf] %vm1284_vm1, %v1281_v43  ;;  %v1203_v49 = vmax.f32 %v1153_v45, %v1178_v46 }
 0x154   : > { %v1232_v50 = vadd.f32 %v1884_v44, %v1203_v49 }
 0x156   : > { %v1257_v51 = vmax.f32 %v1232_v50, 0.0 }
 0x157   : > { %v926_v53 = vpop.f32.mrf.mxu2  ;;  %v1126_v54 = vpop.f32.mrf.mxu3 }
 0x158   : > { %v1282_v55 = vpack.c.bf16 %v1257_v51, %v1257_v51  ;;  %v1179_v56 = vmax.f32 %v926_v53, %v1126_v54  ;;  %v528_v57 = vpop.f32.mrf.mxu0  ;;  %v728_v58 = vpop.f32.mrf.mxu1 }
 0x15a   : > { %1308 = vst.msk [vmem:[%s1891_s20 + $0x5c] sm:$0xf] %vm1284_vm1, %v1282_v55  ;;  %v1204_v59 = vmax.f32 %v1154_v52, %v1179_v56 }
 0x15c   : > { %v1233_v60 = vadd.f32 %v1884_v44, %v1204_v59 }
 0x15e   : > { %v1258_v61 = vmax.f32 %v1233_v60, 0.0 }
 0x15f   : > { %v928_v62 = vpop.f32.mrf.mxu2  ;;  %v1128_v63 = vpop.f32.mrf.mxu3 }
 0x160   : > { %v1283_v0 = vpack.c.bf16 %v1258_v61, %v1258_v61 }
 0x162   : > { %1310 = vst.msk [vmem:[%s1891_s20 + $0x60] sm:$0x3] %vm1309_vm2, %v1283_v0 }
 0x163 PF: > { %s16_s21 = sadd.s32 1, %s1732_s21  }
 0x164   : > { %p13_p4 = scmp.ge.s32.totalorder %s16_s21, 4  }
 0x166   :  { %15 = sbr.rel (!%p13_p4) target bundleno = 1 (0x1), region = 83 }

// kernel: cnnnet_forward.7
= control target key start
LH: loop header
LB: loop body
LE: loop exit
PB: predicated region body
PF: predicated region fallthrough
CT: control target
= control target key end

     0   :  { %s7435_s0 = inlined_call_operand.vmem [shape: bf16[2,6272], index: 0, kind: input, shape index: {}]   ;;  %s7436_s1 = inlined_call_operand.vmem [shape: bf16[6272,128], index: 1, kind: input, shape index: {}]   ;;  %s7437_s2 = inlined_call_operand.vmem [shape: f32[1,128], index: 2, kind: input, shape index: {}]   ;;  %s7438_s3 = inlined_call_operand.vmem [shape: bf16[128,64], index: 3, kind: input, shape index: {}]   ;;  %s7439_s4 = inlined_call_operand.vmem [shape: f32[1,64], index: 4, kind: input, shape index: {}]   ;;  %s7440_s5 = inlined_call_operand.vmem [shape: bf16[64,10], index: 5, kind: input, shape index: {}]   ;;  %s7441_s6 = inlined_call_operand.vmem [shape: f32[1,10], index: 6, kind: input, shape index: {}]   ;;  %s7442_s7 = inlined_call_operand.hbm [shape: f32[2,10], index: 7, kind: output, shape index: {}]  }
   0x1   :  { %v5704_v0 = vld [vmem:[%s7436_s1 + $0x38] sm:$0xff]  ;;  %v5703_v4 = vld [vmem:[%s7436_s1 + $0x30] sm:$0xff]  ;;  %v5702_v8 = vld [vmem:[%s7436_s1 + $0x28] sm:$0xff] }
   0x2   :  { %v5720_v1 = vld [vmem:[%s7436_s1 + $0xb8] sm:$0xff]  ;;  %3287 = vmatpush.bf16.msra.mxu0 %v5704_v0  ;;  %v5719_v5 = vld [vmem:[%s7436_s1 + $0xb0] sm:$0xff]  ;;  %v5718_v9 = vld [vmem:[%s7436_s1 + $0xa8] sm:$0xff] }
   0x3   :  { %v5712_v2 = vld [vmem:[%s7436_s1 + $0x78] sm:$0xff]  ;;  %3313 = vmatpush.bf16.msra.mxu2 %v5720_v1  ;;  %v5711_v6 = vld [vmem:[%s7436_s1 + $0x70] sm:$0xff]  ;;  %v5710_v10 = vld [vmem:[%s7436_s1 + $0x68] sm:$0xff] }
   0x4   :  { %v5728_v3 = vld [vmem:[%s7436_s1 + $0xf8] sm:$0xff]  ;;  %3300 = vmatpush.bf16.msra.mxu1 %v5712_v2  ;;  %v5727_v7 = vld [vmem:[%s7436_s1 + $0xf0] sm:$0xff]  ;;  %v5726_v11 = vld [vmem:[%s7436_s1 + $0xe8] sm:$0xff] }
   0x5   :  { %3326 = vmatpush.bf16.msra.mxu3 %v5728_v3  ;;  %v5701_v12 = vld [vmem:[%s7436_s1 + $0x20] sm:$0xff]  ;;  %v5700_v16 = vld [vmem:[%s7436_s1 + $0x18] sm:$0xff]  ;;  %v5699_v21 = vld [vmem:[%s7436_s1 + $0x10] sm:$0xff] }
   0x6   :  { %3288 = vmatpush.bf16.msra.mxu0 %v5703_v4  ;;  %v5717_v13 = vld [vmem:[%s7436_s1 + $0xa0] sm:$0xff]  ;;  %v5716_v17 = vld [vmem:[%s7436_s1 + $0x98] sm:$0xff]  ;;  %v5715_v22 = vld [vmem:[%s7436_s1 + $0x90] sm:$0xff] }
   0x7   :  { %3314 = vmatpush.bf16.msra.mxu2 %v5719_v5  ;;  %v5709_v14 = vld [vmem:[%s7436_s1 + $0x60] sm:$0xff]  ;;  %v5708_v18 = vld [vmem:[%s7436_s1 + $0x58] sm:$0xff]  ;;  %v5707_v23 = vld [vmem:[%s7436_s1 + $0x50] sm:$0xff] }
   0x8   :  { %3301 = vmatpush.bf16.msra.mxu1 %v5711_v6  ;;  %v5725_v15 = vld [vmem:[%s7436_s1 + $0xe0] sm:$0xff]  ;;  %v5724_v19 = vld [vmem:[%s7436_s1 + $0xd8] sm:$0xff]  ;;  %v5723_v24 = vld [vmem:[%s7436_s1 + $0xd0] sm:$0xff] }
   0x9   :  { %3327 = vmatpush.bf16.msra.mxu3 %v5727_v7  ;;  %v28_v20 = vld [vmem:[%s7435_s0] sm:$0xff] }
   0xa   :  { %3289 = vmatpush.bf16.msra.mxu0 %v5702_v8  ;;  %824 = vst [vmem:[#allocation1] ss:$9 sm:$0xff] %v28_v20 }
   0xb   :  { %3315 = vmatpush.bf16.msra.mxu2 %v5718_v9 }
   0xc   :  { %3302 = vmatpush.bf16.msra.mxu1 %v5710_v10 }
   0xd   :  { %3328 = vmatpush.bf16.msra.mxu3 %v5726_v11 }
   0xe   :  { %3290 = vmatpush.bf16.msra.mxu0 %v5701_v12 }
   0xf   :  { %3316 = vmatpush.bf16.msra.mxu2 %v5717_v13 }
  0x10   :  { %3303 = vmatpush.bf16.msra.mxu1 %v5709_v14 }
  0x11   :  { %3329 = vmatpush.bf16.msra.mxu3 %v5725_v15 }
  0x12   :  { %3291 = vmatpush.bf16.msra.mxu0 %v5700_v16 }
  0x13   :  { %3317 = vmatpush.bf16.msra.mxu2 %v5716_v17 }
  0x14   :  { %3304 = vmatpush.bf16.msra.mxu1 %v5708_v18 }
  0x15   :  { %3330 = vmatpush.bf16.msra.mxu3 %v5724_v19 }
  0x16   :  { %12 = vsyncpa [#allocation3], 0  ;;  %3292 = vmatpush.bf16.msra.mxu0 %v5699_v21  ;;  %v5698_v25 = vld [vmem:[%s7436_s1 + $0x8] sm:$0xff]  ;;  %v5697_v29 = vld [vmem:[%s7436_s1] sm:$0xff]  ;;  %vm4045_vm0 = vcmask 523264   ;;  %s6131_s22 = smov [#allocation2]  }
  0x17   :  { %3318 = vmatpush.bf16.msra.mxu2 %v5715_v22  ;;  %v5714_v26 = vld [vmem:[%s7436_s1 + $0x88] sm:$0xff]  ;;  %v5713_v30 = vld [vmem:[%s7436_s1 + $0x80] sm:$0xff]  ;;  %v5736_v31 = vld [vmem:[%s7436_s1 + $0x138] sm:$0xff]  ;;  %s4069_s23 = sshll.u32 %s6131_s22, 4  ;;  %s4071_s25 = sshll.u32 %s7442_s7, 4  ;;  %vm4062_vm1 = vcmask 74752   ;;  %s4070_s23 = int_to_ptr.vmem [resolvable:$true] %s4069_s23  ;;  %s4072_s25 = int_to_ptr.hbm [resolvable:$true] %s4071_s25 }
  0x18   :  { %3305 = vmatpush.bf16.msra.mxu1 %v5707_v23  ;;  %v5706_v27 = vld [vmem:[%s7436_s1 + $0x48] sm:$0xff]  ;;  %v5752_v32 = vld [vmem:[%s7436_s1 + $0x1b8] sm:$0xff]  ;;  %v5705_v33 = vld [vmem:[%s7436_s1 + $0x40] sm:$0xff] }
  0x19   :  { %3331 = vmatpush.bf16.msra.mxu3 %v5723_v24  ;;  %v5722_v28 = vld [vmem:[%s7436_s1 + $0xc8] sm:$0xff]  ;;  %v5721_v34 = vld [vmem:[%s7436_s1 + $0xc0] sm:$0xff]  ;;  %v5744_v35 = vld [vmem:[%s7436_s1 + $0x178] sm:$0xff] }
  0x1a   :  { %3293 = vmatpush.bf16.msra.mxu0 %v5698_v25  ;;  %v5760_v36 = vld [vmem:[%s7436_s1 + $0x1f8] sm:$0xff]  ;;  %v5735_v37 = vld [vmem:[%s7436_s1 + $0x130] sm:$0xff]  ;;  %v825_v40 = vld [vmem:[#allocation1] sm:$0xff] }
  0x1b   :  { %3319 = vmatpush.bf16.msra.mxu2 %v5714_v26  ;;  %v5751_v38 = vld [vmem:[%s7436_s1 + $0x1b0] sm:$0xff]  ;;  %v828_v43 = vld [vmem:[#allocation1 + $0x1b] sm:$0xff]  ;;  %v5734_v45 = vld [vmem:[%s7436_s1 + $0x128] sm:$0xff] }
  0x1c   :  { %3306 = vmatpush.bf16.msra.mxu1 %v5706_v27  ;;  %v827_v39 = vld [vmem:[#allocation1 + $0x12] sm:$0xff]  ;;  %v826_v44 = vld [vmem:[#allocation1 + $0x9] sm:$0xff]  ;;  %v6305_v49 = vld [vmem:[#allocation1 + $0x3f] sm:$0xff] }
  0x1d   :  { %3332 = vmatpush.bf16.msra.mxu3 %v5722_v28  ;;  %v5743_v41 = vld [vmem:[%s7436_s1 + $0x170] sm:$0xff]  ;;  %v5750_v46 = vld [vmem:[%s7436_s1 + $0x1a8] sm:$0xff]  ;;  %v5733_v54 = vld [vmem:[%s7436_s1 + $0x120] sm:$0xff] }
  0x1e   :  { %3294 = vmatpush.bf16.msra.mxu0 %v5697_v29  ;;  %v5759_v42 = vld [vmem:[%s7436_s1 + $0x1f0] sm:$0xff]  ;;  %v6303_v48 = vld [vmem:[#allocation1 + $0x24] sm:$0xff]  ;;  %v5732_v58 = vld [vmem:[%s7436_s1 + $0x118] sm:$0xff] }
  0x1f   :  { %3320 = vmatpush.bf16.msra.mxu2 %v5713_v30  ;;  %v6301_v47 = vld [vmem:[#allocation1 + $0x36] sm:$0xff]  ;;  %v29_v50 = vld [vmem:[%s7435_s0 + $0x8] sm:$0xff]  ;;  %v5749_v55 = vld [vmem:[%s7436_s1 + $0x1a0] sm:$0xff] }
  0x20   :  { %3307 = vmatpush.bf16.msra.mxu1 %v5705_v33  ;;  %v6310_v51 = vld [vmem:[#allocation1 + $0x2d] sm:$0xff]  ;;  %v5741_v56 = vld [vmem:[%s7436_s1 + $0x160] sm:$0xff]  ;;  %v5748_v59 = vld [vmem:[%s7436_s1 + $0x198] sm:$0xff] }
  0x21   :  { %3333 = vmatpush.bf16.msra.mxu3 %v5721_v34  ;;  %3295 = vmatmul.bf16.vlgmr.msra.gmra.mxu0 %v825_v40  ;;  %v5742_v52 = vld [vmem:[%s7436_s1 + $0x168] sm:$0xff]  ;;  %834 = vst [vmem:[#allocation1] ss:$9 sm:$0xff] %v29_v50  ;;  %v5757_v57 = vld [vmem:[%s7436_s1 + $0x1e0] sm:$0xff]  ;;  %v5740_v60 = vld [vmem:[%s7436_s1 + $0x158] sm:$0xff] }
  0x22   :  { %3339 = vmatpush.bf16.msrb.mxu0 %v5736_v31  ;;  %3321 = vmatmul.bf16.vlgmr.msra.gmra.mxu2 %v827_v39  ;;  %v5758_v53 = vld [vmem:[%s7436_s1 + $0x1e8] sm:$0xff]  ;;  %v5756_v61 = vld [vmem:[%s7436_s1 + $0x1d8] sm:$0xff]  ;;  %v5731_v62 = vld [vmem:[%s7436_s1 + $0x110] sm:$0xff] }
  0x23   :  { %3365 = vmatpush.bf16.msrb.mxu2 %v5752_v32  ;;  %3308 = vmatmul.bf16.vlgmr.msra.gmra.mxu1 %v826_v44  ;;  %v5747_v63 = vld [vmem:[%s7436_s1 + $0x190] sm:$0xff]  ;;  %v5730_v2 = vld [vmem:[%s7436_s1 + $0x108] sm:$0xff]  ;;  %v5729_v6 = vld [vmem:[%s7436_s1 + $0x100] sm:$0xff] }
  0x24   :  { %3352 = vmatpush.bf16.msrb.mxu1 %v5744_v35  ;;  %3334 = vmatmul.bf16.vlgmr.msra.gmra.mxu3 %v828_v43  ;;  %v5739_v0 = vld [vmem:[%s7436_s1 + $0x150] sm:$0xff]  ;;  %v5746_v3 = vld [vmem:[%s7436_s1 + $0x188] sm:$0xff]  ;;  %v5745_v7 = vld [vmem:[%s7436_s1 + $0x180] sm:$0xff] }
  0x25   :  { %3378 = vmatpush.bf16.msrb.mxu3 %v5760_v36  ;;  %v5755_v1 = vld [vmem:[%s7436_s1 + $0x1d0] sm:$0xff]  ;;  %v5738_v4 = vld [vmem:[%s7436_s1 + $0x148] sm:$0xff]  ;;  %v5768_v8 = vld [vmem:[%s7436_s1 + $0x238] sm:$0xff] }
  0x26   :  { %3340 = vmatpush.bf16.msrb.mxu0 %v5735_v37  ;;  %v5754_v5 = vld [vmem:[%s7436_s1 + $0x1c8] sm:$0xff]  ;;  %v5784_v9 = vld [vmem:[%s7436_s1 + $0x2b8] sm:$0xff]  ;;  %v5737_v10 = vld [vmem:[%s7436_s1 + $0x140] sm:$0xff] }
  0x27   :  { %3366 = vmatpush.bf16.msrb.mxu2 %v5751_v38  ;;  %v5753_v11 = vld [vmem:[%s7436_s1 + $0x1c0] sm:$0xff]  ;;  %v5776_v12 = vld [vmem:[%s7436_s1 + $0x278] sm:$0xff]  ;;  %v5767_v14 = vld [vmem:[%s7436_s1 + $0x230] sm:$0xff] }
  0x28   :  { %3353 = vmatpush.bf16.msrb.mxu1 %v5743_v41  ;;  %v5792_v13 = vld [vmem:[%s7436_s1 + $0x2f8] sm:$0xff]  ;;  %v5783_v15 = vld [vmem:[%s7436_s1 + $0x2b0] sm:$0xff]  ;;  %v5766_v18 = vld [vmem:[%s7436_s1 + $0x228] sm:$0xff] }
  0x29   :  { %3379 = vmatpush.bf16.msrb.mxu3 %v5759_v42  ;;  %v5775_v16 = vld [vmem:[%s7436_s1 + $0x270] sm:$0xff]  ;;  %v5782_v19 = vld [vmem:[%s7436_s1 + $0x2a8] sm:$0xff]  ;;  %v5765_v22 = vld [vmem:[%s7436_s1 + $0x220] sm:$0xff] }
  0x2a   :  { %3341 = vmatpush.bf16.msrb.mxu0 %v5734_v45  ;;  %v5791_v17 = vld [vmem:[%s7436_s1 + $0x2f0] sm:$0xff]  ;;  %v5774_v20 = vld [vmem:[%s7436_s1 + $0x268] sm:$0xff]  ;;  %v5781_v23 = vld [vmem:[%s7436_s1 + $0x2a0] sm:$0xff] }
  0x2b   :  { %3367 = vmatpush.bf16.msrb.mxu2 %v5750_v46  ;;  %v5790_v21 = vld [vmem:[%s7436_s1 + $0x2e8] sm:$0xff]  ;;  %v5773_v24 = vld [vmem:[%s7436_s1 + $0x260] sm:$0xff]  ;;  %v5764_v26 = vld [vmem:[%s7436_s1 + $0x218] sm:$0xff] }
  0x2c   :  { %3354 = vmatpush.bf16.msrb.mxu1 %v5742_v52  ;;  %v5789_v25 = vld [vmem:[%s7436_s1 + $0x2e0] sm:$0xff]  ;;  %v5780_v27 = vld [vmem:[%s7436_s1 + $0x298] sm:$0xff]  ;;  %v5763_v30 = vld [vmem:[%s7436_s1 + $0x210] sm:$0xff] }
  0x2d   :  { %3380 = vmatpush.bf16.msrb.mxu3 %v5758_v53  ;;  %v5772_v28 = vld [vmem:[%s7436_s1 + $0x258] sm:$0xff]  ;;  %v5779_v31 = vld [vmem:[%s7436_s1 + $0x290] sm:$0xff]  ;;  %v5762_v34 = vld [vmem:[%s7436_s1 + $0x208] sm:$0xff] }
  0x2e   :  { %3342 = vmatpush.bf16.msrb.mxu0 %v5733_v54  ;;  %v5788_v29 = vld [vmem:[%s7436_s1 + $0x2d8] sm:$0xff]  ;;  %v5771_v32 = vld [vmem:[%s7436_s1 + $0x250] sm:$0xff]  ;;  %v5778_v35 = vld [vmem:[%s7436_s1 + $0x288] sm:$0xff] }
  0x2f   :  { %3368 = vmatpush.bf16.msrb.mxu2 %v5749_v55  ;;  %v5787_v33 = vld [vmem:[%s7436_s1 + $0x2d0] sm:$0xff]  ;;  %v5770_v36 = vld [vmem:[%s7436_s1 + $0x248] sm:$0xff]  ;;  %v5761_v38 = vld [vmem:[%s7436_s1 + $0x200] sm:$0xff] }
  0x30   :  { %3355 = vmatpush.bf16.msrb.mxu1 %v5741_v56  ;;  %v5786_v37 = vld [vmem:[%s7436_s1 + $0x2c8] sm:$0xff]  ;;  %v5777_v39 = vld [vmem:[%s7436_s1 + $0x280] sm:$0xff]  ;;  %v5800_v40 = vld [vmem:[%s7436_s1 + $0x338] sm:$0xff] }
  0x31   :  { %3381 = vmatpush.bf16.msrb.mxu3 %v5757_v57  ;;  %v5816_v41 = vld [vmem:[%s7436_s1 + $0x3b8] sm:$0xff]  ;;  %v5769_v42 = vld [vmem:[%s7436_s1 + $0x240] sm:$0xff]  ;;  %v5799_v50 = vld [vmem:[%s7436_s1 + $0x330] sm:$0xff] }
  0x32   :  { %3343 = vmatpush.bf16.msrb.mxu0 %v5732_v58  ;;  %v5785_v43 = vld [vmem:[%s7436_s1 + $0x2c0] sm:$0xff]  ;;  %v5808_v44 = vld [vmem:[%s7436_s1 + $0x378] sm:$0xff]  ;;  %v5807_v52 = vld [vmem:[%s7436_s1 + $0x370] sm:$0xff] }
  0x33   :  { %3369 = vmatpush.bf16.msrb.mxu2 %v5748_v59  ;;  %v835_v45 = vld [vmem:[#allocation1] sm:$0xff]  ;;  %v837_v46 = vld [vmem:[#allocation1 + $0x12] sm:$0xff]  ;;  %v5798_v54 = vld [vmem:[%s7436_s1 + $0x328] sm:$0xff] }
  0x34   :  { %3356 = vmatpush.bf16.msrb.mxu1 %v5740_v60  ;;  %v5823_v53 = vld [vmem:[%s7436_s1 + $0x3f0] sm:$0xff]  ;;  %v5814_v55 = vld [vmem:[%s7436_s1 + $0x3a8] sm:$0xff]  ;;  %v5797_v58 = vld [vmem:[%s7436_s1 + $0x320] sm:$0xff] }
  0x35   :  { %3382 = vmatpush.bf16.msrb.mxu3 %v5756_v61  ;;  %v5806_v56 = vld [vmem:[%s7436_s1 + $0x368] sm:$0xff]  ;;  %v5813_v59 = vld [vmem:[%s7436_s1 + $0x3a0] sm:$0xff] }
  0x36   :  { %3344 = vmatpush.bf16.msrb.mxu0 %v5731_v62  ;;  %v5822_v57 = vld [vmem:[%s7436_s1 + $0x3e8] sm:$0xff]  ;;  %v5805_v60 = vld [vmem:[%s7436_s1 + $0x360] sm:$0xff]  ;;  %v5796_v62 = vld [vmem:[%s7436_s1 + $0x318] sm:$0xff] }
  0x37   :  { %3370 = vmatpush.bf16.msrb.mxu2 %v5747_v63  ;;  %v5821_v61 = vld [vmem:[%s7436_s1 + $0x3e0] sm:$0xff]  ;;  %v5812_v63 = vld [vmem:[%s7436_s1 + $0x398] sm:$0xff] }
  0x38   :  { %3357 = vmatpush.bf16.msrb.mxu1 %v5739_v0  ;;  %v5804_v0 = vld [vmem:[%s7436_s1 + $0x358] sm:$0xff] }
  0x39   :  { %3383 = vmatpush.bf16.msrb.mxu3 %v5755_v1  ;;  %v5820_v1 = vld [vmem:[%s7436_s1 + $0x3d8] sm:$0xff] }
  0x3a   :  { %3345 = vmatpush.bf16.msrb.mxu0 %v5730_v2  ;;  %v5795_v2 = vld [vmem:[%s7436_s1 + $0x310] sm:$0xff] }
  0x3b   :  { %3371 = vmatpush.bf16.msrb.mxu2 %v5746_v3  ;;  %v5811_v3 = vld [vmem:[%s7436_s1 + $0x390] sm:$0xff] }
  0x3c   :  { %3358 = vmatpush.bf16.msrb.mxu1 %v5738_v4  ;;  %v5803_v4 = vld [vmem:[%s7436_s1 + $0x350] sm:$0xff] }
  0x3d   :  { %3384 = vmatpush.bf16.msrb.mxu3 %v5754_v5  ;;  %v5819_v5 = vld [vmem:[%s7436_s1 + $0x3d0] sm:$0xff] }
  0x3e   :  { %3346 = vmatpush.bf16.msrb.mxu0 %v5729_v6  ;;  %v5794_v6 = vld [vmem:[%s7436_s1 + $0x308] sm:$0xff] }
  0x3f   :  { %3372 = vmatpush.bf16.msrb.mxu2 %v5745_v7  ;;  %v5810_v7 = vld [vmem:[%s7436_s1 + $0x388] sm:$0xff] }
  0x40   :  { %3359 = vmatpush.bf16.msrb.mxu1 %v5737_v10  ;;  %v840_v10 = vld [vmem:[#allocation1 + $0x2d] sm:$0xff] }
  0x41   :  { %3385 = vmatpush.bf16.msrb.mxu3 %v5753_v11  ;;  %3347 = vmatmul.bf16.vlgmr.msrb.gmra.mxu0 %v6303_v48  ;;  %v836_v48 = vld [vmem:[#allocation1 + $0x9] sm:$0xff]  ;;  %v842_v11 = vld [vmem:[#allocation1 + $0x3f] sm:$0xff] }
  0x42   :  { %3391 = vmatpush.bf16.msra.mxu0 %v5768_v8  ;;  %3373 = vmatmul.bf16.vlgmr.msrb.gmra.mxu2 %v6301_v47  ;;  %v5824_v47 = vld [vmem:[%s7436_s1 + $0x3f8] sm:$0xff]  ;;  %v839_v8 = vld [vmem:[#allocation1 + $0x24] sm:$0xff] }
  0x43   :  { %3417 = vmatpush.bf16.msra.mxu2 %v5784_v9  ;;  %3360 = vmatmul.bf16.vlgmr.msrb.gmra.mxu1 %v6310_v51  ;;  %v5815_v51 = vld [vmem:[%s7436_s1 + $0x3b0] sm:$0xff] }
  0x44   :  { %3404 = vmatpush.bf16.msra.mxu1 %v5776_v12  ;;  %3386 = vmatmul.bf16.vlgmr.msrb.gmra.mxu3 %v6305_v49  ;;  %v838_v49 = vld [vmem:[#allocation1 + $0x1b] sm:$0xff]  ;;  %v30_v12 = vld [vmem:[%s7435_s0 + $0x10] sm:$0xff] }
  0x45   :  { %3430 = vmatpush.bf16.msra.mxu3 %v5792_v13  ;;  %v841_v9 = vld [vmem:[#allocation1 + $0x36] sm:$0xff]  ;;  %v5802_v13 = vld [vmem:[%s7436_s1 + $0x348] sm:$0xff] }
  0x46   :  { %3392 = vmatpush.bf16.msra.mxu0 %v5767_v14  ;;  %844 = vst [vmem:[#allocation1] ss:$9 sm:$0xff] %v30_v12  ;;  %v5818_v14 = vld [vmem:[%s7436_s1 + $0x3c8] sm:$0xff]  ;;  %v5876_v12 = vld [vmem:[%s7436_s1 + $0x598] sm:$0xff] }
  0x47   :  { %3418 = vmatpush.bf16.msra.mxu2 %v5783_v15  ;;  %v5793_v15 = vld [vmem:[%s7436_s1 + $0x300] sm:$0xff] }
  0x48   :  { %3405 = vmatpush.bf16.msra.mxu1 %v5775_v16  ;;  %v5809_v16 = vld [vmem:[%s7436_s1 + $0x380] sm:$0xff] }
  0x49   :  { %3431 = vmatpush.bf16.msra.mxu3 %v5791_v17  ;;  %v5832_v17 = vld [vmem:[%s7436_s1 + $0x438] sm:$0xff] }
  0x4a   :  { %3393 = vmatpush.bf16.msra.mxu0 %v5766_v18  ;;  %v5848_v18 = vld [vmem:[%s7436_s1 + $0x4b8] sm:$0xff] }
  0x4b   :  { %3419 = vmatpush.bf16.msra.mxu2 %v5782_v19  ;;  %v5801_v19 = vld [vmem:[%s7436_s1 + $0x340] sm:$0xff] }
  0x4c   :  { %3406 = vmatpush.bf16.msra.mxu1 %v5774_v20  ;;  %v5817_v20 = vld [vmem:[%s7436_s1 + $0x3c0] sm:$0xff] }
  0x4d   :  { %3432 = vmatpush.bf16.msra.mxu3 %v5790_v21  ;;  %v5840_v21 = vld [vmem:[%s7436_s1 + $0x478] sm:$0xff] }
  0x4e   :  { %3394 = vmatpush.bf16.msra.mxu0 %v5765_v22  ;;  %v5856_v22 = vld [vmem:[%s7436_s1 + $0x4f8] sm:$0xff] }
  0x4f   :  { %3420 = vmatpush.bf16.msra.mxu2 %v5781_v23  ;;  %v5831_v23 = vld [vmem:[%s7436_s1 + $0x430] sm:$0xff] }
  0x50   :  { %3407 = vmatpush.bf16.msra.mxu1 %v5773_v24  ;;  %v5847_v24 = vld [vmem:[%s7436_s1 + $0x4b0] sm:$0xff] }
  0x51   :  { %3433 = vmatpush.bf16.msra.mxu3 %v5789_v25  ;;  %v5839_v25 = vld [vmem:[%s7436_s1 + $0x470] sm:$0xff] }
  0x52   :  { %3395 = vmatpush.bf16.msra.mxu0 %v5764_v26  ;;  %v5855_v26 = vld [vmem:[%s7436_s1 + $0x4f0] sm:$0xff] }
  0x53   :  { %3421 = vmatpush.bf16.msra.mxu2 %v5780_v27  ;;  %v5830_v27 = vld [vmem:[%s7436_s1 + $0x428] sm:$0xff] }
  0x54   :  { %3408 = vmatpush.bf16.msra.mxu1 %v5772_v28  ;;  %v5846_v28 = vld [vmem:[%s7436_s1 + $0x4a8] sm:$0xff] }
  0x55   :  { %3434 = vmatpush.bf16.msra.mxu3 %v5788_v29  ;;  %v5838_v29 = vld [vmem:[%s7436_s1 + $0x468] sm:$0xff] }
  0x56   :  { %3396 = vmatpush.bf16.msra.mxu0 %v5763_v30  ;;  %v5854_v30 = vld [vmem:[%s7436_s1 + $0x4e8] sm:$0xff] }
  0x57   :  { %3422 = vmatpush.bf16.msra.mxu2 %v5779_v31  ;;  %v5829_v31 = vld [vmem:[%s7436_s1 + $0x420] sm:$0xff] }
  0x58   :  { %3409 = vmatpush.bf16.msra.mxu1 %v5771_v32  ;;  %v5845_v32 = vld [vmem:[%s7436_s1 + $0x4a0] sm:$0xff] }
  0x59   :  { %3435 = vmatpush.bf16.msra.mxu3 %v5787_v33  ;;  %v5837_v33 = vld [vmem:[%s7436_s1 + $0x460] sm:$0xff] }
  0x5a   :  { %3397 = vmatpush.bf16.msra.mxu0 %v5762_v34  ;;  %v5853_v34 = vld [vmem:[%s7436_s1 + $0x4e0] sm:$0xff] }
  0x5b   :  { %3423 = vmatpush.bf16.msra.mxu2 %v5778_v35  ;;  %v5828_v35 = vld [vmem:[%s7436_s1 + $0x418] sm:$0xff] }
  0x5c   :  { %3410 = vmatpush.bf16.msra.mxu1 %v5770_v36  ;;  %v5844_v36 = vld [vmem:[%s7436_s1 + $0x498] sm:$0xff] }
  0x5d   :  { %3436 = vmatpush.bf16.msra.mxu3 %v5786_v37  ;;  %v5836_v37 = vld [vmem:[%s7436_s1 + $0x458] sm:$0xff] }
  0x5e   :  { %3398 = vmatpush.bf16.msra.mxu0 %v5761_v38  ;;  %v5852_v38 = vld [vmem:[%s7436_s1 + $0x4d8] sm:$0xff] }
  0x5f   :  { %3424 = vmatpush.bf16.msra.mxu2 %v5777_v39  ;;  %v5827_v39 = vld [vmem:[%s7436_s1 + $0x410] sm:$0xff] }
  0x60   :  { %3411 = vmatpush.bf16.msra.mxu1 %v5769_v42  ;;  %v5851_v42 = vld [vmem:[%s7436_s1 + $0x4d0] sm:$0xff] }
  0x61   :  { %3437 = vmatpush.bf16.msra.mxu3 %v5785_v43  ;;  %3399 = vmatmul.bf16.vlgmr.msra.gmra.mxu0 %v835_v45  ;;  %v5826_v43 = vld [vmem:[%s7436_s1 + $0x408] sm:$0xff] }
  0x62   :  { %3443 = vmatpush.bf16.msrb.mxu0 %v5800_v40  ;;  %3425 = vmatmul.bf16.vlgmr.msra.gmra.mxu2 %v837_v46  ;;  %v5843_v40 = vld [vmem:[%s7436_s1 + $0x490] sm:$0xff]  ;;  %v5834_v45 = vld [vmem:[%s7436_s1 + $0x448] sm:$0xff] }
  0x63   :  { %3469 = vmatpush.bf16.msrb.mxu2 %v5816_v41  ;;  %3412 = vmatmul.bf16.vlgmr.msra.gmra.mxu1 %v836_v48  ;;  %v5835_v41 = vld [vmem:[%s7436_s1 + $0x450] sm:$0xff]  ;;  %v5850_v46 = vld [vmem:[%s7436_s1 + $0x4c8] sm:$0xff]  ;;  %v5841_v48 = vld [vmem:[%s7436_s1 + $0x480] sm:$0xff] }
  0x64   :  { %3456 = vmatpush.bf16.msrb.mxu1 %v5808_v44  ;;  %3438 = vmatmul.bf16.vlgmr.msra.gmra.mxu3 %v838_v49  ;;  %v5842_v44 = vld [vmem:[%s7436_s1 + $0x488] sm:$0xff]  ;;  %v5864_v49 = vld [vmem:[%s7436_s1 + $0x538] sm:$0xff] }
  0x65   :  { %3482 = vmatpush.bf16.msrb.mxu3 %v5824_v47  ;;  %v5825_v47 = vld [vmem:[%s7436_s1 + $0x400] sm:$0xff] }
  0x66   :  { %3444 = vmatpush.bf16.msrb.mxu0 %v5799_v50  ;;  %v5880_v50 = vld [vmem:[%s7436_s1 + $0x5b8] sm:$0xff] }
  0x67   :  { %3470 = vmatpush.bf16.msrb.mxu2 %v5815_v51  ;;  %v5833_v51 = vld [vmem:[%s7436_s1 + $0x440] sm:$0xff] }
  0x68   :  { %3457 = vmatpush.bf16.msrb.mxu1 %v5807_v52  ;;  %v5849_v52 = vld [vmem:[%s7436_s1 + $0x4c0] sm:$0xff] }
  0x69   :  { %3483 = vmatpush.bf16.msrb.mxu3 %v5823_v53  ;;  %v5872_v53 = vld [vmem:[%s7436_s1 + $0x578] sm:$0xff] }
  0x6a   :  { %3445 = vmatpush.bf16.msrb.mxu0 %v5798_v54  ;;  %v845_v54 = vld [vmem:[#allocation1] sm:$0xff] }
  0x6b   :  { %3471 = vmatpush.bf16.msrb.mxu2 %v5814_v55  ;;  %v847_v55 = vld [vmem:[#allocation1 + $0x12] sm:$0xff] }
  0x6c   :  { %3458 = vmatpush.bf16.msrb.mxu1 %v5806_v56  ;;  %v5888_v56 = vld [vmem:[%s7436_s1 + $0x5f8] sm:$0xff] }
  0x6d   :  { %3484 = vmatpush.bf16.msrb.mxu3 %v5822_v57  ;;  %v846_v57 = vld [vmem:[#allocation1 + $0x9] sm:$0xff] }
  0x6e   :  { %3446 = vmatpush.bf16.msrb.mxu0 %v5797_v58  ;;  %v848_v58 = vld [vmem:[#allocation1 + $0x1b] sm:$0xff] }
  0x6f   :  { %3472 = vmatpush.bf16.msrb.mxu2 %v5813_v59  ;;  %v5863_v59 = vld [vmem:[%s7436_s1 + $0x530] sm:$0xff] }
  0x70   :  { %3459 = vmatpush.bf16.msrb.mxu1 %v5805_v60  ;;  %v5879_v60 = vld [vmem:[%s7436_s1 + $0x5b0] sm:$0xff] }
  0x71   :  { %3485 = vmatpush.bf16.msrb.mxu3 %v5821_v61  ;;  %v5871_v61 = vld [vmem:[%s7436_s1 + $0x570] sm:$0xff] }
  0x72   :  { %3447 = vmatpush.bf16.msrb.mxu0 %v5796_v62  ;;  %v5887_v62 = vld [vmem:[%s7436_s1 + $0x5f0] sm:$0xff] }
  0x73   :  { %3473 = vmatpush.bf16.msrb.mxu2 %v5812_v63  ;;  %v5862_v63 = vld [vmem:[%s7436_s1 + $0x528] sm:$0xff] }
  0x74   :  { %3460 = vmatpush.bf16.msrb.mxu1 %v5804_v0  ;;  %v5878_v0 = vld [vmem:[%s7436_s1 + $0x5a8] sm:$0xff] }
  0x75   :  { %3486 = vmatpush.bf16.msrb.mxu3 %v5820_v1  ;;  %v5870_v1 = vld [vmem:[%s7436_s1 + $0x568] sm:$0xff] }
  0x76   :  { %3448 = vmatpush.bf16.msrb.mxu0 %v5795_v2  ;;  %v5886_v2 = vld [vmem:[%s7436_s1 + $0x5e8] sm:$0xff] }
  0x77   :  { %3474 = vmatpush.bf16.msrb.mxu2 %v5811_v3  ;;  %v6102_v3 = vld [vmem:[%s7437_s2] ss:$0 sm:$0xff] }
  0x78   :  { %3461 = vmatpush.bf16.msrb.mxu1 %v5803_v4  ;;  %v5861_v4 = vld [vmem:[%s7436_s1 + $0x520] sm:$0xff] }
  0x79   :  { %3487 = vmatpush.bf16.msrb.mxu3 %v5819_v5  ;;  %v5877_v5 = vld [vmem:[%s7436_s1 + $0x5a0] sm:$0xff] }
  0x7a   :  { %3449 = vmatpush.bf16.msrb.mxu0 %v5794_v6 }
  0x7b   :  { %3475 = vmatpush.bf16.msrb.mxu2 %v5810_v7  ;;  %v5869_v7 = vld [vmem:[%s7436_s1 + $0x560] sm:$0xff] }
  0x7c   :  { %3462 = vmatpush.bf16.msrb.mxu1 %v5802_v13 }
  0x7d   :  { %3488 = vmatpush.bf16.msrb.mxu3 %v5818_v14  ;;  %v5868_v14 = vld [vmem:[%s7436_s1 + $0x558] sm:$0xff] }
  0x7e   :  { %3450 = vmatpush.bf16.msrb.mxu0 %v5793_v15  ;;  %v5884_v15 = vld [vmem:[%s7436_s1 + $0x5d8] sm:$0xff] }
  0x7f   :  { %3476 = vmatpush.bf16.msrb.mxu2 %v5809_v16 }
  0x80   :  { %3463 = vmatpush.bf16.msrb.mxu1 %v5801_v19 }
  0x81   :  { %3489 = vmatpush.bf16.msrb.mxu3 %v5817_v20  ;;  %3451 = vmatmul.bf16.vlgmr.msrb.gmra.mxu0 %v839_v8  ;;  %v5885_v8 = vld [vmem:[%s7436_s1 + $0x5e0] sm:$0xff] }
  0x82   :  { %3495 = vmatpush.bf16.msra.mxu0 %v5832_v17  ;;  %3477 = vmatmul.bf16.vlgmr.msrb.gmra.mxu2 %v841_v9  ;;  %v5859_v17 = vld [vmem:[%s7436_s1 + $0x510] sm:$0xff] }
  0x83   :  { %3521 = vmatpush.bf16.msra.mxu2 %v5848_v18  ;;  %3464 = vmatmul.bf16.vlgmr.msrb.gmra.mxu1 %v840_v10  ;;  %v5875_v18 = vld [vmem:[%s7436_s1 + $0x590] sm:$0xff] }
  0x84   :  { %3508 = vmatpush.bf16.msra.mxu1 %v5840_v21  ;;  %3490 = vmatmul.bf16.vlgmr.msrb.gmra.mxu3 %v842_v11  ;;  %v5860_v11 = vld [vmem:[%s7436_s1 + $0x518] sm:$0xff] }
  0x85   :  { %3534 = vmatpush.bf16.msra.mxu3 %v5856_v22  ;;  %v5867_v22 = vld [vmem:[%s7436_s1 + $0x550] sm:$0xff] }
  0x86   :  { %3496 = vmatpush.bf16.msra.mxu0 %v5831_v23  ;;  %v5883_v23 = vld [vmem:[%s7436_s1 + $0x5d0] sm:$0xff] }
  0x87   :  { %3522 = vmatpush.bf16.msra.mxu2 %v5847_v24  ;;  %v5858_v24 = vld [vmem:[%s7436_s1 + $0x508] sm:$0xff] }
  0x88   :  { %3509 = vmatpush.bf16.msra.mxu1 %v5839_v25 }
  0x89   :  { %3535 = vmatpush.bf16.msra.mxu3 %v5855_v26  ;;  %v5874_v26 = vld [vmem:[%s7436_s1 + $0x588] sm:$0xff] }
  0x8a   :  { %3497 = vmatpush.bf16.msra.mxu0 %v5830_v27  ;;  %v849_v27 = vld [vmem:[#allocation1 + $0x24] sm:$0xff] }
  0x8b   :  { %3523 = vmatpush.bf16.msra.mxu2 %v5846_v28  ;;  %v851_v28 = vld [vmem:[#allocation1 + $0x36] sm:$0xff] }
  0x8c   :  { %3510 = vmatpush.bf16.msra.mxu1 %v5838_v29 }
  0x8d   :  { %3536 = vmatpush.bf16.msra.mxu3 %v5854_v30  ;;  %v850_v30 = vld [vmem:[#allocation1 + $0x2d] sm:$0xff] }
  0x8e   :  { %3498 = vmatpush.bf16.msra.mxu0 %v5829_v31  ;;  %v852_v31 = vld [vmem:[#allocation1 + $0x3f] sm:$0xff] }
  0x8f   :  { %3524 = vmatpush.bf16.msra.mxu2 %v5845_v32  ;;  %v31_v32 = vld [vmem:[%s7435_s0 + $0x18] sm:$0xff] }
  0x90   :  { %3511 = vmatpush.bf16.msra.mxu1 %v5837_v33  ;;  %854 = vst [vmem:[#allocation1] ss:$9 sm:$0xff] %v31_v32  ;;  %v5866_v33 = vld [vmem:[%s7436_s1 + $0x548] sm:$0xff]  ;;  %v5951_v32 = vld [vmem:[%s7436_s1 + $0x7f0] sm:$0xff] }
  0x91   :  { %3537 = vmatpush.bf16.msra.mxu3 %v5853_v34  ;;  %v5882_v34 = vld [vmem:[%s7436_s1 + $0x5c8] sm:$0xff] }
  0x92   :  { %3499 = vmatpush.bf16.msra.mxu0 %v5828_v35 }
  0x93   :  { %3525 = vmatpush.bf16.msra.mxu2 %v5844_v36  ;;  %v5857_v36 = vld [vmem:[%s7436_s1 + $0x500] sm:$0xff] }
  0x94   :  { %3512 = vmatpush.bf16.msra.mxu1 %v5836_v37  ;;  %v5873_v37 = vld [vmem:[%s7436_s1 + $0x580] sm:$0xff] }
  0x95   :  { %3538 = vmatpush.bf16.msra.mxu3 %v5852_v38  ;;  %v5896_v38 = vld [vmem:[%s7436_s1 + $0x638] sm:$0xff] }
  0x96   :  { %3500 = vmatpush.bf16.msra.mxu0 %v5827_v39  ;;  %v5912_v39 = vld [vmem:[%s7436_s1 + $0x6b8] sm:$0xff] }
  0x97   :  { %3526 = vmatpush.bf16.msra.mxu2 %v5843_v40 }
  0x98   :  { %3513 = vmatpush.bf16.msra.mxu1 %v5835_v41  ;;  %v5865_v41 = vld [vmem:[%s7436_s1 + $0x540] sm:$0xff] }
  0x99   :  { %3539 = vmatpush.bf16.msra.mxu3 %v5851_v42  ;;  %v5881_v42 = vld [vmem:[%s7436_s1 + $0x5c0] sm:$0xff] }
  0x9a   :  { %3501 = vmatpush.bf16.msra.mxu0 %v5826_v43  ;;  %v5904_v43 = vld [vmem:[%s7436_s1 + $0x678] sm:$0xff] }
  0x9b   :  { %3527 = vmatpush.bf16.msra.mxu2 %v5842_v44  ;;  %v5920_v44 = vld [vmem:[%s7436_s1 + $0x6f8] sm:$0xff] }
  0x9c   :  { %3514 = vmatpush.bf16.msra.mxu1 %v5834_v45  ;;  %v5895_v45 = vld [vmem:[%s7436_s1 + $0x630] sm:$0xff] }
  0x9d   :  { %3540 = vmatpush.bf16.msra.mxu3 %v5850_v46  ;;  %v5911_v46 = vld [vmem:[%s7436_s1 + $0x6b0] sm:$0xff] }
  0x9e   :  { %3502 = vmatpush.bf16.msra.mxu0 %v5825_v47  ;;  %v3296_v6 = vpop.f32.mrf.mxu0  ;;  %v5903_v47 = vld [vmem:[%s7436_s1 + $0x670] sm:$0xff] }
  0x9f   :  { %3528 = vmatpush.bf16.msra.mxu2 %v5841_v48  ;;  %v3297_v9 = vadd.f32 %v6102_v3, %v3296_v6  ;;  %v5919_v48 = vld [vmem:[%s7436_s1 + $0x6f0] sm:$0xff] }
  0xa0   :  { %3515 = vmatpush.bf16.msra.mxu1 %v5833_v51  ;;  %v3309_v10 = vpop.f32.mrf.mxu1  ;;  %v5902_v51 = vld [vmem:[%s7436_s1 + $0x668] sm:$0xff]  ;;  %v5891_v3 = vld [vmem:[%s7436_s1 + $0x610] sm:$0xff] }
  0xa1   :  { %3541 = vmatpush.bf16.msra.mxu3 %v5849_v52  ;;  %3503 = vmatmul.bf16.vlgmr.msra.gmra.mxu0 %v845_v54  ;;  %v3310_v13 = vadd.f32 %v3309_v10, %v3297_v9  ;;  %v5918_v52 = vld [vmem:[%s7436_s1 + $0x6e8] sm:$0xff]  ;;  %v5909_v54 = vld [vmem:[%s7436_s1 + $0x6a0] sm:$0xff]  ;;  %v5915_v9 = vld [vmem:[%s7436_s1 + $0x6d0] sm:$0xff] }
  0xa2   :  { %3547 = vmatpush.bf16.msrb.mxu0 %v5864_v49  ;;  %3529 = vmatmul.bf16.vlgmr.msra.gmra.mxu2 %v847_v55  ;;  %v5894_v49 = vld [vmem:[%s7436_s1 + $0x628] sm:$0xff] }
  0xa3   :  { %3573 = vmatpush.bf16.msrb.mxu2 %v5880_v50  ;;  %3516 = vmatmul.bf16.vlgmr.msra.gmra.mxu1 %v846_v57  ;;  %v5910_v50 = vld [vmem:[%s7436_s1 + $0x6a8] sm:$0xff]  ;;  %v5901_v57 = vld [vmem:[%s7436_s1 + $0x660] sm:$0xff] }
  0xa4   :  { %3560 = vmatpush.bf16.msrb.mxu1 %v5872_v53  ;;  %3542 = vmatmul.bf16.vlgmr.msra.gmra.mxu3 %v848_v58  ;;  %v5893_v53 = vld [vmem:[%s7436_s1 + $0x620] sm:$0xff] }
  0xa5   :  { %3586 = vmatpush.bf16.msrb.mxu3 %v5888_v56  ;;  %v3322_v16 = vpop.f32.mrf.mxu2  ;;  %v5917_v58 = vld [vmem:[%s7436_s1 + $0x6e0] sm:$0xff] }
  0xa6   :  { %3548 = vmatpush.bf16.msrb.mxu0 %v5863_v59  ;;  %v3323_v19 = vadd.f32 %v3322_v16, %v3310_v13  ;;  %v3298_v21 = vpop.f32.mrf.mxu0  ;;  %v5898_v13 = vld [vmem:[%s7436_s1 + $0x648] sm:$0xff]  ;;  %v5889_v16 = vld [vmem:[%s7436_s1 + $0x600] sm:$0xff] }
  0xa7   :  { %3574 = vmatpush.bf16.msrb.mxu2 %v5879_v60  ;;  %v3335_v20 = vpop.f32.mrf.mxu3  ;;  %v5897_v21 = vld [vmem:[%s7436_s1 + $0x640] sm:$0xff] }
  0xa8   :  { %3561 = vmatpush.bf16.msrb.mxu1 %v5871_v61  ;;  %v3336_v25 = vadd.f32 %v3335_v20, %v3323_v19  ;;  %v3311_v29 = vpop.f32.mrf.mxu1  ;;  %v5892_v61 = vld [vmem:[%s7436_s1 + $0x618] sm:$0xff] }
  0xa9   :  { %3587 = vmatpush.bf16.msrb.mxu3 %v5887_v62  ;;  %v5908_v62 = vld [vmem:[%s7436_s1 + $0x698] sm:$0xff]  ;;  %v5927_v29 = vld [vmem:[%s7436_s1 + $0x730] sm:$0xff] }
  0xaa   :  { %3549 = vmatpush.bf16.msrb.mxu0 %v5862_v63  ;;  %v5900_v63 = vld [vmem:[%s7436_s1 + $0x658] sm:$0xff] }
  0xab   :  { %3575 = vmatpush.bf16.msrb.mxu2 %v5878_v0  ;;  %v5916_v0 = vld [vmem:[%s7436_s1 + $0x6d8] sm:$0xff] }
  0xac   :  { %3562 = vmatpush.bf16.msrb.mxu1 %v5870_v1  ;;  %v5928_v19 = vld [vmem:[%s7436_s1 + $0x738] sm:$0xff] }
  0xad   :  { %3588 = vmatpush.bf16.msrb.mxu3 %v5886_v2  ;;  %v3324_v35 = vpop.f32.mrf.mxu2  ;;  %v5944_v20 = vld [vmem:[%s7436_s1 + $0x7b8] sm:$0xff] }
  0xae   :  { %3550 = vmatpush.bf16.msrb.mxu0 %v5861_v4  ;;  %v5907_v4 = vld [vmem:[%s7436_s1 + $0x690] sm:$0xff]  ;;  %v5934_v35 = vld [vmem:[%s7436_s1 + $0x768] sm:$0xff] }
  0xaf   :  { %3576 = vmatpush.bf16.msrb.mxu2 %v5877_v5  ;;  %v3337_v40 = vpop.f32.mrf.mxu3 }
  0xb0   :  { %3563 = vmatpush.bf16.msrb.mxu1 %v5869_v7  ;;  %v5941_v40 = vld [vmem:[%s7436_s1 + $0x7a0] sm:$0xff] }
  0xb1   :  { %3589 = vmatpush.bf16.msrb.mxu3 %v5885_v8  ;;  %v5899_v8 = vld [vmem:[%s7436_s1 + $0x650] sm:$0xff] }
  0xb2   :  { %3551 = vmatpush.bf16.msrb.mxu0 %v5860_v11  ;;  %v5890_v11 = vld [vmem:[%s7436_s1 + $0x608] sm:$0xff] }
  0xb3   :  { %3577 = vmatpush.bf16.msrb.mxu2 %v5876_v12  ;;  %v5906_v12 = vld [vmem:[%s7436_s1 + $0x688] sm:$0xff] }
  0xb4   :  { %3564 = vmatpush.bf16.msrb.mxu1 %v5868_v14  ;;  %v5914_v14 = vld [vmem:[%s7436_s1 + $0x6c8] sm:$0xff] }
  0xb5   :  { %3590 = vmatpush.bf16.msrb.mxu3 %v5884_v15 }
  0xb6   :  { %3552 = vmatpush.bf16.msrb.mxu0 %v5859_v17  ;;  %v5905_v17 = vld [vmem:[%s7436_s1 + $0x680] sm:$0xff] }
  0xb7   :  { %3578 = vmatpush.bf16.msrb.mxu2 %v5875_v18 }
  0xb8   :  { %3565 = vmatpush.bf16.msrb.mxu1 %v5867_v22  ;;  %v5913_v22 = vld [vmem:[%s7436_s1 + $0x6c0] sm:$0xff] }
  0xb9   :  { %3591 = vmatpush.bf16.msrb.mxu3 %v5883_v23  ;;  %v5936_v23 = vld [vmem:[%s7436_s1 + $0x778] sm:$0xff] }
  0xba   :  { %3553 = vmatpush.bf16.msrb.mxu0 %v5858_v24  ;;  %v855_v24 = vld [vmem:[#allocation1] sm:$0xff] }
  0xbb   :  { %3579 = vmatpush.bf16.msrb.mxu2 %v5874_v26  ;;  %v5952_v26 = vld [vmem:[%s7436_s1 + $0x7f8] sm:$0xff] }
  0xbc   :  { %3566 = vmatpush.bf16.msrb.mxu1 %v5866_v33  ;;  %v5926_v33 = vld [vmem:[%s7436_s1 + $0x728] sm:$0xff] }
  0xbd   :  { %3592 = vmatpush.bf16.msrb.mxu3 %v5882_v34  ;;  %v5942_v34 = vld [vmem:[%s7436_s1 + $0x7a8] sm:$0xff] }
  0xbe   :  { %3554 = vmatpush.bf16.msrb.mxu0 %v5857_v36  ;;  %v3348_v55 = vpop.f32.mrf.mxu0  ;;  %v5950_v36 = vld [vmem:[%s7436_s1 + $0x7e8] sm:$0xff] }
  0xbf   :  { %3580 = vmatpush.bf16.msrb.mxu2 %v5873_v37  ;;  %v3349_v56 = vadd.f32 %v3348_v55, %v3336_v25  ;;  %v857_v25 = vld [vmem:[#allocation1 + $0x12] sm:$0xff] }
  0xc0   :  { %3567 = vmatpush.bf16.msrb.mxu1 %v5865_v41  ;;  %v3361_v59 = vpop.f32.mrf.mxu1  ;;  %v5939_v55 = vld [vmem:[%s7436_s1 + $0x790] sm:$0xff] }
  0xc1   :  { %3593 = vmatpush.bf16.msrb.mxu3 %v5881_v42  ;;  %3555 = vmatmul.bf16.vlgmr.msrb.gmra.mxu0 %v849_v27  ;;  %v3362_v60 = vadd.f32 %v3361_v59, %v3349_v56  ;;  %v856_v27 = vld [vmem:[#allocation1 + $0x9] sm:$0xff] }
  0xc2   :  { %3599 = vmatpush.bf16.msra.mxu0 %v5896_v38  ;;  %3581 = vmatmul.bf16.vlgmr.msrb.gmra.mxu2 %v851_v28  ;;  %v858_v28 = vld [vmem:[#allocation1 + $0x1b] sm:$0xff]  ;;  %v5922_v59 = vld [vmem:[%s7436_s1 + $0x708] sm:$0xff] }
  0xc3   :  { %3625 = vmatpush.bf16.msra.mxu2 %v5912_v39  ;;  %3568 = vmatmul.bf16.vlgmr.msrb.gmra.mxu1 %v850_v30  ;;  %v5943_v30 = vld [vmem:[%s7436_s1 + $0x7b0] sm:$0xff]  ;;  %v5925_v39 = vld [vmem:[%s7436_s1 + $0x720] sm:$0xff] }
  0xc4   :  { %3612 = vmatpush.bf16.msra.mxu1 %v5904_v43  ;;  %3594 = vmatmul.bf16.vlgmr.msrb.gmra.mxu3 %v852_v31  ;;  %v5935_v31 = vld [vmem:[%s7436_s1 + $0x770] sm:$0xff]  ;;  %v5933_v43 = vld [vmem:[%s7436_s1 + $0x760] sm:$0xff] }
  0xc5   :  { %3638 = vmatpush.bf16.msra.mxu3 %v5920_v44  ;;  %v3374_v1 = vpop.f32.mrf.mxu2  ;;  %v5949_v44 = vld [vmem:[%s7436_s1 + $0x7e0] sm:$0xff] }
  0xc6   :  { %3600 = vmatpush.bf16.msra.mxu0 %v5895_v45  ;;  %v3375_v2 = vadd.f32 %v3374_v1, %v3362_v60  ;;  %v3350_v6 = vpop.f32.mrf.mxu0  ;;  %v5924_v45 = vld [vmem:[%s7436_s1 + $0x718] sm:$0xff]  ;;  %v5938_v60 = vld [vmem:[%s7436_s1 + $0x788] sm:$0xff] }
  0xc7   :  { %3626 = vmatpush.bf16.msra.mxu2 %v5911_v46  ;;  %v3387_v5 = vpop.f32.mrf.mxu3  ;;  %v5940_v46 = vld [vmem:[%s7436_s1 + $0x798] sm:$0xff]  ;;  %v5921_v6 = vld [vmem:[%s7436_s1 + $0x700] sm:$0xff] }
  0xc8   :  { %3613 = vmatpush.bf16.msra.mxu1 %v5903_v47  ;;  %v3388_v7 = vadd.f32 %v3387_v5, %v3375_v2  ;;  %v3363_v10 = vpop.f32.mrf.mxu1  ;;  %v32_v2 = vld [vmem:[%s7435_s0 + $0x20] sm:$0xff] }
  0xc9   :  { %3639 = vmatpush.bf16.msra.mxu3 %v5919_v48  ;;  %v5929_v10 = vld [vmem:[%s7436_s1 + $0x740] sm:$0xff] }
  0xca   :  { %3601 = vmatpush.bf16.msra.mxu0 %v5894_v49  ;;  %v5932_v49 = vld [vmem:[%s7436_s1 + $0x758] sm:$0xff] }
  0xcb   :  { %3627 = vmatpush.bf16.msra.mxu2 %v5910_v50  ;;  %v5948_v50 = vld [vmem:[%s7436_s1 + $0x7d8] sm:$0xff] }
  0xcc   :  { %3614 = vmatpush.bf16.msra.mxu1 %v5902_v51 }
  0xcd   :  { %3640 = vmatpush.bf16.msra.mxu3 %v5918_v52  ;;  %v3376_v15 = vpop.f32.mrf.mxu2 }
  0xce   :  { %3602 = vmatpush.bf16.msra.mxu0 %v5893_v53  ;;  %v5975_v15 = vld [vmem:[%s7436_s1 + $0x8b0] sm:$0xff] }
  0xcf   :  { %3628 = vmatpush.bf16.msra.mxu2 %v5909_v54  ;;  %v3389_v18 = vpop.f32.mrf.mxu3  ;;  %v5923_v54 = vld [vmem:[%s7436_s1 + $0x710] sm:$0xff] }
  0xd0   :  { %3615 = vmatpush.bf16.msra.mxu1 %v5901_v57  ;;  %v5931_v57 = vld [vmem:[%s7436_s1 + $0x750] sm:$0xff]  ;;  %v5958_v18 = vld [vmem:[%s7436_s1 + $0x828] sm:$0xff] }
  0xd1   :  { %3641 = vmatpush.bf16.msra.mxu3 %v5917_v58  ;;  %v5947_v58 = vld [vmem:[%s7436_s1 + $0x7d0] sm:$0xff] }
  0xd2   :  { %3603 = vmatpush.bf16.msra.mxu0 %v5892_v61  ;;  %v859_v61 = vld [vmem:[#allocation1 + $0x24] sm:$0xff] }
  0xd3   :  { %3629 = vmatpush.bf16.msra.mxu2 %v5908_v62  ;;  %v861_v62 = vld [vmem:[#allocation1 + $0x36] sm:$0xff] }
  0xd4   :  { %3616 = vmatpush.bf16.msra.mxu1 %v5900_v63  ;;  %v860_v63 = vld [vmem:[#allocation1 + $0x2d] sm:$0xff] }
  0xd5   :  { %3642 = vmatpush.bf16.msra.mxu3 %v5916_v0  ;;  %v862_v0 = vld [vmem:[#allocation1 + $0x3f] sm:$0xff] }
  0xd6   :  { %3604 = vmatpush.bf16.msra.mxu0 %v5891_v3  ;;  %864 = vst [vmem:[#allocation1] ss:$9 sm:$0xff] %v32_v2  ;;  %v5930_v3 = vld [vmem:[%s7436_s1 + $0x748] sm:$0xff] }
  0xd7   :  { %3630 = vmatpush.bf16.msra.mxu2 %v5907_v4  ;;  %v5946_v4 = vld [vmem:[%s7436_s1 + $0x7c8] sm:$0xff] }
  0xd8   :  { %3617 = vmatpush.bf16.msra.mxu1 %v5899_v8  ;;  %v5960_v8 = vld [vmem:[%s7436_s1 + $0x838] sm:$0xff]  ;;  %v5990_v2 = vld [vmem:[%s7436_s1 + $0x928] sm:$0xff] }
  0xd9   :  { %3643 = vmatpush.bf16.msra.mxu3 %v5915_v9  ;;  %v5976_v9 = vld [vmem:[%s7436_s1 + $0x8b8] sm:$0xff] }
  0xda   :  { %3605 = vmatpush.bf16.msra.mxu0 %v5890_v11  ;;  %v5945_v11 = vld [vmem:[%s7436_s1 + $0x7c0] sm:$0xff] }
  0xdb   :  { %3631 = vmatpush.bf16.msra.mxu2 %v5906_v12  ;;  %v5968_v12 = vld [vmem:[%s7436_s1 + $0x878] sm:$0xff] }
  0xdc   :  { %3618 = vmatpush.bf16.msra.mxu1 %v5898_v13  ;;  %v5984_v13 = vld [vmem:[%s7436_s1 + $0x8f8] sm:$0xff] }
  0xdd   :  { %3644 = vmatpush.bf16.msra.mxu3 %v5914_v14  ;;  %v5959_v14 = vld [vmem:[%s7436_s1 + $0x830] sm:$0xff] }
  0xde   :  { %3606 = vmatpush.bf16.msra.mxu0 %v5889_v16  ;;  %v3400_v37 = vpop.f32.mrf.mxu0  ;;  %v5967_v16 = vld [vmem:[%s7436_s1 + $0x870] sm:$0xff] }
  0xdf   :  { %3632 = vmatpush.bf16.msra.mxu2 %v5905_v17  ;;  %v3401_v38 = vadd.f32 %v3400_v37, %v3388_v7  ;;  %v5937_v7 = vld [vmem:[%s7436_s1 + $0x780] sm:$0xff]  ;;  %v5983_v17 = vld [vmem:[%s7436_s1 + $0x8f0] sm:$0xff] }
  0xe0   :  { %3619 = vmatpush.bf16.msra.mxu1 %v5897_v21  ;;  %v3413_v41 = vpop.f32.mrf.mxu1  ;;  %v5982_v21 = vld [vmem:[%s7436_s1 + $0x8e8] sm:$0xff] }
  0xe1   :  { %3645 = vmatpush.bf16.msra.mxu3 %v5913_v22  ;;  %3607 = vmatmul.bf16.vlgmr.msra.gmra.mxu0 %v855_v24  ;;  %v3414_v42 = vadd.f32 %v3413_v41, %v3401_v38  ;;  %v5957_v24 = vld [vmem:[%s7436_s1 + $0x820] sm:$0xff] }
  0xe2   :  { %3651 = vmatpush.bf16.msrb.mxu0 %v5928_v19  ;;  %3633 = vmatmul.bf16.vlgmr.msra.gmra.mxu2 %v857_v25  ;;  %v5974_v19 = vld [vmem:[%s7436_s1 + $0x8a8] sm:$0xff]  ;;  %v5973_v25 = vld [vmem:[%s7436_s1 + $0x8a0] sm:$0xff] }
  0xe3   :  { %3677 = vmatpush.bf16.msrb.mxu2 %v5944_v20  ;;  %3620 = vmatmul.bf16.vlgmr.msra.gmra.mxu1 %v856_v27  ;;  %v5966_v20 = vld [vmem:[%s7436_s1 + $0x868] sm:$0xff] }
  0xe4   :  { %3664 = vmatpush.bf16.msrb.mxu1 %v5936_v23  ;;  %3646 = vmatmul.bf16.vlgmr.msra.gmra.mxu3 %v858_v28  ;;  %v5965_v28 = vld [vmem:[%s7436_s1 + $0x860] sm:$0xff] }
  0xe5   :  { %3690 = vmatpush.bf16.msrb.mxu3 %v5952_v26  ;;  %v3426_v47 = vpop.f32.mrf.mxu2 }
  0xe6   :  { %3652 = vmatpush.bf16.msrb.mxu0 %v5927_v29  ;;  %v3427_v48 = vadd.f32 %v3426_v47, %v3414_v42  ;;  %v3402_v52 = vpop.f32.mrf.mxu0  ;;  %v5981_v29 = vld [vmem:[%s7436_s1 + $0x8e0] sm:$0xff]  ;;  %v5963_v42 = vld [vmem:[%s7436_s1 + $0x850] sm:$0xff]  ;;  %v5962_v47 = vld [vmem:[%s7436_s1 + $0x848] sm:$0xff] }
  0xe7   :  { %3678 = vmatpush.bf16.msrb.mxu2 %v5943_v30  ;;  %v3439_v51 = vpop.f32.mrf.mxu3  ;;  %v5956_v30 = vld [vmem:[%s7436_s1 + $0x818] sm:$0xff] }
  0xe8   :  { %3665 = vmatpush.bf16.msrb.mxu1 %v5935_v31  ;;  %v6931_v53 = vadd.f32 %v3439_v51, %v3427_v48  ;;  %v3415_v56 = vpop.f32.mrf.mxu1  ;;  %v5972_v31 = vld [vmem:[%s7436_s1 + $0x898] sm:$0xff]  ;;  %v5978_v48 = vld [vmem:[%s7436_s1 + $0x8c8] sm:$0xff]  ;;  %v5969_v51 = vld [vmem:[%s7436_s1 + $0x880] sm:$0xff] }
  0xe9   :  { %3691 = vmatpush.bf16.msrb.mxu3 %v5951_v32  ;;  %v5992_v52 = vld [vmem:[%s7436_s1 + $0x938] sm:$0xff] }
  0xea   :  { %3653 = vmatpush.bf16.msrb.mxu0 %v5926_v33  ;;  %v6000_v56 = vld [vmem:[%s7436_s1 + $0x978] sm:$0xff] }
  0xeb   :  { %3679 = vmatpush.bf16.msrb.mxu2 %v5942_v34  ;;  %v5964_v34 = vld [vmem:[%s7436_s1 + $0x858] sm:$0xff] }
  0xec   :  { %3666 = vmatpush.bf16.msrb.mxu1 %v5934_v35  ;;  %v5980_v35 = vld [vmem:[%s7436_s1 + $0x8d8] sm:$0xff] }
  0xed   :  { %3692 = vmatpush.bf16.msrb.mxu3 %v5950_v36  ;;  %v3428_v1 = vpop.f32.mrf.mxu2 }
  0xee   :  { %3654 = vmatpush.bf16.msrb.mxu0 %v5925_v39  ;;  %v5955_v39 = vld [vmem:[%s7436_s1 + $0x810] sm:$0xff] }
  0xef   :  { %3680 = vmatpush.bf16.msrb.mxu2 %v5941_v40  ;;  %v3441_v5 = vpop.f32.mrf.mxu3  ;;  %v5971_v40 = vld [vmem:[%s7436_s1 + $0x890] sm:$0xff] }
  0xf0   :  { %3667 = vmatpush.bf16.msrb.mxu1 %v5933_v43  ;;  %v5979_v43 = vld [vmem:[%s7436_s1 + $0x8d0] sm:$0xff]  ;;  %v6014_v5 = vld [vmem:[%s7436_s1 + $0x9e8] sm:$0xff] }
  0xf1   :  { %3693 = vmatpush.bf16.msrb.mxu3 %v5949_v44  ;;  %v5954_v44 = vld [vmem:[%s7436_s1 + $0x808] sm:$0xff]  ;;  %v6015_v1 = vld [vmem:[%s7436_s1 + $0x9f0] sm:$0xff] }
  0xf2   :  { %3655 = vmatpush.bf16.msrb.mxu0 %v5924_v45  ;;  %v5970_v45 = vld [vmem:[%s7436_s1 + $0x888] sm:$0xff] }
  0xf3   :  { %3681 = vmatpush.bf16.msrb.mxu2 %v5940_v46 }
  0xf4   :  { %3668 = vmatpush.bf16.msrb.mxu1 %v5932_v49 }
  0xf5   :  { %3694 = vmatpush.bf16.msrb.mxu3 %v5948_v50  ;;  %v5953_v50 = vld [vmem:[%s7436_s1 + $0x800] sm:$0xff] }
  0xf6   :  { %3656 = vmatpush.bf16.msrb.mxu0 %v5923_v54  ;;  %v5961_v54 = vld [vmem:[%s7436_s1 + $0x840] sm:$0xff] }
  0xf7   :  { %3682 = vmatpush.bf16.msrb.mxu2 %v5939_v55  ;;  %v5977_v55 = vld [vmem:[%s7436_s1 + $0x8c0] sm:$0xff] }
  0xf8   :  { %3669 = vmatpush.bf16.msrb.mxu1 %v5931_v57  ;;  %v865_v57 = vld [vmem:[#allocation1] sm:$0xff] }
  0xf9   :  { %3695 = vmatpush.bf16.msrb.mxu3 %v5947_v58  ;;  %v867_v58 = vld [vmem:[#allocation1 + $0x12] sm:$0xff] }
  0xfa   :  { %3657 = vmatpush.bf16.msrb.mxu0 %v5922_v59  ;;  %v6016_v59 = vld [vmem:[%s7436_s1 + $0x9f8] sm:$0xff] }
  0xfb   :  { %3683 = vmatpush.bf16.msrb.mxu2 %v5938_v60  ;;  %v866_v60 = vld [vmem:[#allocation1 + $0x9] sm:$0xff] }
  0xfc   :  { %3670 = vmatpush.bf16.msrb.mxu1 %v5930_v3  ;;  %v6006_v3 = vld [vmem:[%s7436_s1 + $0x9a8] sm:$0xff] }
  0xfd   :  { %3696 = vmatpush.bf16.msrb.mxu3 %v5946_v4  ;;  %v5998_v4 = vld [vmem:[%s7436_s1 + $0x968] sm:$0xff] }
  0xfe   :  { %3658 = vmatpush.bf16.msrb.mxu0 %v5921_v6  ;;  %v3452_v22 = vpop.f32.mrf.mxu0 }
  0xff   :  { %3684 = vmatpush.bf16.msrb.mxu2 %v5937_v7  ;;  %v3453_v23 = vadd.f32 %v3452_v22, %v6931_v53  ;;  %v6008_v53 = vld [vmem:[%s7436_s1 + $0x9b8] sm:$0xff] }
 0x100   :  { %3671 = vmatpush.bf16.msrb.mxu1 %v5929_v10  ;;  %v3465_v26 = vpop.f32.mrf.mxu1 }
 0x101   :  { %3697 = vmatpush.bf16.msrb.mxu3 %v5945_v11  ;;  %3659 = vmatmul.bf16.vlgmr.msrb.gmra.mxu0 %v859_v61  ;;  %v3466_v27 = vadd.f32 %v3465_v26, %v3453_v23  ;;  %v868_v61 = vld [vmem:[#allocation1 + $0x1b] sm:$0xff]  ;;  %v5987_v23 = vld [vmem:[%s7436_s1 + $0x910] sm:$0xff] }
 0x102   :  { %3703 = vmatpush.bf16.msra.mxu0 %v5960_v8  ;;  %3685 = vmatmul.bf16.vlgmr.msrb.gmra.mxu2 %v861_v62  ;;  %v5991_v62 = vld [vmem:[%s7436_s1 + $0x930] sm:$0xff]  ;;  %v5989_v8 = vld [vmem:[%s7436_s1 + $0x920] sm:$0xff] }
 0x103   :  { %3729 = vmatpush.bf16.msra.mxu2 %v5976_v9  ;;  %3672 = vmatmul.bf16.vlgmr.msrb.gmra.mxu1 %v860_v63  ;;  %v6007_v63 = vld [vmem:[%s7436_s1 + $0x9b0] sm:$0xff]  ;;  %v6005_v9 = vld [vmem:[%s7436_s1 + $0x9a0] sm:$0xff] }
 0x104   :  { %3716 = vmatpush.bf16.msra.mxu1 %v5968_v12  ;;  %3698 = vmatmul.bf16.vlgmr.msrb.gmra.mxu3 %v862_v0  ;;  %v5999_v0 = vld [vmem:[%s7436_s1 + $0x970] sm:$0xff]  ;;  %v5997_v12 = vld [vmem:[%s7436_s1 + $0x960] sm:$0xff] }
 0x105   :  { %3742 = vmatpush.bf16.msra.mxu3 %v5984_v13  ;;  %v3478_v32 = vpop.f32.mrf.mxu2  ;;  %v6013_v13 = vld [vmem:[%s7436_s1 + $0x9e0] sm:$0xff]  ;;  %v5995_v26 = vld [vmem:[%s7436_s1 + $0x950] sm:$0xff] }
 0x106   :  { %3704 = vmatpush.bf16.msra.mxu0 %v5959_v14  ;;  %v3479_v33 = vadd.f32 %v3478_v32, %v3466_v27  ;;  %v3454_v37 = vpop.f32.mrf.mxu0  ;;  %v5988_v14 = vld [vmem:[%s7436_s1 + $0x918] sm:$0xff]  ;;  %v6011_v27 = vld [vmem:[%s7436_s1 + $0x9d0] sm:$0xff] }
 0x107   :  { %3730 = vmatpush.bf16.msra.mxu2 %v5975_v15  ;;  %v3491_v36 = vpop.f32.mrf.mxu3  ;;  %v6004_v15 = vld [vmem:[%s7436_s1 + $0x998] sm:$0xff]  ;;  %v870_v32 = vld [vmem:[#allocation1 + $0x2d] sm:$0xff] }
 0x108   :  { %3717 = vmatpush.bf16.msra.mxu1 %v5967_v16  ;;  %v3492_v38 = vadd.f32 %v3491_v36, %v3479_v33  ;;  %v3467_v41 = vpop.f32.mrf.mxu1  ;;  %v872_v33 = vld [vmem:[#allocation1 + $0x3f] sm:$0xff]  ;;  %v5994_v36 = vld [vmem:[%s7436_s1 + $0x948] sm:$0xff] }
 0x109   :  { %3743 = vmatpush.bf16.msra.mxu3 %v5983_v17  ;;  %v6010_v37 = vld [vmem:[%s7436_s1 + $0x9c8] sm:$0xff]  ;;  %v6024_v41 = vld [vmem:[%s7436_s1 + $0xa38] sm:$0xff] }
 0x10a   :  { %3705 = vmatpush.bf16.msra.mxu0 %v5958_v18  ;;  %v5996_v18 = vld [vmem:[%s7436_s1 + $0x958] sm:$0xff] }
 0x10b   :  { %3731 = vmatpush.bf16.msra.mxu2 %v5974_v19  ;;  %v6012_v19 = vld [vmem:[%s7436_s1 + $0x9d8] sm:$0xff] }
 0x10c   :  { %3718 = vmatpush.bf16.msra.mxu1 %v5966_v20 }
 0x10d   :  { %3744 = vmatpush.bf16.msra.mxu3 %v5982_v21  ;;  %v3480_v46 = vpop.f32.mrf.mxu2 }
 0x10e   :  { %3706 = vmatpush.bf16.msra.mxu0 %v5957_v24  ;;  %v6003_v24 = vld [vmem:[%s7436_s1 + $0x990] sm:$0xff]  ;;  %v6048_v46 = vld [vmem:[%s7436_s1 + $0xaf8] sm:$0xff] }
 0x10f   :  { %3732 = vmatpush.bf16.msra.mxu2 %v5973_v25  ;;  %v3493_v49 = vpop.f32.mrf.mxu3 }
 0x110   :  { %3719 = vmatpush.bf16.msra.mxu1 %v5965_v28  ;;  %v5986_v28 = vld [vmem:[%s7436_s1 + $0x908] sm:$0xff]  ;;  %v6031_v49 = vld [vmem:[%s7436_s1 + $0xa70] sm:$0xff] }
 0x111   :  { %3745 = vmatpush.bf16.msra.mxu3 %v5981_v29  ;;  %v6002_v29 = vld [vmem:[%s7436_s1 + $0x988] sm:$0xff] }
 0x112   :  { %3707 = vmatpush.bf16.msra.mxu0 %v5956_v30  ;;  %v869_v30 = vld [vmem:[#allocation1 + $0x24] sm:$0xff] }
 0x113   :  { %3733 = vmatpush.bf16.msra.mxu2 %v5972_v31  ;;  %v871_v31 = vld [vmem:[#allocation1 + $0x36] sm:$0xff] }
 0x114   :  { %3720 = vmatpush.bf16.msra.mxu1 %v5964_v34 }
 0x115   :  { %3746 = vmatpush.bf16.msra.mxu3 %v5980_v35  ;;  %v33_v35 = vld [vmem:[%s7435_s0 + $0x28] sm:$0xff] }
 0x116   :  { %3708 = vmatpush.bf16.msra.mxu0 %v5955_v39  ;;  %874 = vst [vmem:[#allocation1] ss:$9 sm:$0xff] %v33_v35  ;;  %v5985_v39 = vld [vmem:[%s7436_s1 + $0x900] sm:$0xff]  ;;  %v6054_v35 = vld [vmem:[%s7436_s1 + $0xb28] sm:$0xff] }
 0x117   :  { %3734 = vmatpush.bf16.msra.mxu2 %v5971_v40  ;;  %v6001_v40 = vld [vmem:[%s7436_s1 + $0x980] sm:$0xff] }
 0x118   :  { %3721 = vmatpush.bf16.msra.mxu1 %v5963_v42  ;;  %v6040_v42 = vld [vmem:[%s7436_s1 + $0xab8] sm:$0xff] }
 0x119   :  { %3747 = vmatpush.bf16.msra.mxu3 %v5979_v43  ;;  %v5993_v43 = vld [vmem:[%s7436_s1 + $0x940] sm:$0xff] }
 0x11a   :  { %3709 = vmatpush.bf16.msra.mxu0 %v5954_v44  ;;  %v6009_v44 = vld [vmem:[%s7436_s1 + $0x9c0] sm:$0xff] }
 0x11b   :  { %3735 = vmatpush.bf16.msra.mxu2 %v5970_v45  ;;  %v6032_v45 = vld [vmem:[%s7436_s1 + $0xa78] sm:$0xff] }
 0x11c   :  { %3722 = vmatpush.bf16.msra.mxu1 %v5962_v47  ;;  %v6023_v47 = vld [vmem:[%s7436_s1 + $0xa30] sm:$0xff] }
 0x11d   :  { %3748 = vmatpush.bf16.msra.mxu3 %v5978_v48  ;;  %v6039_v48 = vld [vmem:[%s7436_s1 + $0xab0] sm:$0xff] }
 0x11e   :  { %3710 = vmatpush.bf16.msra.mxu0 %v5953_v50  ;;  %v3504_v6 = vpop.f32.mrf.mxu0  ;;  %v6047_v50 = vld [vmem:[%s7436_s1 + $0xaf0] sm:$0xff] }
 0x11f   :  { %3736 = vmatpush.bf16.msra.mxu2 %v5969_v51  ;;  %v3505_v7 = vadd.f32 %v3504_v6, %v3492_v38  ;;  %v6022_v51 = vld [vmem:[%s7436_s1 + $0xa28] sm:$0xff] }
 0x120   :  { %3723 = vmatpush.bf16.msra.mxu1 %v5961_v54  ;;  %v3517_v10 = vpop.f32.mrf.mxu1  ;;  %v6046_v54 = vld [vmem:[%s7436_s1 + $0xae8] sm:$0xff] }
 0x121   :  { %3749 = vmatpush.bf16.msra.mxu3 %v5977_v55  ;;  %3711 = vmatmul.bf16.vlgmr.msra.gmra.mxu0 %v865_v57  ;;  %v3518_v11 = vadd.f32 %v3517_v10, %v3505_v7  ;;  %v6021_v57 = vld [vmem:[%s7436_s1 + $0xa20] sm:$0xff] }
 0x122   :  { %3755 = vmatpush.bf16.msrb.mxu0 %v5992_v52  ;;  %3737 = vmatmul.bf16.vlgmr.msra.gmra.mxu2 %v867_v58  ;;  %v6038_v52 = vld [vmem:[%s7436_s1 + $0xaa8] sm:$0xff]  ;;  %v6037_v58 = vld [vmem:[%s7436_s1 + $0xaa0] sm:$0xff] }
 0x123   :  { %3781 = vmatpush.bf16.msrb.mxu2 %v6008_v53  ;;  %3724 = vmatmul.bf16.vlgmr.msra.gmra.mxu1 %v866_v60  ;;  %v6030_v53 = vld [vmem:[%s7436_s1 + $0xa68] sm:$0xff] }
 0x124   :  { %3768 = vmatpush.bf16.msrb.mxu1 %v6000_v56  ;;  %3750 = vmatmul.bf16.vlgmr.msra.gmra.mxu3 %v868_v61  ;;  %v6029_v61 = vld [vmem:[%s7436_s1 + $0xa60] sm:$0xff] }
 0x125   :  { %3794 = vmatpush.bf16.msrb.mxu3 %v6016_v59  ;;  %v3530_v16 = vpop.f32.mrf.mxu2 }
 0x126   :  { %3756 = vmatpush.bf16.msrb.mxu0 %v5991_v62  ;;  %v3531_v17 = vadd.f32 %v3530_v16, %v3518_v11  ;;  %v3506_v21 = vpop.f32.mrf.mxu0  ;;  %v6045_v62 = vld [vmem:[%s7436_s1 + $0xae0] sm:$0xff]  ;;  %v6027_v11 = vld [vmem:[%s7436_s1 + $0xa50] sm:$0xff]  ;;  %v6026_v16 = vld [vmem:[%s7436_s1 + $0xa48] sm:$0xff] }
 0x127   :  { %3782 = vmatpush.bf16.msrb.mxu2 %v6007_v63  ;;  %v3543_v20 = vpop.f32.mrf.mxu3  ;;  %v6020_v63 = vld [vmem:[%s7436_s1 + $0xa18] sm:$0xff] }
 0x128   :  { %3769 = vmatpush.bf16.msrb.mxu1 %v5999_v0  ;;  %v7129_v22 = vadd.f32 %v3543_v20, %v3531_v17  ;;  %v3519_v25 = vpop.f32.mrf.mxu1  ;;  %v6036_v0 = vld [vmem:[%s7436_s1 + $0xa98] sm:$0xff]  ;;  %v6042_v17 = vld [vmem:[%s7436_s1 + $0xac8] sm:$0xff]  ;;  %v6033_v20 = vld [vmem:[%s7436_s1 + $0xa80] sm:$0xff] }
 0x129   :  { %3795 = vmatpush.bf16.msrb.mxu3 %v6015_v1  ;;  %v6056_v21 = vld [vmem:[%s7436_s1 + $0xb38] sm:$0xff] }
 0x12a   :  { %3757 = vmatpush.bf16.msrb.mxu0 %v5990_v2  ;;  %v6064_v25 = vld [vmem:[%s7436_s1 + $0xb78] sm:$0xff] }
 0x12b   :  { %3783 = vmatpush.bf16.msrb.mxu2 %v6006_v3  ;;  %v6028_v3 = vld [vmem:[%s7436_s1 + $0xa58] sm:$0xff] }
 0x12c   :  { %3770 = vmatpush.bf16.msrb.mxu1 %v5998_v4  ;;  %v6044_v4 = vld [vmem:[%s7436_s1 + $0xad8] sm:$0xff] }
 0x12d   :  { %3796 = vmatpush.bf16.msrb.mxu3 %v6014_v5  ;;  %v3532_v34 = vpop.f32.mrf.mxu2 }
 0x12e   :  { %3758 = vmatpush.bf16.msrb.mxu0 %v5989_v8  ;;  %v6019_v8 = vld [vmem:[%s7436_s1 + $0xa10] sm:$0xff] }
 0x12f   :  { %3784 = vmatpush.bf16.msrb.mxu2 %v6005_v9  ;;  %v3545_v38 = vpop.f32.mrf.mxu3  ;;  %v6035_v9 = vld [vmem:[%s7436_s1 + $0xa90] sm:$0xff] }
 0x130   :  { %3771 = vmatpush.bf16.msrb.mxu1 %v5997_v12  ;;  %v6043_v12 = vld [vmem:[%s7436_s1 + $0xad0] sm:$0xff]  ;;  %v6078_v38 = vld [vmem:[%s7436_s1 + $0xbe8] sm:$0xff] }
 0x131   :  { %3797 = vmatpush.bf16.msrb.mxu3 %v6013_v13  ;;  %v6018_v13 = vld [vmem:[%s7436_s1 + $0xa08] sm:$0xff]  ;;  %v6079_v34 = vld [vmem:[%s7436_s1 + $0xbf0] sm:$0xff] }
 0x132   :  { %3759 = vmatpush.bf16.msrb.mxu0 %v5988_v14  ;;  %v6034_v14 = vld [vmem:[%s7436_s1 + $0xa88] sm:$0xff] }
 0x133   :  { %3785 = vmatpush.bf16.msrb.mxu2 %v6004_v15 }
 0x134   :  { %3772 = vmatpush.bf16.msrb.mxu1 %v5996_v18 }
 0x135   :  { %3798 = vmatpush.bf16.msrb.mxu3 %v6012_v19  ;;  %v6017_v19 = vld [vmem:[%s7436_s1 + $0xa00] sm:$0xff] }
 0x136   :  { %3760 = vmatpush.bf16.msrb.mxu0 %v5987_v23  ;;  %v6025_v23 = vld [vmem:[%s7436_s1 + $0xa40] sm:$0xff] }
 0x137   :  { %3786 = vmatpush.bf16.msrb.mxu2 %v6003_v24  ;;  %v6041_v24 = vld [vmem:[%s7436_s1 + $0xac0] sm:$0xff] }
 0x138   :  { %3773 = vmatpush.bf16.msrb.mxu1 %v5995_v26  ;;  %v875_v26 = vld [vmem:[#allocation1] sm:$0xff] }
 0x139   :  { %3799 = vmatpush.bf16.msrb.mxu3 %v6011_v27  ;;  %v877_v27 = vld [vmem:[#allocation1 + $0x12] sm:$0xff] }
 0x13a   :  { %3761 = vmatpush.bf16.msrb.mxu0 %v5986_v28  ;;  %v6080_v28 = vld [vmem:[%s7436_s1 + $0xbf8] sm:$0xff] }
 0x13b   :  { %3787 = vmatpush.bf16.msrb.mxu2 %v6002_v29  ;;  %v876_v29 = vld [vmem:[#allocation1 + $0x9] sm:$0xff] }
 0x13c   :  { %3774 = vmatpush.bf16.msrb.mxu1 %v5994_v36  ;;  %v6070_v36 = vld [vmem:[%s7436_s1 + $0xba8] sm:$0xff] }
 0x13d   :  { %3800 = vmatpush.bf16.msrb.mxu3 %v6010_v37  ;;  %v6062_v37 = vld [vmem:[%s7436_s1 + $0xb68] sm:$0xff] }
 0x13e   :  { %3762 = vmatpush.bf16.msrb.mxu0 %v5985_v39  ;;  %v3556_v55 = vpop.f32.mrf.mxu0 }
 0x13f   :  { %3788 = vmatpush.bf16.msrb.mxu2 %v6001_v40  ;;  %v3557_v56 = vadd.f32 %v3556_v55, %v7129_v22  ;;  %v6072_v22 = vld [vmem:[%s7436_s1 + $0xbb8] sm:$0xff] }
 0x140   :  { %3775 = vmatpush.bf16.msrb.mxu1 %v5993_v43  ;;  %v3569_v59 = vpop.f32.mrf.mxu1 }
 0x141   :  { %3801 = vmatpush.bf16.msrb.mxu3 %v6009_v44  ;;  %3763 = vmatmul.bf16.vlgmr.msrb.gmra.mxu0 %v869_v30  ;;  %v3570_v60 = vadd.f32 %v3569_v59, %v3557_v56  ;;  %v878_v30 = vld [vmem:[#allocation1 + $0x1b] sm:$0xff]  ;;  %v6051_v56 = vld [vmem:[%s7436_s1 + $0xb10] sm:$0xff] }
 0x142   :  { %3807 = vmatpush.bf16.msra.mxu0 %v6024_v41  ;;  %3789 = vmatmul.bf16.vlgmr.msrb.gmra.mxu2 %v871_v31  ;;  %v6055_v31 = vld [vmem:[%s7436_s1 + $0xb30] sm:$0xff]  ;;  %v6053_v41 = vld [vmem:[%s7436_s1 + $0xb20] sm:$0xff] }
 0x143   :  { %3833 = vmatpush.bf16.msra.mxu2 %v6040_v42  ;;  %3776 = vmatmul.bf16.vlgmr.msrb.gmra.mxu1 %v870_v32  ;;  %v6071_v32 = vld [vmem:[%s7436_s1 + $0xbb0] sm:$0xff]  ;;  %v6069_v42 = vld [vmem:[%s7436_s1 + $0xba0] sm:$0xff] }
 0x144   :  { %3820 = vmatpush.bf16.msra.mxu1 %v6032_v45  ;;  %3802 = vmatmul.bf16.vlgmr.msrb.gmra.mxu3 %v872_v33  ;;  %v6063_v33 = vld [vmem:[%s7436_s1 + $0xb70] sm:$0xff]  ;;  %v6061_v45 = vld [vmem:[%s7436_s1 + $0xb60] sm:$0xff] }
 0x145   :  { %3846 = vmatpush.bf16.msra.mxu3 %v6048_v46  ;;  %v3582_v1 = vpop.f32.mrf.mxu2  ;;  %v6077_v46 = vld [vmem:[%s7436_s1 + $0xbe0] sm:$0xff]  ;;  %v6059_v59 = vld [vmem:[%s7436_s1 + $0xb50] sm:$0xff] }
 0x146   :  { %3808 = vmatpush.bf16.msra.mxu0 %v6023_v47  ;;  %v3583_v2 = vadd.f32 %v3582_v1, %v3570_v60  ;;  %v3558_v6 = vpop.f32.mrf.mxu0  ;;  %v6052_v47 = vld [vmem:[%s7436_s1 + $0xb18] sm:$0xff]  ;;  %v6075_v60 = vld [vmem:[%s7436_s1 + $0xbd0] sm:$0xff] }
 0x147   :  { %3834 = vmatpush.bf16.msra.mxu2 %v6039_v48  ;;  %v3595_v5 = vpop.f32.mrf.mxu3  ;;  %v6068_v48 = vld [vmem:[%s7436_s1 + $0xb98] sm:$0xff]  ;;  %v880_v1 = vld [vmem:[#allocation1 + $0x2d] sm:$0xff] }
 0x148   :  { %3821 = vmatpush.bf16.msra.mxu1 %v6031_v49  ;;  %v3596_v7 = vadd.f32 %v3595_v5, %v3583_v2  ;;  %v3571_v10 = vpop.f32.mrf.mxu1  ;;  %v882_v2 = vld [vmem:[#allocation1 + $0x3f] sm:$0xff]  ;;  %v6058_v5 = vld [vmem:[%s7436_s1 + $0xb48] sm:$0xff] }
 0x149   :  { %3847 = vmatpush.bf16.msra.mxu3 %v6047_v50  ;;  %v6074_v6 = vld [vmem:[%s7436_s1 + $0xbc8] sm:$0xff]  ;;  %v6088_v10 = vld [vmem:[%s7436_s1 + $0xc38] sm:$0xff] }
 0x14a   :  { %3809 = vmatpush.bf16.msra.mxu0 %v6022_v51  ;;  %v6060_v51 = vld [vmem:[%s7436_s1 + $0xb58] sm:$0xff] }
 0x14b   :  { %3835 = vmatpush.bf16.msra.mxu2 %v6038_v52  ;;  %v6076_v52 = vld [vmem:[%s7436_s1 + $0xbd8] sm:$0xff] }
 0x14c   :  { %3822 = vmatpush.bf16.msra.mxu1 %v6030_v53 }
 0x14d   :  { %3848 = vmatpush.bf16.msra.mxu3 %v6046_v54  ;;  %v3584_v15 = vpop.f32.mrf.mxu2 }
 0x14e   :  { %3810 = vmatpush.bf16.msra.mxu0 %v6021_v57  ;;  %v6067_v57 = vld [vmem:[%s7436_s1 + $0xb90] sm:$0xff] }
 0x14f   :  { %3836 = vmatpush.bf16.msra.mxu2 %v6037_v58  ;;  %v3597_v18 = vpop.f32.mrf.mxu3 }
 0x150   :  { %3823 = vmatpush.bf16.msra.mxu1 %v6029_v61  ;;  %v6050_v61 = vld [vmem:[%s7436_s1 + $0xb08] sm:$0xff] }
 0x151   :  { %3849 = vmatpush.bf16.msra.mxu3 %v6045_v62  ;;  %v6066_v62 = vld [vmem:[%s7436_s1 + $0xb88] sm:$0xff] }
 0x152   :  { %3811 = vmatpush.bf16.msra.mxu0 %v6020_v63  ;;  %v879_v63 = vld [vmem:[#allocation1 + $0x24] sm:$0xff] }
 0x153   :  { %3837 = vmatpush.bf16.msra.mxu2 %v6036_v0  ;;  %v881_v0 = vld [vmem:[#allocation1 + $0x36] sm:$0xff] }
 0x154   :  { %3824 = vmatpush.bf16.msra.mxu1 %v6028_v3 }
 0x155   :  { %3850 = vmatpush.bf16.msra.mxu3 %v6044_v4  ;;  %v34_v4 = vld [vmem:[%s7435_s0 + $0x30] sm:$0x1] }
 0x156   :  { %3812 = vmatpush.bf16.msra.mxu0 %v6019_v8  ;;  %884 = vst [vmem:[#allocation1] ss:$9 sm:$0xff] %v34_v4  ;;  %v6049_v8 = vld [vmem:[%s7436_s1 + $0xb00] sm:$0xff] }
 0x157   :  { %3838 = vmatpush.bf16.msra.mxu2 %v6035_v9  ;;  %v6065_v9 = vld [vmem:[%s7436_s1 + $0xb80] sm:$0xff] }
 0x158   :  { %3825 = vmatpush.bf16.msra.mxu1 %v6027_v11  ;;  %v6057_v11 = vld [vmem:[%s7436_s1 + $0xb40] sm:$0xff] }
 0x159   :  { %3851 = vmatpush.bf16.msra.mxu3 %v6043_v12  ;;  %v6073_v12 = vld [vmem:[%s7436_s1 + $0xbc0] sm:$0xff] }
 0x15a   :  { %3813 = vmatpush.bf16.msra.mxu0 %v6018_v13  ;;  %v6087_v13 = vld [vmem:[%s7436_s1 + $0xc30] sm:$0xff] }
 0x15b   :  { %3839 = vmatpush.bf16.msra.mxu2 %v6034_v14  ;;  %v6086_v14 = vld [vmem:[%s7436_s1 + $0xc28] sm:$0xff] }
 0x15c   :  { %3826 = vmatpush.bf16.msra.mxu1 %v6026_v16 }
 0x15d   :  { %3852 = vmatpush.bf16.msra.mxu3 %v6042_v17  ;;  %v6085_v17 = vld [vmem:[%s7436_s1 + $0xc20] sm:$0xff] }
 0x15e   :  { %3814 = vmatpush.bf16.msra.mxu0 %v6017_v19  ;;  %v3608_v39 = vpop.f32.mrf.mxu0 }
 0x15f   :  { %3840 = vmatpush.bf16.msra.mxu2 %v6033_v20  ;;  %v3609_v40 = vadd.f32 %v3608_v39, %v3596_v7  ;;  %v6084_v20 = vld [vmem:[%s7436_s1 + $0xc18] sm:$0xff] }
 0x160   :  { %3827 = vmatpush.bf16.msra.mxu1 %v6025_v23  ;;  %v3621_v43 = vpop.f32.mrf.mxu1 }
 0x161   :  { %3853 = vmatpush.bf16.msra.mxu3 %v6041_v24  ;;  %3815 = vmatmul.bf16.vlgmr.msra.gmra.mxu0 %v875_v26  ;;  %v3622_v44 = vadd.f32 %v3621_v43, %v3609_v40  ;;  %v6083_v26 = vld [vmem:[%s7436_s1 + $0xc10] sm:$0xff] }
 0x162   :  { %3859 = vmatpush.bf16.msrb.mxu0 %v6056_v21  ;;  %3841 = vmatmul.bf16.vlgmr.msra.gmra.mxu2 %v877_v27 }
 0x163   :  { %3885 = vmatpush.bf16.msrb.mxu2 %v6072_v22  ;;  %3828 = vmatmul.bf16.vlgmr.msra.gmra.mxu1 %v876_v29 }
 0x164   :  { %3872 = vmatpush.bf16.msrb.mxu1 %v6064_v25  ;;  %3854 = vmatmul.bf16.vlgmr.msra.gmra.mxu3 %v878_v30 }
 0x165   :  { %3898 = vmatpush.bf16.msrb.mxu3 %v6080_v28  ;;  %v3634_v49 = vpop.f32.mrf.mxu2  ;;  %v6082_v28 = vld [vmem:[%s7436_s1 + $0xc08] sm:$0xff] }
 0x166   :  { %3860 = vmatpush.bf16.msrb.mxu0 %v6055_v31  ;;  %v3635_v50 = vadd.f32 %v3634_v49, %v3622_v44  ;;  %v3610_v54 = vpop.f32.mrf.mxu0  ;;  %v6081_v31 = vld [vmem:[%s7436_s1 + $0xc00] sm:$0xff] }
 0x167   :  { %3886 = vmatpush.bf16.msrb.mxu2 %v6071_v32  ;;  %v3647_v53 = vpop.f32.mrf.mxu3  ;;  %v885_v32 = vld [vmem:[#allocation1] sm:$0xff] }
 0x168   :  { %3873 = vmatpush.bf16.msrb.mxu1 %v6063_v33  ;;  %v3648_v55 = vadd.f32 %v3647_v53, %v3635_v50  ;;  %v3623_v58 = vpop.f32.mrf.mxu1 }
 0x169   :  { %3899 = vmatpush.bf16.msrb.mxu3 %v6079_v34  ;;  %v6096_v58 = vld [vmem:[%s7438_s3 + $0x38] sm:$0xff] }
 0x16a   :  { %3861 = vmatpush.bf16.msrb.mxu0 %v6054_v35 }
 0x16b   :  { %3887 = vmatpush.bf16.msrb.mxu2 %v6070_v36 }
 0x16c   :  { %3874 = vmatpush.bf16.msrb.mxu1 %v6062_v37 }
 0x16d   :  { %3900 = vmatpush.bf16.msrb.mxu3 %v6078_v38  ;;  %v3636_v3 = vpop.f32.mrf.mxu2 }
 0x16e   :  { %3862 = vmatpush.bf16.msrb.mxu0 %v6053_v41 }
 0x16f   :  { %3888 = vmatpush.bf16.msrb.mxu2 %v6069_v42  ;;  %v3649_v7 = vpop.f32.mrf.mxu3 }
 0x170   :  { %3875 = vmatpush.bf16.msrb.mxu1 %v6061_v45  ;;  %v6090_v7 = vld [vmem:[%s7438_s3 + $0x8] sm:$0xff] }
 0x171   :  { %3901 = vmatpush.bf16.msrb.mxu3 %v6077_v46 }
 0x172   :  { %3863 = vmatpush.bf16.msrb.mxu0 %v6052_v47 }
 0x173   :  { %3889 = vmatpush.bf16.msrb.mxu2 %v6068_v48 }
 0x174   :  { %3876 = vmatpush.bf16.msrb.mxu1 %v6060_v51 }
 0x175   :  { %3902 = vmatpush.bf16.msrb.mxu3 %v6076_v52 }
 0x176   :  { %3864 = vmatpush.bf16.msrb.mxu0 %v6051_v56 }
 0x177   :  { %3890 = vmatpush.bf16.msrb.mxu2 %v6067_v57 }
 0x178   :  { %3877 = vmatpush.bf16.msrb.mxu1 %v6059_v59 }
 0x179   :  { %3903 = vmatpush.bf16.msrb.mxu3 %v6075_v60 }
 0x17a   :  { %3865 = vmatpush.bf16.msrb.mxu0 %v6050_v61  ;;  %v6095_v61 = vld [vmem:[%s7438_s3 + $0x30] sm:$0xff] }
 0x17b   :  { %3891 = vmatpush.bf16.msrb.mxu2 %v6066_v62 }
 0x17c   :  { %3878 = vmatpush.bf16.msrb.mxu1 %v6058_v5  ;;  %v6092_v5 = vld [vmem:[%s7438_s3 + $0x18] sm:$0xff] }
 0x17d   :  { %3904 = vmatpush.bf16.msrb.mxu3 %v6074_v6  ;;  %v6091_v6 = vld [vmem:[%s7438_s3 + $0x10] sm:$0xff] }
 0x17e   :  { %3866 = vmatpush.bf16.msrb.mxu0 %v6049_v8  ;;  %v3660_v15 = vpop.f32.mrf.mxu0 }
 0x17f   :  { %3892 = vmatpush.bf16.msrb.mxu2 %v6065_v9  ;;  %v3661_v16 = vadd.f32 %v3660_v15, %v3648_v55  ;;  %v6089_v9 = vld [vmem:[%s7438_s3] sm:$0xff] }
 0x180   :  { %3879 = vmatpush.bf16.msrb.mxu1 %v6057_v11  ;;  %v3673_v18 = vpop.f32.mrf.mxu1 }
 0x181   :  { %3905 = vmatpush.bf16.msrb.mxu3 %v6073_v12  ;;  %3867 = vmatmul.bf16.vlgmr.msrb.gmra.mxu0 %v879_v63  ;;  %v3674_v19 = vadd.f32 %v3673_v18, %v3661_v16  ;;  %v6100_v12 = vld [vmem:[%s7440_s5 + $0x18] sm:$0xff]  ;;  %v6099_v16 = vld [vmem:[%s7440_s5 + $0x10] sm:$0xff] }
 0x182   :  { %3911 = vmatpush.bf16.msra.mxu0 %v6088_v10  ;;  %3893 = vmatmul.bf16.vlgmr.msrb.gmra.mxu2 %v881_v0  ;;  %v6094_v0 = vld [vmem:[%s7438_s3 + $0x28] sm:$0xff] }
 0x183   :  { %3880 = vmatmul.bf16.vlgmr.msrb.gmra.mxu1 %v880_v1  ;;  %4053 = vmatpush.bf16.msra.mxu2 %v6100_v12 }
 0x184   :  { %3906 = vmatmul.bf16.vlgmr.msrb.gmra.mxu3 %v882_v2  ;;  %3994 = vmatpush.bf16.msra.mxu1 %v6096_v58  ;;  %v6093_v2 = vld [vmem:[%s7438_s3 + $0x20] sm:$0xff] }
 0x185   :  { %v3686_v21 = vpop.f32.mrf.mxu2 }
 0x186   :  { %3912 = vmatpush.bf16.msra.mxu0 %v6087_v13  ;;  %v3687_v22 = vadd.f32 %v3686_v21, %v3674_v19  ;;  %v3662_v24 = vpop.f32.mrf.mxu0  ;;  %v6098_v19 = vld [vmem:[%s7440_s5 + $0x8] sm:$0xff] }
 0x187   :  { %v3699_v23 = vpop.f32.mrf.mxu3  ;;  %4054 = vmatpush.bf16.msra.mxu2 %v6099_v16 }
 0x188   :  { %v3700_v25 = vadd.f32 %v3699_v23, %v3687_v22  ;;  %v3675_v27 = vpop.f32.mrf.mxu1  ;;  %3995 = vmatpush.bf16.msra.mxu1 %v6095_v61 }
 0x18a   :  { %3913 = vmatpush.bf16.msra.mxu0 %v6086_v14 }
 0x18b   :  { %4055 = vmatpush.bf16.msra.mxu2 %v6098_v19 }
 0x18c   :  { %3996 = vmatpush.bf16.msra.mxu1 %v6094_v0 }
 0x18d   :  { %v3688_v29 = vpop.f32.mrf.mxu2 }
 0x18e   :  { %3914 = vmatpush.bf16.msra.mxu0 %v6085_v17 }
 0x18f   :  { %v3701_v30 = vpop.f32.mrf.mxu3 }
 0x190   :  { %3997 = vmatpush.bf16.msra.mxu1 %v6093_v2 }
 0x192   :  { %3915 = vmatpush.bf16.msra.mxu0 %v6084_v20 }
 0x194   :  { %3998 = vmatpush.bf16.msra.mxu1 %v6092_v5 }
 0x196   :  { %3916 = vmatpush.bf16.msra.mxu0 %v6083_v26 }
 0x198   :  { %3999 = vmatpush.bf16.msra.mxu1 %v6091_v6 }
 0x19a   :  { %3917 = vmatpush.bf16.msra.mxu0 %v6082_v28 }
 0x19c   :  { %4000 = vmatpush.bf16.msra.mxu1 %v6090_v7 }
 0x19e   :  { %3918 = vmatpush.bf16.msra.mxu0 %v6081_v31  ;;  %v3712_v33 = vpop.f32.mrf.mxu0 }
 0x19f   :  { %v3713_v34 = vadd.f32 %v3712_v33, %v3700_v25  ;;  %v6097_v33 = vld [vmem:[%s7440_s5] sm:$0xff] }
 0x1a0   :  { %v3725_v35 = vpop.f32.mrf.mxu1  ;;  %4001 = vmatpush.bf16.msra.mxu1 %v6089_v9  ;;  %4056 = vmatpush.bf16.msra.mxu2 %v6097_v33 }
 0x1a1   :  { %3919 = vmatmul.bf16.vlgmr.msra.gmra.mxu0 %v885_v32  ;;  %v3726_v36 = vadd.f32 %v3725_v35, %v3713_v34  ;;  %v6103_v34 = vld [vmem:[%s7439_s4] ss:$0 sm:$0xff] }
 0x1a5   :  { %v3738_v37 = vpop.f32.mrf.mxu2 }
 0x1a6   :  { %v3739_v38 = vadd.f32 %v3738_v37, %v3726_v36  ;;  %v3714_v40 = vpop.f32.mrf.mxu0 }
 0x1a7   :  { %v3751_v39 = vpop.f32.mrf.mxu3  ;;  %v6104_v40 = vld [vmem:[%s7441_s6] ss:$0 sm:$0xff] }
 0x1a8   :  { %v3752_v41 = vadd.f32 %v3751_v39, %v3739_v38  ;;  %v3727_v42 = vpop.f32.mrf.mxu1 }
 0x1ad   :  { %v3740_v43 = vpop.f32.mrf.mxu2 }
 0x1af   :  { %v3753_v44 = vpop.f32.mrf.mxu3 }
 0x1be   :  { %v3764_v45 = vpop.f32.mrf.mxu0 }
 0x1bf   :  { %v3765_v46 = vadd.f32 %v3764_v45, %v3752_v41 }
 0x1c0   :  { %v3777_v47 = vpop.f32.mrf.mxu1 }
 0x1c1   :  { %v3778_v48 = vadd.f32 %v3777_v47, %v3765_v46 }
 0x1c5   :  { %v3790_v49 = vpop.f32.mrf.mxu2 }
 0x1c6   :  { %v3791_v50 = vadd.f32 %v3790_v49, %v3778_v48  ;;  %v3766_v52 = vpop.f32.mrf.mxu0 }
 0x1c7   :  { %v3803_v51 = vpop.f32.mrf.mxu3 }
 0x1c8   :  { %v3804_v53 = vadd.f32 %v3803_v51, %v3791_v50  ;;  %v3779_v54 = vpop.f32.mrf.mxu1 }
 0x1cd   :  { %v3792_v55 = vpop.f32.mrf.mxu2 }
 0x1cf   :  { %v3805_v56 = vpop.f32.mrf.mxu3 }
 0x1de   :  { %v3816_v57 = vpop.f32.mrf.mxu0 }
 0x1df   :  { %v3817_v13 = vadd.f32 %v3816_v57, %v3804_v53 }
 0x1e0   :  { %v3829_v59 = vpop.f32.mrf.mxu1 }
 0x1e1   :  { %v3830_v18 = vadd.f32 %v3829_v59, %v3817_v13 }
 0x1e5   :  { %v3842_v60 = vpop.f32.mrf.mxu2 }
 0x1e6   :  { %v3818_v63 = vpop.f32.mrf.mxu0  ;;  %v3843_v20 = vadd.f32 %v3842_v60, %v3830_v18 }
 0x1e7   :  { %v3855_v62 = vpop.f32.mrf.mxu3 }
 0x1e8   :  { %v3831_v1 = vpop.f32.mrf.mxu1  ;;  %v3856_v23 = vadd.f32 %v3855_v62, %v3843_v20 }
 0x1ed   :  { %v3844_v3 = vpop.f32.mrf.mxu2 }
 0x1ef   :  { %v3857_v4 = vpop.f32.mrf.mxu3 }
 0x1fe   :  { %v3868_v8 = vpop.f32.mrf.mxu0 }
 0x1ff   :  { %v3869_v24 = vadd.f32 %v3868_v8, %v3856_v23 }
 0x200   :  { %v3881_v10 = vpop.f32.mrf.mxu1 }
 0x201   :  { %v3882_v25 = vadd.f32 %v3881_v10, %v3869_v24 }
 0x205   :  { %v3894_v11 = vpop.f32.mrf.mxu2 }
 0x206   :  { %v3870_v15 = vpop.f32.mrf.mxu0  ;;  %v3895_v26 = vadd.f32 %v3894_v11, %v3882_v25 }
 0x207   :  { %v3907_v14 = vpop.f32.mrf.mxu3 }
 0x208   :  { %v3883_v17 = vpop.f32.mrf.mxu1  ;;  %v3908_v27 = vadd.f32 %v3907_v14, %v3895_v26 }
 0x20d   :  { %v3896_v21 = vpop.f32.mrf.mxu2 }
 0x20f   :  { %v3909_v22 = vpop.f32.mrf.mxu3 }
 0x21e   :  { %v3920_v28 = vpop.f32.mrf.mxu0 }
 0x21f   :  { %v3921_v29 = vadd.f32 %v3920_v28, %v3908_v27 }
 0x221   :  { %v3924_v30 = vmax.f32 %v3921_v29, 0.0 }
 0x223   :  { %v3925_v31 = vpack.c.bf16 %v3924_v30, %v3924_v30 }
 0x225   :  { %4002 = vmatmul.bf16.vlgmr.msra.gmra.mxu1 %v3925_v31 }
 0x226   :  { %v3922_v32 = vpop.f32.mrf.mxu0 }
 0x2a2   :  { %v4003_v35 = vpop.f32.mrf.mxu1 }
 0x2a3   :  { %v4004_v36 = vadd.f32 %v6103_v34, %v4003_v35 }
 0x2a5   :  { %v4007_v37 = vmax.f32 %v4004_v36, 0.0 }
 0x2a7   :  { %v4008_v38 = vpack.c.bf16 %v4007_v37, %v4007_v37 }
 0x2a9   :  { %5696 = vmatmul.msk.bf16.vlgmr.msra.gmra.mxu2 %vm4045_vm0, %v4008_v38 }
 0x2aa   :  { %v4005_v39 = vpop.f32.mrf.mxu1 }
 0x32c   :  { %v4058_v41 = vpop.f32.mrf.mxu2 }
 0x32d   :  { %v4059_v42 = vadd.f32 %v6104_v40, %v4058_v41 }
 0x32f   :  { %4063 = vst.msk [vmem:[#allocation2] sm:$0x3] %vm4062_vm1, %v4059_v42 }
 0x330   :  { %4074 = dma.vmem_to_hbm [thread:$0]  %s4070_s23, 32, %s4072_s25, [#allocation3]  }
 0x334   :  { %v4060_v43 = vpop.f32.mrf.mxu2 }
 0x335   :  { %6129 = dma.done.wait [#allocation3], 32  }
 0x336   :  { %6130 = vsyncadd [#allocation3], 4294967264 }
 0x337   :  { %4079 = vsyncpa [#allocation3], 1 }

</bundles_post_ra>
